<compile_context>
chip_gen: v5e
topology: v5e:2x2
jax: 0.10.0
libtpu: 0.0.40
codegen_flags: <defaults>
</compile_context>

<pallas_src>
import functools
import numpy as np
import jax
import jax.numpy as jnp
from jax.experimental import pallas as pl
from jax.experimental.pallas import tpu as pltpu


_LEAKY_SLOPE = 0.2
_VMEM_LIMIT = 32 * 1024 * 1024


def _leaky_relu(x, slope=_LEAKY_SLOPE):
    return jnp.where(x > 0, x, slope * x)


def _pick_tile(n, target):
    """Largest t <= target with n % t == 0 and (t % 8 == 0); falls back to n."""
    if n <= target:
        return n
    for t in range(min(n, target), 7, -1):
        if n % t == 0 and t % 8 == 0:
            return t
    return n


# ----------------------------------------------------------------------------
# Kernel 1: fused encoding + U/V/W MLP branches (+ optional hadamard reduction)
# ----------------------------------------------------------------------------
def fused_forward_kernel(x_ref, scale_ref, phase_ref,
                         w1_ref, b1_ref, w2_ref, b2_ref,
                         w3_ref, b3_ref, w4_ref, b4_ref,
                         *out_refs, reduce_product):
    """x tile (TN,3) -> per-branch Gaussian encoding -> 4-layer MLP.

    reduce_product=False: writes U, V, W tiles (TN, rank).
    reduce_product=True : writes sum_r(U*V*W) as a (TN, 1) tile (flag==1 path).
    """
    x = x_ref[...]                         # (TN, 3)
    scale = scale_ref[...]                 # (1, posdim) == 2*pi*[b, b]
    phase = phase_ref[...]                 # (1, posdim) == [0, -pi/2]  (cos->sin)
    prod = None
    for br in range(3):                    # static unroll over the 3 branches
        # GaussianEncoding: [cos(2*pi*x*b), sin(2*pi*x*b)] == cos(x*scale + phase)
        coords = jnp.cos(x[:, br:br + 1] * scale + phase)        # (TN, posdim)
        h = jnp.dot(coords, w1_ref[br],
                    preferred_element_type=jnp.float32) + b1_ref[br]
        h = _leaky_relu(h)
        h = jnp.dot(h, w2_ref[br],
                    preferred_element_type=jnp.float32) + b2_ref[br]
        h = _leaky_relu(h)
        h = jnp.dot(h, w3_ref[br],
                    preferred_element_type=jnp.float32) + b3_ref[br]
        h = _leaky_relu(h)
        h = jnp.dot(h, w4_ref[br],
                    preferred_element_type=jnp.float32) + b4_ref[br]
        if reduce_product:
            prod = h if prod is None else prod * h
        else:
            out_refs[br][...] = h
    if reduce_product:
        out_refs[0][...] = jnp.sum(prod, axis=-1, keepdims=True)


def run_fused_forward(params, x, *, reduce_product, row_tile=512):
    N = x.shape[0]
    posdim = 2 * params["enc_b"].shape[0]
    rank = params["U"]["w4"].shape[1]

    tn = _pick_tile(N, row_tile)
    grid = (N // tn,)

    # Stack U/V/W branch params on a leading axis: 8 VMEM-resident inputs.
    def _stack(name):
        return jnp.stack(
            [params["U"][name], params["V"][name], params["W"][name]], axis=0)
    stacked = [_stack(n) for n in ("w1", "b1", "w2", "b2", "w3", "b3", "w4", "b4")]

    b = params["enc_b"].reshape(-1)                                  # (posdim//2,)
    scale = (2.0 * np.pi) * jnp.concatenate([b, b])[None, :]          # (1, posdim)
    phase = jnp.concatenate(
        [jnp.zeros_like(b), jnp.full_like(b, -0.5 * np.pi)])[None, :]  # (1, posdim)

    def _resident(shape):
        nd = len(shape)
        return pl.BlockSpec(shape, lambda i, _nd=nd: (0,) * _nd)

    in_specs = [pl.BlockSpec((tn, 3), lambda i: (i, 0)),
                _resident((1, posdim)), _resident((1, posdim))]
    in_specs += [_resident(tuple(w.shape)) for w in stacked]

    if reduce_product:
        out_shape = jax.ShapeDtypeStruct((N, 1), jnp.float32)
        out_specs = pl.BlockSpec((tn, 1), lambda i: (i, 0))
    else:
        out_shape = tuple(jax.ShapeDtypeStruct((N, rank), jnp.float32)
                          for _ in range(3))
        out_specs = tuple(pl.BlockSpec((tn, rank), lambda i: (i, 0))
                          for _ in range(3))

    kernel = functools.partial(fused_forward_kernel,
                               reduce_product=reduce_product)
    return pl.pallas_call(
        kernel,
        out_shape=out_shape,
        grid=grid,
        in_specs=in_specs,
        out_specs=out_specs,
        compiler_params=pltpu.CompilerParams(
            dimension_semantics=("parallel",),
            vmem_limit_bytes=_VMEM_LIMIT),
    )(x, scale, phase, *stacked)


# ----------------------------------------------------------------------------
# Kernel 2: rank contraction einsum('ir,jr,kr->ijk') tiled over (i, j)
# ----------------------------------------------------------------------------
def triple_outer_kernel(u_ref, v_ref, wt_ref, o_ref, *, ti):
    u = u_ref[...]            # (TI, R)
    v = v_ref[...]            # (TJ, R)
    wt = wt_ref[...]          # (R, N)  -- pre-transposed once in the wrapper
    for il in range(ti):      # static unroll; each iter is one MXU dot
        uv = v * u[il:il + 1, :]                                  # (TJ, R)
        o_ref[il, :, :] = jnp.dot(uv, wt,
                                  preferred_element_type=jnp.float32)


def run_triple_outer(U, V, W, *, ti_target=None, tj_target=256,
                     block_budget_bytes=4 * 1024 * 1024):
    N, R = U.shape
    Wt = W.T                  # single tiny transpose outside the kernel

    tj = _pick_tile(N, tj_target)
    if ti_target is None:
        ti_target = max(8, block_budget_bytes // (tj * N * 4))
    ti = _pick_tile(N, min(ti_target, 64))

    kernel = functools.partial(triple_outer_kernel, ti=ti)
    return pl.pallas_call(
        kernel,
        out_shape=jax.ShapeDtypeStruct((N, N, N), jnp.float32),
        grid=(N // ti, N // tj),
        in_specs=[pl.BlockSpec((ti, R), lambda i, j: (i, 0)),
                  pl.BlockSpec((tj, R), lambda i, j: (j, 0)),
                  pl.BlockSpec((R, N), lambda i, j: (0, 0))],
        out_specs=pl.BlockSpec((ti, tj, N), lambda i, j: (i, j, 0)),
        compiler_params=pltpu.CompilerParams(
            dimension_semantics=("parallel", "parallel"),
            vmem_limit_bytes=_VMEM_LIMIT),
    )(U, V, Wt)


# ----------------------------------------------------------------------------
# Parameter initialisation (mimics the PyTorch init semantics)
# ----------------------------------------------------------------------------
def _init_branch(key, posdim, mid, rank):
    ks = jax.random.split(key, 8)
    leaky_gain = float(np.sqrt(2.0 / (1.0 + 0.2 ** 2)))   # calculate_gain('leaky_relu', 0.2)

    def xavier(k, fan_in, fan_out):
        lim = leaky_gain * np.sqrt(6.0 / (fan_in + fan_out))
        return jax.random.uniform(k, (fan_in, fan_out), jnp.float32, -lim, lim)

    def bias(k, fan_in, fan_out):
        lim = 1.0 / np.sqrt(fan_in)
        return jax.random.uniform(k, (1, fan_out), jnp.float32, -lim, lim)

    return {
        "w1": jax.random.uniform(ks[0], (posdim, mid), jnp.float32,
                                 -1.0 / posdim, 1.0 / posdim),
        "b1": bias(ks[1], posdim, mid),
        "w2": xavier(ks[2], mid, mid),
        "b2": bias(ks[3], mid, mid),
        "w3": xavier(ks[4], mid, mid),
        "b3": bias(ks[5], mid, mid),
        "w4": jax.random.uniform(ks[6], (mid, rank), jnp.float32,
                                 -1.0 / np.sqrt(mid), 1.0 / np.sqrt(mid)),
        "b4": bias(ks[7], mid, rank),
    }


def make_network_params(key, rank, mid_channel, posdim):
    ku, kv, kw, kb = jax.random.split(key, 4)
    return {
        "U": _init_branch(ku, posdim, mid_channel, rank),
        "V": _init_branch(kv, posdim, mid_channel, rank),
        "W": _init_branch(kw, posdim, mid_channel, rank),
        # GaussianEncoding(sigma=1.0): b ~ N(0, 1), shape (posdim//2, 1)
        "enc_b": jax.random.normal(kb, (posdim // 2, 1), jnp.float32),
    }


# ----------------------------------------------------------------------------
# Network forward (flag must be a static Python int)
# ----------------------------------------------------------------------------
def network_forward(params, x, flag, *, row_tile=512, ti_target=None, tj_target=256):
    if flag == 1:
        out = run_fused_forward(params, x, reduce_product=True, row_tile=row_tile)
        return out[:, 0]
    elif flag in (2, 3):
        U, V, W = run_fused_forward(params, x, reduce_product=False, row_tile=row_tile)
        T = run_triple_outer(U, V, W, ti_target=ti_target, tj_target=tj_target)
        return T if flag == 2 else (T, U, V, W)
    else:
        raise NotImplementedError


# ----------------------------------------------------------------------------
# Pure-JAX reference (for correctness checking only)
# ----------------------------------------------------------------------------
def _reference_forward(params, x, flag):
    hp = jax.lax.Precision.HIGHEST

    def enc(col):
        vp = 2.0 * np.pi * jnp.dot(col, params["enc_b"].T, precision=hp)
        return jnp.concatenate([jnp.cos(vp), jnp.sin(vp)], axis=-1)

    def branch(c, p):
        h = jnp.dot(c, p["w1"], precision=hp) + p["b1"]
        h = jnp.where(h > 0, h, 0.2 * h)
        h = jnp.dot(h, p["w2"], precision=hp) + p["b2"]
        h = jnp.where(h > 0, h, 0.2 * h)
        h = jnp.dot(h, p["w3"], precision=hp) + p["b3"]
        h = jnp.where(h > 0, h, 0.2 * h)
        return jnp.dot(h, p["w4"], precision=hp) + p["b4"]

    U = branch(enc(x[:, 0:1]), params["U"])
    V = branch(enc(x[:, 1:2]), params["V"])
    W = branch(enc(x[:, 2:3]), params["W"])
    if flag == 1:
        return jnp.einsum('nr,nr,nr->n', U, V, W)
    T = jnp.einsum('ir,jr,kr->ijk', U, V, W, precision=hp)
    return T if flag == 2 else (T, U, V, W)


# ----------------------------------------------------------------------------
if __name__ == "__main__":
    Rank, mid_channel, posdim = 8, 32, 8
    N = 64

    key = jax.random.PRNGKey(0)
    kp, kx = jax.random.split(key)
    params = make_network_params(kp, Rank, mid_channel, posdim)
    x = jax.random.uniform(kx, (N, 3), jnp.float32)   # point-cloud coordinates

    # Small tiles so the demo exercises multi-step grids on both kernels.
    out1 = network_forward(params, x, flag=1, row_tile=32)
    out2 = network_forward(params, x, flag=2, row_tile=32,
                           ti_target=32, tj_target=32)
    out3, U, V, W = network_forward(params, x, flag=3, row_tile=32,
                                    ti_target=32, tj_target=32)
    jax.block_until_ready((out1, out2, out3, U, V, W))

    assert out1.shape == (N,)
    assert out2.shape == (N, N, N)
    assert U.shape == V.shape == W.shape == (N, Rank)

    # flag-1 (fused in-kernel reduction) must match the diagonal of flag-2.
    diag = out2[jnp.arange(N), jnp.arange(N), jnp.arange(N)]
    np.testing.assert_allclose(np.asarray(diag), np.asarray(out1),
                               rtol=5e-3, atol=5e-4)

    # Pure-JAX reference check.
    ref1 = _reference_forward(params, x, 1)
    ref2 = _reference_forward(params, x, 2)
    np.testing.assert_allclose(np.asarray(out1), np.asarray(ref1),
                               rtol=5e-3, atol=5e-4)
    np.testing.assert_allclose(np.asarray(out2), np.asarray(ref2),
                               rtol=5e-3, atol=5e-4)

    print("KERNEL_OK")
</pallas_src>

<mosaic_0001>
module attributes {stable_mosaic.version = 11 : i64} {
  func.func @fused_forward_kernel(%arg0: i32, %arg1: memref<32x3xf32, #tpu.memory_space<vmem>>, %arg2: memref<1x8xf32, #tpu.memory_space<vmem>>, %arg3: memref<1x8xf32, #tpu.memory_space<vmem>>, %arg4: memref<3x8x32xf32, #tpu.memory_space<vmem>>, %arg5: memref<3x1x32xf32, #tpu.memory_space<vmem>>, %arg6: memref<3x32x32xf32, #tpu.memory_space<vmem>>, %arg7: memref<3x1x32xf32, #tpu.memory_space<vmem>>, %arg8: memref<3x32x32xf32, #tpu.memory_space<vmem>>, %arg9: memref<3x1x32xf32, #tpu.memory_space<vmem>>, %arg10: memref<3x32x8xf32, #tpu.memory_space<vmem>>, %arg11: memref<3x1x8xf32, #tpu.memory_space<vmem>>, %arg12: memref<32x1xf32, #tpu.memory_space<vmem>>) attributes {dimension_semantics = [#tpu.dimension_semantics<parallel>], iteration_bounds = array<i64: 2>, scalar_prefetch = 0 : i64, scratch_operands = 0 : i64, tpu.core_type = #tpu.core_type<tc>, window_params = [{transform_indices = @transform_0, window_bounds = array<i64: 32, 3>}, {pipeline_mode = #tpu.pipeline_mode<synchronous>, transform_indices = @transform_1, window_bounds = array<i64: 1, 8>}, {pipeline_mode = #tpu.pipeline_mode<synchronous>, transform_indices = @transform_2, window_bounds = array<i64: 1, 8>}, {pipeline_mode = #tpu.pipeline_mode<synchronous>, transform_indices = @transform_3, window_bounds = array<i64: 3, 8, 32>}, {pipeline_mode = #tpu.pipeline_mode<synchronous>, transform_indices = @transform_4, window_bounds = array<i64: 3, 1, 32>}, {pipeline_mode = #tpu.pipeline_mode<synchronous>, transform_indices = @transform_5, window_bounds = array<i64: 3, 32, 32>}, {pipeline_mode = #tpu.pipeline_mode<synchronous>, transform_indices = @transform_6, window_bounds = array<i64: 3, 1, 32>}, {pipeline_mode = #tpu.pipeline_mode<synchronous>, transform_indices = @transform_7, window_bounds = array<i64: 3, 32, 32>}, {pipeline_mode = #tpu.pipeline_mode<synchronous>, transform_indices = @transform_8, window_bounds = array<i64: 3, 1, 32>}, {pipeline_mode = #tpu.pipeline_mode<synchronous>, transform_indices = @transform_9, window_bounds = array<i64: 3, 32, 8>}, {pipeline_mode = #tpu.pipeline_mode<synchronous>, transform_indices = @transform_10, window_bounds = array<i64: 3, 1, 8>}, {transform_indices = @transform_11, window_bounds = array<i64: 32, 1>}]} {
    %c0 = arith.constant 0 : index
    %c0_0 = arith.constant 0 : index
    %0 = vector.load %arg1[%c0, %c0_0] : memref<32x3xf32, #tpu.memory_space<vmem>>, vector<32x3xf32>
    %c0_1 = arith.constant 0 : index
    %c0_2 = arith.constant 0 : index
    %1 = vector.load %arg2[%c0_1, %c0_2] : memref<1x8xf32, #tpu.memory_space<vmem>>, vector<1x8xf32>
    %c0_3 = arith.constant 0 : index
    %c0_4 = arith.constant 0 : index
    %2 = vector.load %arg3[%c0_3, %c0_4] : memref<1x8xf32, #tpu.memory_space<vmem>>, vector<1x8xf32>
    %3 = vector.extract_strided_slice %0 {offsets = [0, 0], sizes = [32, 1], strides = [1, 1]} : vector<32x3xf32> to vector<32x1xf32>
    %4 = vector.broadcast %3 : vector<32x1xf32> to vector<32x8xf32>
    %5 = vector.broadcast %1 : vector<1x8xf32> to vector<32x8xf32>
    %6 = arith.mulf %4, %5 : vector<32x8xf32>
    %7 = vector.broadcast %2 : vector<1x8xf32> to vector<32x8xf32>
    %8 = arith.addf %6, %7 : vector<32x8xf32>
    %9 = math.cos %8 : vector<32x8xf32>
    %c0_5 = arith.constant 0 : index
    %c0_6 = arith.constant 0 : index
    %c0_7 = arith.constant 0 : index
    %10 = vector.load %arg4[%c0_5, %c0_6, %c0_7] : memref<3x8x32xf32, #tpu.memory_space<vmem>>, vector<1x8x32xf32>
    %11 = vector.shape_cast %10 : vector<1x8x32xf32> to vector<8x32xf32>
    %cst = arith.constant dense<0.000000e+00> : vector<32x32xf32>
    %12 = tpu.matmul %9, %11, %cst {dimension_numbers = #tpu.dot_dimension_numbers<[1], [0], [0], [1], [0, 0, 1, 1], [], []>} : vector<32x8xf32>, vector<8x32xf32>, vector<32x32xf32> -> vector<32x32xf32>
    %c0_8 = arith.constant 0 : index
    %c0_9 = arith.constant 0 : index
    %c0_10 = arith.constant 0 : index
    %13 = vector.load %arg5[%c0_8, %c0_9, %c0_10] : memref<3x1x32xf32, #tpu.memory_space<vmem>>, vector<1x1x32xf32>
    %14 = vector.shape_cast %13 : vector<1x1x32xf32> to vector<1x32xf32>
    %15 = vector.broadcast %14 : vector<1x32xf32> to vector<32x32xf32>
    %16 = arith.addf %12, %15 : vector<32x32xf32>
    %cst_11 = arith.constant 0.000000e+00 : f32
    %17 = vector.broadcast %cst_11 : f32 to vector<32x32xf32>
    %18 = arith.cmpf ogt, %16, %17 : vector<32x32xf32>
    %cst_12 = arith.constant 2.000000e-01 : f32
    %19 = vector.broadcast %cst_12 : f32 to vector<32x32xf32>
    %20 = arith.mulf %19, %16 : vector<32x32xf32>
    %21 = arith.select %18, %16, %20 : vector<32x32xi1>, vector<32x32xf32>
    %c0_13 = arith.constant 0 : index
    %c0_14 = arith.constant 0 : index
    %c0_15 = arith.constant 0 : index
    %22 = vector.load %arg6[%c0_13, %c0_14, %c0_15] : memref<3x32x32xf32, #tpu.memory_space<vmem>>, vector<1x32x32xf32>
    %23 = vector.shape_cast %22 : vector<1x32x32xf32> to vector<32x32xf32>
    %cst_16 = arith.constant dense<0.000000e+00> : vector<32x32xf32>
    %24 = tpu.matmul %21, %23, %cst_16 {dimension_numbers = #tpu.dot_dimension_numbers<[1], [0], [0], [1], [0, 0, 1, 1], [], []>} : vector<32x32xf32>, vector<32x32xf32>, vector<32x32xf32> -> vector<32x32xf32>
    %c0_17 = arith.constant 0 : index
    %c0_18 = arith.constant 0 : index
    %c0_19 = arith.constant 0 : index
    %25 = vector.load %arg7[%c0_17, %c0_18, %c0_19] : memref<3x1x32xf32, #tpu.memory_space<vmem>>, vector<1x1x32xf32>
    %26 = vector.shape_cast %25 : vector<1x1x32xf32> to vector<1x32xf32>
    %27 = vector.broadcast %26 : vector<1x32xf32> to vector<32x32xf32>
    %28 = arith.addf %24, %27 : vector<32x32xf32>
    %cst_20 = arith.constant 0.000000e+00 : f32
    %29 = vector.broadcast %cst_20 : f32 to vector<32x32xf32>
    %30 = arith.cmpf ogt, %28, %29 : vector<32x32xf32>
    %cst_21 = arith.constant 2.000000e-01 : f32
    %31 = vector.broadcast %cst_21 : f32 to vector<32x32xf32>
    %32 = arith.mulf %31, %28 : vector<32x32xf32>
    %33 = arith.select %30, %28, %32 : vector<32x32xi1>, vector<32x32xf32>
    %c0_22 = arith.constant 0 : index
    %c0_23 = arith.constant 0 : index
    %c0_24 = arith.constant 0 : index
    %34 = vector.load %arg8[%c0_22, %c0_23, %c0_24] : memref<3x32x32xf32, #tpu.memory_space<vmem>>, vector<1x32x32xf32>
    %35 = vector.shape_cast %34 : vector<1x32x32xf32> to vector<32x32xf32>
    %cst_25 = arith.constant dense<0.000000e+00> : vector<32x32xf32>
    %36 = tpu.matmul %33, %35, %cst_25 {dimension_numbers = #tpu.dot_dimension_numbers<[1], [0], [0], [1], [0, 0, 1, 1], [], []>} : vector<32x32xf32>, vector<32x32xf32>, vector<32x32xf32> -> vector<32x32xf32>
    %c0_26 = arith.constant 0 : index
    %c0_27 = arith.constant 0 : index
    %c0_28 = arith.constant 0 : index
    %37 = vector.load %arg9[%c0_26, %c0_27, %c0_28] : memref<3x1x32xf32, #tpu.memory_space<vmem>>, vector<1x1x32xf32>
    %38 = vector.shape_cast %37 : vector<1x1x32xf32> to vector<1x32xf32>
    %39 = vector.broadcast %38 : vector<1x32xf32> to vector<32x32xf32>
    %40 = arith.addf %36, %39 : vector<32x32xf32>
    %cst_29 = arith.constant 0.000000e+00 : f32
    %41 = vector.broadcast %cst_29 : f32 to vector<32x32xf32>
    %42 = arith.cmpf ogt, %40, %41 : vector<32x32xf32>
    %cst_30 = arith.constant 2.000000e-01 : f32
    %43 = vector.broadcast %cst_30 : f32 to vector<32x32xf32>
    %44 = arith.mulf %43, %40 : vector<32x32xf32>
    %45 = arith.select %42, %40, %44 : vector<32x32xi1>, vector<32x32xf32>
    %c0_31 = arith.constant 0 : index
    %c0_32 = arith.constant 0 : index
    %c0_33 = arith.constant 0 : index
    %46 = vector.load %arg10[%c0_31, %c0_32, %c0_33] : memref<3x32x8xf32, #tpu.memory_space<vmem>>, vector<1x32x8xf32>
    %47 = vector.shape_cast %46 : vector<1x32x8xf32> to vector<32x8xf32>
    %cst_34 = arith.constant dense<0.000000e+00> : vector<32x8xf32>
    %48 = tpu.matmul %45, %47, %cst_34 {dimension_numbers = #tpu.dot_dimension_numbers<[1], [0], [0], [1], [0, 0, 1, 1], [], []>} : vector<32x32xf32>, vector<32x8xf32>, vector<32x8xf32> -> vector<32x8xf32>
    %c0_35 = arith.constant 0 : index
    %c0_36 = arith.constant 0 : index
    %c0_37 = arith.constant 0 : index
    %49 = vector.load %arg11[%c0_35, %c0_36, %c0_37] : memref<3x1x8xf32, #tpu.memory_space<vmem>>, vector<1x1x8xf32>
    %50 = vector.shape_cast %49 : vector<1x1x8xf32> to vector<1x8xf32>
    %51 = vector.broadcast %50 : vector<1x8xf32> to vector<32x8xf32>
    %52 = arith.addf %48, %51 : vector<32x8xf32>
    %53 = vector.extract_strided_slice %0 {offsets = [0, 1], sizes = [32, 1], strides = [1, 1]} : vector<32x3xf32> to vector<32x1xf32>
    %54 = vector.broadcast %53 : vector<32x1xf32> to vector<32x8xf32>
    %55 = vector.broadcast %1 : vector<1x8xf32> to vector<32x8xf32>
    %56 = arith.mulf %54, %55 : vector<32x8xf32>
    %57 = vector.broadcast %2 : vector<1x8xf32> to vector<32x8xf32>
    %58 = arith.addf %56, %57 : vector<32x8xf32>
    %59 = math.cos %58 : vector<32x8xf32>
    %c1 = arith.constant 1 : index
    %c0_38 = arith.constant 0 : index
    %c0_39 = arith.constant 0 : index
    %60 = vector.load %arg4[%c1, %c0_38, %c0_39] : memref<3x8x32xf32, #tpu.memory_space<vmem>>, vector<1x8x32xf32>
    %61 = vector.shape_cast %60 : vector<1x8x32xf32> to vector<8x32xf32>
    %cst_40 = arith.constant dense<0.000000e+00> : vector<32x32xf32>
    %62 = tpu.matmul %59, %61, %cst_40 {dimension_numbers = #tpu.dot_dimension_numbers<[1], [0], [0], [1], [0, 0, 1, 1], [], []>} : vector<32x8xf32>, vector<8x32xf32>, vector<32x32xf32> -> vector<32x32xf32>
    %c1_41 = arith.constant 1 : index
    %c0_42 = arith.constant 0 : index
    %c0_43 = arith.constant 0 : index
    %63 = vector.load %arg5[%c1_41, %c0_42, %c0_43] : memref<3x1x32xf32, #tpu.memory_space<vmem>>, vector<1x1x32xf32>
    %64 = vector.shape_cast %63 : vector<1x1x32xf32> to vector<1x32xf32>
    %65 = vector.broadcast %64 : vector<1x32xf32> to vector<32x32xf32>
    %66 = arith.addf %62, %65 : vector<32x32xf32>
    %cst_44 = arith.constant 0.000000e+00 : f32
    %67 = vector.broadcast %cst_44 : f32 to vector<32x32xf32>
    %68 = arith.cmpf ogt, %66, %67 : vector<32x32xf32>
    %cst_45 = arith.constant 2.000000e-01 : f32
    %69 = vector.broadcast %cst_45 : f32 to vector<32x32xf32>
    %70 = arith.mulf %69, %66 : vector<32x32xf32>
    %71 = arith.select %68, %66, %70 : vector<32x32xi1>, vector<32x32xf32>
    %c1_46 = arith.constant 1 : index
    %c0_47 = arith.constant 0 : index
    %c0_48 = arith.constant 0 : index
    %72 = vector.load %arg6[%c1_46, %c0_47, %c0_48] : memref<3x32x32xf32, #tpu.memory_space<vmem>>, vector<1x32x32xf32>
    %73 = vector.shape_cast %72 : vector<1x32x32xf32> to vector<32x32xf32>
    %cst_49 = arith.constant dense<0.000000e+00> : vector<32x32xf32>
    %74 = tpu.matmul %71, %73, %cst_49 {dimension_numbers = #tpu.dot_dimension_numbers<[1], [0], [0], [1], [0, 0, 1, 1], [], []>} : vector<32x32xf32>, vector<32x32xf32>, vector<32x32xf32> -> vector<32x32xf32>
    %c1_50 = arith.constant 1 : index
    %c0_51 = arith.constant 0 : index
    %c0_52 = arith.constant 0 : index
    %75 = vector.load %arg7[%c1_50, %c0_51, %c0_52] : memref<3x1x32xf32, #tpu.memory_space<vmem>>, vector<1x1x32xf32>
    %76 = vector.shape_cast %75 : vector<1x1x32xf32> to vector<1x32xf32>
    %77 = vector.broadcast %76 : vector<1x32xf32> to vector<32x32xf32>
    %78 = arith.addf %74, %77 : vector<32x32xf32>
    %cst_53 = arith.constant 0.000000e+00 : f32
    %79 = vector.broadcast %cst_53 : f32 to vector<32x32xf32>
    %80 = arith.cmpf ogt, %78, %79 : vector<32x32xf32>
    %cst_54 = arith.constant 2.000000e-01 : f32
    %81 = vector.broadcast %cst_54 : f32 to vector<32x32xf32>
    %82 = arith.mulf %81, %78 : vector<32x32xf32>
    %83 = arith.select %80, %78, %82 : vector<32x32xi1>, vector<32x32xf32>
    %c1_55 = arith.constant 1 : index
    %c0_56 = arith.constant 0 : index
    %c0_57 = arith.constant 0 : index
    %84 = vector.load %arg8[%c1_55, %c0_56, %c0_57] : memref<3x32x32xf32, #tpu.memory_space<vmem>>, vector<1x32x32xf32>
    %85 = vector.shape_cast %84 : vector<1x32x32xf32> to vector<32x32xf32>
    %cst_58 = arith.constant dense<0.000000e+00> : vector<32x32xf32>
    %86 = tpu.matmul %83, %85, %cst_58 {dimension_numbers = #tpu.dot_dimension_numbers<[1], [0], [0], [1], [0, 0, 1, 1], [], []>} : vector<32x32xf32>, vector<32x32xf32>, vector<32x32xf32> -> vector<32x32xf32>
    %c1_59 = arith.constant 1 : index
    %c0_60 = arith.constant 0 : index
    %c0_61 = arith.constant 0 : index
    %87 = vector.load %arg9[%c1_59, %c0_60, %c0_61] : memref<3x1x32xf32, #tpu.memory_space<vmem>>, vector<1x1x32xf32>
    %88 = vector.shape_cast %87 : vector<1x1x32xf32> to vector<1x32xf32>
    %89 = vector.broadcast %88 : vector<1x32xf32> to vector<32x32xf32>
    %90 = arith.addf %86, %89 : vector<32x32xf32>
    %cst_62 = arith.constant 0.000000e+00 : f32
    %91 = vector.broadcast %cst_62 : f32 to vector<32x32xf32>
    %92 = arith.cmpf ogt, %90, %91 : vector<32x32xf32>
    %cst_63 = arith.constant 2.000000e-01 : f32
    %93 = vector.broadcast %cst_63 : f32 to vector<32x32xf32>
    %94 = arith.mulf %93, %90 : vector<32x32xf32>
    %95 = arith.select %92, %90, %94 : vector<32x32xi1>, vector<32x32xf32>
    %c1_64 = arith.constant 1 : index
    %c0_65 = arith.constant 0 : index
    %c0_66 = arith.constant 0 : index
    %96 = vector.load %arg10[%c1_64, %c0_65, %c0_66] : memref<3x32x8xf32, #tpu.memory_space<vmem>>, vector<1x32x8xf32>
    %97 = vector.shape_cast %96 : vector<1x32x8xf32> to vector<32x8xf32>
    %cst_67 = arith.constant dense<0.000000e+00> : vector<32x8xf32>
    %98 = tpu.matmul %95, %97, %cst_67 {dimension_numbers = #tpu.dot_dimension_numbers<[1], [0], [0], [1], [0, 0, 1, 1], [], []>} : vector<32x32xf32>, vector<32x8xf32>, vector<32x8xf32> -> vector<32x8xf32>
    %c1_68 = arith.constant 1 : index
    %c0_69 = arith.constant 0 : index
    %c0_70 = arith.constant 0 : index
    %99 = vector.load %arg11[%c1_68, %c0_69, %c0_70] : memref<3x1x8xf32, #tpu.memory_space<vmem>>, vector<1x1x8xf32>
    %100 = vector.shape_cast %99 : vector<1x1x8xf32> to vector<1x8xf32>
    %101 = vector.broadcast %100 : vector<1x8xf32> to vector<32x8xf32>
    %102 = arith.addf %98, %101 : vector<32x8xf32>
    %103 = arith.mulf %52, %102 : vector<32x8xf32>
    %104 = vector.extract_strided_slice %0 {offsets = [0, 2], sizes = [32, 1], strides = [1, 1]} : vector<32x3xf32> to vector<32x1xf32>
    %105 = vector.broadcast %104 : vector<32x1xf32> to vector<32x8xf32>
    %106 = vector.broadcast %1 : vector<1x8xf32> to vector<32x8xf32>
    %107 = arith.mulf %105, %106 : vector<32x8xf32>
    %108 = vector.broadcast %2 : vector<1x8xf32> to vector<32x8xf32>
    %109 = arith.addf %107, %108 : vector<32x8xf32>
    %110 = math.cos %109 : vector<32x8xf32>
    %c2 = arith.constant 2 : index
    %c0_71 = arith.constant 0 : index
    %c0_72 = arith.constant 0 : index
    %111 = vector.load %arg4[%c2, %c0_71, %c0_72] : memref<3x8x32xf32, #tpu.memory_space<vmem>>, vector<1x8x32xf32>
    %112 = vector.shape_cast %111 : vector<1x8x32xf32> to vector<8x32xf32>
    %cst_73 = arith.constant dense<0.000000e+00> : vector<32x32xf32>
    %113 = tpu.matmul %110, %112, %cst_73 {dimension_numbers = #tpu.dot_dimension_numbers<[1], [0], [0], [1], [0, 0, 1, 1], [], []>} : vector<32x8xf32>, vector<8x32xf32>, vector<32x32xf32> -> vector<32x32xf32>
    %c2_74 = arith.constant 2 : index
    %c0_75 = arith.constant 0 : index
    %c0_76 = arith.constant 0 : index
    %114 = vector.load %arg5[%c2_74, %c0_75, %c0_76] : memref<3x1x32xf32, #tpu.memory_space<vmem>>, vector<1x1x32xf32>
    %115 = vector.shape_cast %114 : vector<1x1x32xf32> to vector<1x32xf32>
    %116 = vector.broadcast %115 : vector<1x32xf32> to vector<32x32xf32>
    %117 = arith.addf %113, %116 : vector<32x32xf32>
    %cst_77 = arith.constant 0.000000e+00 : f32
    %118 = vector.broadcast %cst_77 : f32 to vector<32x32xf32>
    %119 = arith.cmpf ogt, %117, %118 : vector<32x32xf32>
    %cst_78 = arith.constant 2.000000e-01 : f32
    %120 = vector.broadcast %cst_78 : f32 to vector<32x32xf32>
    %121 = arith.mulf %120, %117 : vector<32x32xf32>
    %122 = arith.select %119, %117, %121 : vector<32x32xi1>, vector<32x32xf32>
    %c2_79 = arith.constant 2 : index
    %c0_80 = arith.constant 0 : index
    %c0_81 = arith.constant 0 : index
    %123 = vector.load %arg6[%c2_79, %c0_80, %c0_81] : memref<3x32x32xf32, #tpu.memory_space<vmem>>, vector<1x32x32xf32>
    %124 = vector.shape_cast %123 : vector<1x32x32xf32> to vector<32x32xf32>
    %cst_82 = arith.constant dense<0.000000e+00> : vector<32x32xf32>
    %125 = tpu.matmul %122, %124, %cst_82 {dimension_numbers = #tpu.dot_dimension_numbers<[1], [0], [0], [1], [0, 0, 1, 1], [], []>} : vector<32x32xf32>, vector<32x32xf32>, vector<32x32xf32> -> vector<32x32xf32>
    %c2_83 = arith.constant 2 : index
    %c0_84 = arith.constant 0 : index
    %c0_85 = arith.constant 0 : index
    %126 = vector.load %arg7[%c2_83, %c0_84, %c0_85] : memref<3x1x32xf32, #tpu.memory_space<vmem>>, vector<1x1x32xf32>
    %127 = vector.shape_cast %126 : vector<1x1x32xf32> to vector<1x32xf32>
    %128 = vector.broadcast %127 : vector<1x32xf32> to vector<32x32xf32>
    %129 = arith.addf %125, %128 : vector<32x32xf32>
    %cst_86 = arith.constant 0.000000e+00 : f32
    %130 = vector.broadcast %cst_86 : f32 to vector<32x32xf32>
    %131 = arith.cmpf ogt, %129, %130 : vector<32x32xf32>
    %cst_87 = arith.constant 2.000000e-01 : f32
    %132 = vector.broadcast %cst_87 : f32 to vector<32x32xf32>
    %133 = arith.mulf %132, %129 : vector<32x32xf32>
    %134 = arith.select %131, %129, %133 : vector<32x32xi1>, vector<32x32xf32>
    %c2_88 = arith.constant 2 : index
    %c0_89 = arith.constant 0 : index
    %c0_90 = arith.constant 0 : index
    %135 = vector.load %arg8[%c2_88, %c0_89, %c0_90] : memref<3x32x32xf32, #tpu.memory_space<vmem>>, vector<1x32x32xf32>
    %136 = vector.shape_cast %135 : vector<1x32x32xf32> to vector<32x32xf32>
    %cst_91 = arith.constant dense<0.000000e+00> : vector<32x32xf32>
    %137 = tpu.matmul %134, %136, %cst_91 {dimension_numbers = #tpu.dot_dimension_numbers<[1], [0], [0], [1], [0, 0, 1, 1], [], []>} : vector<32x32xf32>, vector<32x32xf32>, vector<32x32xf32> -> vector<32x32xf32>
    %c2_92 = arith.constant 2 : index
    %c0_93 = arith.constant 0 : index
    %c0_94 = arith.constant 0 : index
    %138 = vector.load %arg9[%c2_92, %c0_93, %c0_94] : memref<3x1x32xf32, #tpu.memory_space<vmem>>, vector<1x1x32xf32>
    %139 = vector.shape_cast %138 : vector<1x1x32xf32> to vector<1x32xf32>
    %140 = vector.broadcast %139 : vector<1x32xf32> to vector<32x32xf32>
    %141 = arith.addf %137, %140 : vector<32x32xf32>
    %cst_95 = arith.constant 0.000000e+00 : f32
    %142 = vector.broadcast %cst_95 : f32 to vector<32x32xf32>
    %143 = arith.cmpf ogt, %141, %142 : vector<32x32xf32>
    %cst_96 = arith.constant 2.000000e-01 : f32
    %144 = vector.broadcast %cst_96 : f32 to vector<32x32xf32>
    %145 = arith.mulf %144, %141 : vector<32x32xf32>
    %146 = arith.select %143, %141, %145 : vector<32x32xi1>, vector<32x32xf32>
    %c2_97 = arith.constant 2 : index
    %c0_98 = arith.constant 0 : index
    %c0_99 = arith.constant 0 : index
    %147 = vector.load %arg10[%c2_97, %c0_98, %c0_99] : memref<3x32x8xf32, #tpu.memory_space<vmem>>, vector<1x32x8xf32>
    %148 = vector.shape_cast %147 : vector<1x32x8xf32> to vector<32x8xf32>
    %cst_100 = arith.constant dense<0.000000e+00> : vector<32x8xf32>
    %149 = tpu.matmul %146, %148, %cst_100 {dimension_numbers = #tpu.dot_dimension_numbers<[1], [0], [0], [1], [0, 0, 1, 1], [], []>} : vector<32x32xf32>, vector<32x8xf32>, vector<32x8xf32> -> vector<32x8xf32>
    %c2_101 = arith.constant 2 : index
    %c0_102 = arith.constant 0 : index
    %c0_103 = arith.constant 0 : index
    %150 = vector.load %arg11[%c2_101, %c0_102, %c0_103] : memref<3x1x8xf32, #tpu.memory_space<vmem>>, vector<1x1x8xf32>
    %151 = vector.shape_cast %150 : vector<1x1x8xf32> to vector<1x8xf32>
    %152 = vector.broadcast %151 : vector<1x8xf32> to vector<32x8xf32>
    %153 = arith.addf %149, %152 : vector<32x8xf32>
    %154 = arith.mulf %103, %153 : vector<32x8xf32>
    %cst_104 = arith.constant dense<0.000000e+00> : vector<32xf32>
    %155 = vector.multi_reduction <add>, %154, %cst_104 [1] : vector<32x8xf32> to vector<32xf32>
    %156 = vector.shape_cast %155 : vector<32xf32> to vector<32x1xf32>
    %c0_105 = arith.constant 0 : index
    %c0_106 = arith.constant 0 : index
    %157 = vector.load %arg12[%c0_105, %c0_106] : memref<32x1xf32, #tpu.memory_space<vmem>>, vector<32x1xf32>
    tpu.vector_store %arg12[%c0_105, %c0_106], %156 {strides = array<i32>} : memref<32x1xf32, #tpu.memory_space<vmem>>, vector<32x1xf32>,
    return
  }
  func.func @transform_0(%arg0: i32) -> (i32, i32) {
    %c0_i32 = arith.constant 0 : i32
    %c0_i32_0 = arith.constant 0 : i32
    return %arg0, %c0_i32 : i32, i32
  }
  func.func @transform_1(%arg0: i32) -> (i32, i32) {
    %c0_i32 = arith.constant 0 : i32
    %c0_i32_0 = arith.constant 0 : i32
    %c0_i32_1 = arith.constant 0 : i32
    return %c0_i32, %c0_i32_0 : i32, i32
  }
  func.func @transform_2(%arg0: i32) -> (i32, i32) {
    %c0_i32 = arith.constant 0 : i32
    %c0_i32_0 = arith.constant 0 : i32
    %c0_i32_1 = arith.constant 0 : i32
    return %c0_i32, %c0_i32_0 : i32, i32
  }
  func.func @transform_3(%arg0: i32) -> (i32, i32, i32) {
    %c0_i32 = arith.constant 0 : i32
    %c0_i32_0 = arith.constant 0 : i32
    %c0_i32_1 = arith.constant 0 : i32
    %c0_i32_2 = arith.constant 0 : i32
    return %c0_i32, %c0_i32_0, %c0_i32_1 : i32, i32, i32
  }
  func.func @transform_4(%arg0: i32) -> (i32, i32, i32) {
    %c0_i32 = arith.constant 0 : i32
    %c0_i32_0 = arith.constant 0 : i32
    %c0_i32_1 = arith.constant 0 : i32
    %c0_i32_2 = arith.constant 0 : i32
    return %c0_i32, %c0_i32_0, %c0_i32_1 : i32, i32, i32
  }
  func.func @transform_5(%arg0: i32) -> (i32, i32, i32) {
    %c0_i32 = arith.constant 0 : i32
    %c0_i32_0 = arith.constant 0 : i32
    %c0_i32_1 = arith.constant 0 : i32
    %c0_i32_2 = arith.constant 0 : i32
    return %c0_i32, %c0_i32_0, %c0_i32_1 : i32, i32, i32
  }
  func.func @transform_6(%arg0: i32) -> (i32, i32, i32) {
    %c0_i32 = arith.constant 0 : i32
    %c0_i32_0 = arith.constant 0 : i32
    %c0_i32_1 = arith.constant 0 : i32
    %c0_i32_2 = arith.constant 0 : i32
    return %c0_i32, %c0_i32_0, %c0_i32_1 : i32, i32, i32
  }
  func.func @transform_7(%arg0: i32) -> (i32, i32, i32) {
    %c0_i32 = arith.constant 0 : i32
    %c0_i32_0 = arith.constant 0 : i32
    %c0_i32_1 = arith.constant 0 : i32
    %c0_i32_2 = arith.constant 0 : i32
    return %c0_i32, %c0_i32_0, %c0_i32_1 : i32, i32, i32
  }
  func.func @transform_8(%arg0: i32) -> (i32, i32, i32) {
    %c0_i32 = arith.constant 0 : i32
    %c0_i32_0 = arith.constant 0 : i32
    %c0_i32_1 = arith.constant 0 : i32
    %c0_i32_2 = arith.constant 0 : i32
    return %c0_i32, %c0_i32_0, %c0_i32_1 : i32, i32, i32
  }
  func.func @transform_9(%arg0: i32) -> (i32, i32, i32) {
    %c0_i32 = arith.constant 0 : i32
    %c0_i32_0 = arith.constant 0 : i32
    %c0_i32_1 = arith.constant 0 : i32
    %c0_i32_2 = arith.constant 0 : i32
    return %c0_i32, %c0_i32_0, %c0_i32_1 : i32, i32, i32
  }
  func.func @transform_10(%arg0: i32) -> (i32, i32, i32) {
    %c0_i32 = arith.constant 0 : i32
    %c0_i32_0 = arith.constant 0 : i32
    %c0_i32_1 = arith.constant 0 : i32
    %c0_i32_2 = arith.constant 0 : i32
    return %c0_i32, %c0_i32_0, %c0_i32_1 : i32, i32, i32
  }
  func.func @transform_11(%arg0: i32) -> (i32, i32) {
    %c0_i32 = arith.constant 0 : i32
    %c0_i32_0 = arith.constant 0 : i32
    return %arg0, %c0_i32 : i32, i32
  }
}

</mosaic_0001>

<bundles_post_ra>
// kernel: tpu_custom_call.1
= control target key start
LH: loop header
LB: loop body
LE: loop exit
PB: predicated region body
PF: predicated region fallthrough
CT: control target
= control target key end

     0   :  { %16 = vsyncpa [#allocation3], 0  ;;  %s3430_s17 = smov 0   ;;  %s5265_s0 = inlined_call_operand.vmem [shape: f32[64,3], index: 0, kind: input, shape index: {}]   ;;  %s5266_s1 = inlined_call_operand.vmem [shape: f32[1,8], index: 1, kind: input, shape index: {}]   ;;  %s5267_s2 = inlined_call_operand.vmem [shape: f32[1,8], index: 2, kind: input, shape index: {}]   ;;  %s5268_s3 = inlined_call_operand.vmem [shape: f32[3,8,32], index: 3, kind: input, shape index: {}]   ;;  %s5269_s4 = inlined_call_operand.vmem [shape: f32[3,1,32], index: 4, kind: input, shape index: {}]   ;;  %s5270_s5 = inlined_call_operand.vmem [shape: f32[3,32,32], index: 5, kind: input, shape index: {}]   ;;  %s5271_s6 = inlined_call_operand.vmem [shape: f32[3,1,32], index: 6, kind: input, shape index: {}]   ;;  %s5272_s7 = inlined_call_operand.hbm [shape: f32[3,32,32], index: 7, kind: input, shape index: {}]   ;;  %s5273_s8 = inlined_call_operand.vmem [shape: f32[3,1,32], index: 8, kind: input, shape index: {}]   ;;  %s5274_s9 = inlined_call_operand.vmem [shape: f32[3,32,8], index: 9, kind: input, shape index: {}]   ;;  %s5275_s10 = inlined_call_operand.vmem [shape: f32[3,1,8], index: 10, kind: input, shape index: {}]   ;;  %s5276_s11 = inlined_call_operand.vmem [shape: f32[64,1], index: 11, kind: output, shape index: {}]  }
   0x1 LB: > { %s318_s20 = sshll.u32 %s5272_s7, 4  ;;  %s3141_s21 = sadd.s32 4294967295, %s3356_s17   ;;  %s3356_s17 = sphi %s3430_s17, %s22_s17   ;;  %s319_s20 = int_to_ptr.hbm [resolvable:$true] %s318_s20 }
   0x2   : > { %p3143_p0 = scmp.ge.s32.totalorder %s3356_s17, 1  ;;  %p289_p1 = scmp.lt.s32.totalorder %s3356_s17, 3 }
   0x3   : > { %p3272_p2 = scmp.eq.s32.totalorder %s3141_s21, 0  ;;  %s3358_s22 = smov [#allocation2]  }
   0x4   : > { %p290_p3 = pnand %p3143_p0, %p289_p1  ;;  %s320_s23 = sshll.u32 %s3358_s22, 4  ;;  %s321_s23 = int_to_ptr.vmem [resolvable:$true] %s320_s23 }
   0x5   : > { %s3359_s24 = smov 128   ;;  %s3360_s25 = smov 8  }
   0x6   : > { %p3268_p4 = pneg %p290_p3  ;;  %354 = sbr.rel (%p290_p3) target bundleno = 1273 (0x4f9), region = 64 }
   0x8   : > { %p3269_p5 = pnand %p3272_p2, %p3268_p4 }
   0xa   : > { %3271 = dma.hbm_to_vmem [thread:$0]  (!%p3269_p5), %s319_s20, 1536, %s321_s23, [#allocation3], %s3359_s24, %s3359_s24, %s3360_s25  }
   0xb   : > { %3351 = dma.done.wait (%p3272_p2), [#allocation3], 1536  }
   0xc   : > { %3353 = vsyncadd (%p3272_p2), [#allocation3], 4294965760  ;;  %s3148_s26 = sshll.u32 %s3141_s21, 2  ;;  %v3361_v0 = vmov 1   ;;  %v5291_v1 = vmov 0   ;;  %v3363_v6 = vmov 2  }
   0xd   : > { %3296 = vset.pattern.permute.xlu2 %v3361_v0  ;;  %3295 = vset.pattern.permute.xlu1 %v5291_v1  ;;  %p396_p6 = scmp.lt.s32.totalorder %s3148_s26, 7  ;;  %v3454_v7 = vld [vmem:[%s5266_s1] ss:$0 sm:$0xff]  ;;  %v5285_v51 = vmov 920167782  }
   0xe   : > { %3294 = vset.pattern.permute.xlu0 %v5291_v1  ;;  %v3459_v8 = vld [vmem:[%s5267_s2] ss:$0 sm:$0xff]  ;;  %v5283_v53 = vmov 1326507024   ;;  %v5281_v61 = vmov 2102212464  }
   0xf   : > { %s5398_s26 = smov (!%p396_p6, %s3148_s26), 7  ;;  %v1063_v56 = vld [vmem:[%s5268_s3] sm:$0xff] }
  0x10   : > { %s3149_s27 = sshll.u32 %s5398_s26, 3  ;;  %1096 = vmatpush.msra.mxu0 %v1063_v56 }
  0x11   : > { %s399_s30 = scalar_lea.vmem %s5265_s0, %s3149_s27  ;;  %s405_s16 = scalar_lea.vmem %s5276_s11, %s3149_s27 }
  0x12   : > { %v409_v2 = vld [vmem:[%s399_s30 + $0x10] sm:$0xff]  ;;  %v407_v3 = vld [vmem:[%s399_s30] sm:$0xff]  ;;  %v410_v4 = vld [vmem:[%s399_s30 + $0x18] sm:$0xff] }
  0x13   : > { %425 = vperm.xlu1 %3295, %v409_v2   ;;  %1295 = vperm.xlu2 %3296, %v407_v3   ;;  %v408_v5 = vld [vmem:[%s399_s30 + $0x8] sm:$0xff] }
  0x14   : > { %415 = vperm.xlu0 %3294, %v407_v3  }
  0x1b   : > { %430 = vperm.xlu1 %3295, %v410_v4   ;;  %1299 = vperm.xlu2 %3296, %v408_v5  }
  0x1c   : > { %420 = vperm.xlu0 %3294, %v408_v5  }
  0x23   : > { %3298 = vset.pattern.permute.xlu1 %v3361_v0  ;;  %3299 = vset.pattern.permute.xlu2 %v3363_v6 }
  0x24   : > { %3297 = vset.pattern.permute.xlu0 %v3361_v0  ;;  %1307 = vperm.xlu1 %3298, %v410_v4  }
  0x25   : > { %2176 = vperm.xlu2 %3299, %v407_v3   ;;  %1303 = vperm.xlu0 %3297, %v409_v2  }
  0x2c   : > { %3300 = vset.pattern.permute.xlu1 %v3363_v6 }
  0x2d   : > { %2184 = vperm.xlu2 %3299, %v409_v2   ;;  %3301 = vset.pattern.permute.xlu0 %v3363_v6  ;;  %v5279_v2 = vmov 2475754826  }
  0x2e   : > { %2180 = vperm.xlu1 %3300, %v408_v5   ;;  %2188 = vperm.xlu0 %3301, %v410_v4   ;;  %v5287_v4 = vmov 2131351028  }
  0x6d   : > { %v1296_v9 = vpop.permute.xlu2 %1295 }
  0x6e   : > { %v1310_v10 = vmul.f32 %v3454_v7, %v1296_v9 }
  0x70   : > { %v3463_v11 = vadd.f32 %v3459_v8, %v1310_v10 }
  0x72   : > { %v1321_v15 = vand.u32 2139095040, %v3463_v11 }
  0x74   : > { %v1322_v18 = vshrl.u32 %v1321_v15, 23 }
  0x75   : > { %v1300_v12 = vpop.permute.xlu2 %1299 }
  0x76   : > { %v1311_v13 = vmul.f32 %v3454_v7, %v1300_v12  ;;  %v3180_v20 = vadd.s32 4294967169, %v1322_v18 }
  0x78   : > { %v3467_v14 = vadd.f32 %v3459_v8, %v1311_v13  ;;  %v1328_v27 = vadd.s32 1, %v3180_v20 }
  0x7a   : > { %v1475_v33 = vand.u32 2139095040, %v3467_v14  ;;  %vm1329_vm0 = vcmp.gt.s32.totalorder %v1328_v27, 0 }
  0x7b   : > { %v1330_v41 = vsel %vm1329_vm0, %v1328_v27, 0 }
  0x7c   : > { %v1476_v42 = vshrl.u32 %v1475_v33, 23  ;;  %v3497_v48 = vand.u32 31, %v1330_v41  ;;  %v3509_v59 = vshrl.u32 %v1330_v41, 5 }
  0x7e   : > { %v3183_v49 = vadd.s32 4294967169, %v1476_v42  ;;  %v3512_v60 = vsub.s32 32, %v3497_v48  ;;  %v1344_v62 = vshll.u32 %v5281_v61, %v3497_v48  ;;  %vm1353_vm6 = vcmp.lt.s32.totalorder %v3509_v59, 4 }
  0x7f   : > { %v2177_v16 = vpop.permute.xlu2 %2176 }
  0x80   : > { %v2191_v17 = vmul.f32 %v3454_v7, %v2177_v16  ;;  %v1482_v10 = vadd.s32 1, %v3183_v49  ;;  %v1345_v20 = vshrl.u32 %v5285_v51, %v3512_v60 }
  0x82   : > { %v3472_v19 = vadd.f32 %v3459_v8, %v2191_v17  ;;  %vm1483_vm5 = vcmp.gt.s32.totalorder %v1482_v10, 0 }
  0x84   : > { %5316 = vst [vmem:[#allocation5_spill] sm:$0xff] %v3472_v19  ;;  %v2202_v21 = vand.u32 2139095040, %v3472_v19  ;;  %v5277_v44 = vand.u32 2147483647, %v3472_v19 }
  0x85   : > { %v426_v22 = vpop.permute.xlu1 %425 }
  0x86   : > { %v416_v23 = vpop.permute.xlu0 %415  ;;  %v2203_v24 = vshrl.u32 %v2202_v21, 23  ;;  %v438_v30 = vmul.f32 %v3454_v7, %v426_v22  ;;  %v2206_v50 = vand.u32 8388607, %v5277_v44  ;;  %v3530_v21 = vshll.u32 %v5285_v51, %v3497_v48 }
  0x87   : > { %v2185_v25 = vpop.permute.xlu2 %2184  ;;  %v436_v29 = vmul.f32 %v3454_v7, %v416_v23  ;;  %v3534_v22 = vshrl.u32 %v5283_v53, %v3512_v60 }
  0x88   : > { %v2193_v26 = vmul.f32 %v3454_v7, %v2185_v25  ;;  %v3221_v28 = vadd.s32 4294967169, %v2203_v24  ;;  %v3486_v37 = vadd.f32 %v3459_v8, %v438_v30  ;;  %v2207_v12 = vor.u32 8388608, %v2206_v50 }
  0x89   : > { %v3483_v34 = vadd.f32 %v3459_v8, %v436_v29  ;;  %v5289_v24 = vmov 683565275  }
  0x8a   : > { %v3479_v31 = vadd.f32 %v3459_v8, %v2193_v26  ;;  %v2209_v32 = vadd.s32 1, %v3221_v28  ;;  %v758_v47 = vand.u32 2139095040, %v3486_v37  ;;  %v3544_v33 = vshll.u32 %v2207_v12, 8 }
  0x8b   : > { %v450_v46 = vand.u32 2139095040, %v3483_v34 }
  0x8c   : > { %5317 = vst [vmem:[#allocation6_spill] sm:$0xff] %v3479_v31  ;;  %vm2210_vm1 = vcmp.gt.s32.totalorder %v2209_v32, 0  ;;  %v759_v58 = vshrl.u32 %v758_v47, 23  ;;  %v2510_v49 = vand.u32 2139095040, %v3479_v31  ;;  %v2248_v56 = vand.u32 65535, %v3544_v33 }
  0x8d   : > { %v431_v35 = vpop.permute.xlu1 %430  ;;  %v2211_v36 = vsel %vm2210_vm1, %v2209_v32, 0  ;;  %v451_v55 = vshrl.u32 %v450_v46, 23  ;;  %5318 = vst [vmem:[#allocation7_spill] sm:$0xff] %v3544_v33  ;;  %v1484_v46 = vsel %vm1483_vm5, %v1482_v10, 0 }
  0x8e   : > { %v439_v38 = vmul.f32 %v3454_v7, %v431_v35  ;;  %v421_v39 = vpop.permute.xlu0 %420  ;;  %v2213_v40 = vand.u32 31, %v2211_v36  ;;  %v3507_v57 = vshrl.u32 %v2211_v36, 5  ;;  %v3158_v18 = vadd.s32 4294967169, %v759_v58 }
  0x8f   : > { %v3152_v15 = vadd.s32 4294967169, %v451_v55  ;;  %v437_v23 = vmul.f32 %v3454_v7, %v421_v39  ;;  %v3546_v36 = vor.u32 %v1345_v20, %v1344_v62 }
  0x90   : > { %v3490_v43 = vadd.f32 %v3459_v8, %v439_v38  ;;  %v3493_v45 = vsub.s32 32, %v2213_v40  ;;  %v2228_v52 = vshll.u32 %v5285_v51, %v2213_v40  ;;  %v2219_v3 = vshll.u32 %v5279_v2, %v2213_v40 }
  0x91   : > { %v2222_v6 = vshll.u32 %v5287_v4, %v2213_v40  ;;  %v2225_v16 = vshll.u32 %v5281_v61, %v2213_v40  ;;  %vm2234_vm2 = vcmp.lt.s32.totalorder %v3507_v57, 4  ;;  %v2216_v25 = vshll.u32 %v5289_v24, %v2213_v40 }
  0x92   : > { %v2229_v54 = vshrl.u32 %v5283_v53, %v3493_v45  ;;  %v2220_v5 = vshrl.u32 %v5287_v4, %v3493_v45  ;;  %v2223_v9 = vshrl.u32 %v5281_v61, %v3493_v45  ;;  %v2226_v17 = vshrl.u32 %v5285_v51, %v3493_v45 }
  0x93   : > { %vm2231_vm3 = vcmp.lt.s32.totalorder %v3507_v57, 1  ;;  %v2217_v28 = vshrl.u32 %v5279_v2, %v3493_v45  ;;  %vm2233_vm4 = vcmp.lt.s32.totalorder %v3507_v57, 3  ;;  %v457_v30 = vadd.s32 1, %v3152_v15 }
  0x94   : > { %v2230_v13 = vor.u32 %v2229_v54, %v2228_v52  ;;  %v2221_v26 = vor.u32 %v2220_v5, %v2219_v3  ;;  %v2224_v27 = vor.u32 %v2223_v9, %v2222_v6  ;;  %v2227_v32 = vor.u32 %v2226_v17, %v2225_v16 }
  0x95   : > { %v765_v35 = vadd.s32 1, %v3158_v18  ;;  %v1349_v38 = vor.u32 %v3534_v22, %v3530_v21  ;;  %vm2232_vm7 = vcmp.lt.s32.totalorder %v3507_v57, 2  ;;  %v3557_v41 = vadd.f32 %v3459_v8, %v437_v23 }
  0x96   : > { %v1308_v63 = vpop.permute.xlu1 %1307  ;;  %v2244_v29 = vsel %vm2234_vm2, %v2230_v13, 1326507024  ;;  %v2243_v39 = vsel %vm2231_vm3, %v2221_v26, %v2224_v27  ;;  %v2218_v47 = vor.u32 %v2217_v28, %v2216_v25  ;;  %vm458_vm8 = vcmp.gt.s32.totalorder %v457_v30, 0 }
  0x97   : > { %v1304_v0 = vpop.permute.xlu0 %1303  ;;  %v2245_v40 = vsel %vm2233_vm4, %v2227_v32, %v2244_v29  ;;  %v1313_v42 = vmul.f32 %v3454_v7, %v1308_v63  ;;  %v2215_v54 = vshrl.u32 %v5289_v24, %v3493_v45  ;;  %v2240_v55 = vsel %vm2234_vm2, %v2227_v32, 920167782 }
  0x98   : > { %vm766_vm9 = vcmp.gt.s32.totalorder %v765_v35, 0  ;;  %v2246_v58 = vsel %vm2232_vm7, %v2243_v39, %v2245_v40  ;;  %v604_v62 = vand.u32 2139095040, %v3557_v41  ;;  %v1312_v3 = vmul.f32 %v3454_v7, %v1304_v0 }
  0x99   : > { %v3570_v63 = vadd.f32 %v3459_v8, %v1313_v42  ;;  %v2236_v5 = vsel %vm2234_vm2, %v2224_v27, 2102212464  ;;  %v459_v45 = vsel %vm458_vm8, %v457_v30, 0  ;;  %v2239_v10 = vsel %vm2231_vm3, %v2218_v47, %v2221_v26 }
  0x9a   : > { %v767_v12 = vsel %vm766_vm9, %v765_v35, 0  ;;  %v2511_v13 = vshrl.u32 %v2510_v49, 23  ;;  %v3580_v15 = vadd.f32 %v3459_v8, %v1312_v3  ;;  %v2241_v16 = vsel %vm2233_vm4, %v2224_v27, %v2240_v55 }
  0x9b   : > { %5319 = vst [vmem:[#allocation8_spill] sm:$0xff] %v3570_v63  ;;  %v2251_v0 = vshrl.u32 %v2246_v58, 16  ;;  %v2237_v20 = vsel %vm2233_vm4, %v2221_v26, %v2236_v5  ;;  %v461_v21 = vand.u32 31, %v459_v45  ;;  %v605_v22 = vshrl.u32 %v604_v62, 23 }
  0x9c   : > { %v3594_v23 = vand.u32 31, %v1484_v46  ;;  %v2242_v25 = vsel %vm2232_vm7, %v2239_v10, %v2241_v16  ;;  %v2249_v27 = vshrl.u32 %v3544_v33, 16  ;;  %v2250_v28 = vand.u32 65535, %v2246_v58 }
  0x9d   : > { %v3599_v29 = vand.u32 31, %v767_v12  ;;  %v3610_v30 = vmul.u32 %v2251_v0, %v2248_v56  ;;  %v3227_v32 = vadd.s32 4294967169, %v2511_v13  ;;  %v3614_v35 = vsel %vm1353_vm6, %v1349_v38, 1326507024 }
  0x9e   : > { %5321 = vst [vmem:[#allocation10_spill] sm:$0xff] %v3594_v23  ;;  %v462_v39 = vsub.s32 32, %v461_v21  ;;  %v3155_v40 = vadd.s32 4294967169, %v605_v22  ;;  %v5278_v42 = vand.u32 2147483647, %v3483_v34  ;;  %v3620_v49 = vsub.s32 32, %v3594_v23 }
  0x9f   : > { %5323 = vst [vmem:[#allocation12_spill] sm:$0xff] %v3610_v30  ;;  %v2273_v57 = vshrl.u32 %v2242_v25, 16  ;;  %v3626_v55 = vshrl.u32 %v767_v12, 5  ;;  %v3629_v38 = vsub.s32 32, %v3599_v29  ;;  %v2252_v58 = vmul.u32 %v2250_v28, %v2248_v56 }
  0xa0   : > { %v2181_v50 = vpop.permute.xlu1 %2180  ;;  %v2189_v52 = vpop.permute.xlu0 %2188  ;;  %5325 = vst [vmem:[#allocation14_spill] sm:$0xff] %v3620_v49  ;;  %v2256_v62 = vshll.u32 %v3610_v30, 16  ;;  %v912_v3 = vand.u32 2139095040, %v3490_v43  ;;  %v3633_v5 = vmul.u32 %v2251_v0, %v2249_v27  ;;  %v465_v10 = vshrl.u32 %v5279_v2, %v462_v39 }
  0xa1   : > { %v2192_v6 = vmul.f32 %v3454_v7, %v2181_v50  ;;  %v2194_v9 = vmul.f32 %v3454_v7, %v2189_v52  ;;  %v2235_v7 = vsel %vm2231_vm3, %v2215_v54, %v2218_v47  ;;  %v3617_v47 = vshrl.u32 %v1484_v46, 5 }
  0xa2   : > { %v3608_v26 = vsel %vm2232_vm7, %v2235_v7, %v2237_v20  ;;  %v2272_v50 = vand.u32 65535, %v2242_v25  ;;  %v3622_v52 = vmul.u32 %v2250_v28, %v2249_v27  ;;  %v2517_v46 = vadd.s32 1, %v3227_v32 }
  0xa3   : > { %v3585_v17 = vadd.f32 %v3459_v8, %v2192_v6  ;;  %v3588_v18 = vadd.f32 %v3459_v8, %v2194_v9  ;;  %v3604_v8 = vsel %vm1353_vm6, %v3546_v36, 920167782  ;;  %5322 = vst [vmem:[#allocation11_spill] sm:$0xff] %v3608_v26  ;;  %v611_v6 = vadd.s32 1, %v3155_v40 }
  0xa4   : > { %5324 = vst [vmem:[#allocation13_spill] sm:$0xff] %v3617_v47  ;;  %v454_v9 = vand.u32 8388607, %v5278_v42  ;;  %v3638_v13 = vmul.u32 %v2272_v50, %v2248_v56  ;;  %v3640_v12 = vmul.u32 %v2273_v57, %v2248_v56  ;;  %v3642_v16 = vmul.u32 %v2272_v50, %v2249_v27 }
  0xa5   : > { %5320 = vst [vmem:[#allocation9_spill] sm:$0xff] %v3588_v18  ;;  %v468_v7 = vshrl.u32 %v5287_v4, %v462_v39  ;;  %v3646_v22 = vmul.u32 %v2273_v57, %v2249_v27  ;;  %v464_v0 = vshll.u32 %v5289_v24, %v461_v21  ;;  %v467_v25 = vshll.u32 %v5279_v2, %v461_v21 }
  0xa6   : > { %5326 = vst [vmem:[#allocation15_spill] sm:$0xff] %v3622_v52  ;;  %vm3650_vm10 = vc.u32 %v2252_v58, %v2256_v62  ;;  %v460_v32 = vshrl.u32 %v459_v45, 5  ;;  %vm2518_vm11 = vcmp.gt.s32.totalorder %v2517_v46, 0  ;;  %v913_v56 = vshrl.u32 %v912_v3, 23 }
  0xa7   : > { %5327 = vst [vmem:[#allocation16_spill] sm:$0xff] %v3638_v13  ;;  %vm612_vm12 = vcmp.gt.s32.totalorder %v611_v6, 0  ;;  %v455_v40 = vor.u32 8388608, %v454_v9  ;;  %v466_v50 = vor.u32 %v465_v10, %v464_v0  ;;  %v469_v44 = vor.u32 %v468_v7, %v467_v25 }
  0xa8   : > { %5328 = vst [vmem:[#allocation17_spill] sm:$0xff] %v3640_v12  ;;  %v470_v54 = vshll.u32 %v5287_v4, %v461_v21  ;;  %v471_v27 = vshrl.u32 %v5281_v61, %v462_v39  ;;  %v473_v57 = vshll.u32 %v5281_v61, %v461_v21  ;;  %v474_v20 = vshrl.u32 %v5285_v51, %v462_v39 }
  0xa9   : > { %5329 = vst [vmem:[#allocation18_spill] sm:$0xff] %v3642_v16  ;;  %v3658_v42 = vadd.s32 %v2256_v62, %v2252_v58  ;;  %v3660_v2 = vsel %vm2518_vm11, %v2517_v46, 0  ;;  %v476_v45 = vshll.u32 %v5285_v51, %v461_v21  ;;  %v477_v3 = vshrl.u32 %v5283_v53, %v462_v39 }
  0xaa   : > { %5330 = vst [vmem:[#allocation19_spill] sm:$0xff] %v3646_v22  ;;  %v463_v9 = vshrl.u32 %v5289_v24, %v462_v39  ;;  %v472_v10 = vor.u32 %v471_v27, %v470_v54  ;;  %v475_v7 = vor.u32 %v474_v20, %v473_v57  ;;  %vm479_vm13 = vcmp.lt.s32.totalorder %v460_v32, 1 }
  0xab   : > { %5333 = vst [vmem:[#allocation20_spill] sm:$0xff] %v3658_v42  ;;  %v613_v0 = vsel %vm612_vm12, %v611_v6, 0  ;;  %v478_v25 = vor.u32 %v477_v3, %v476_v45  ;;  %vm482_vm14 = vcmp.lt.s32.totalorder %v460_v32, 4  ;;  %v487_v61 = vsel %vm479_vm13, %v466_v50, %v469_v44 }
  0xac   : > { %vm481_vm15 = vcmp.lt.s32.totalorder %v460_v32, 3  ;;  %v488_v58 = vsel %vm482_vm14, %v475_v7, 920167782  ;;  %v491_v62 = vsel %vm479_vm13, %v469_v44, %v472_v10  ;;  %v3668_v46 = vshll.u32 %v455_v40, 8 }
  0xad   : > { %vm480_vm0 = vcmp.lt.s32.totalorder %v460_v32, 2  ;;  %v484_v21 = vsel %vm482_vm14, %v472_v10, 2102212464  ;;  %v489_v53 = vsel %vm481_vm15, %v472_v10, %v488_v58  ;;  %v492_v39 = vsel %vm482_vm14, %v478_v25, 1326507024 }
  0xae   : > { %v615_v54 = vand.u32 31, %v613_v0  ;;  %v490_v20 = vsel %vm480_vm0, %v487_v61, %v489_v53  ;;  %v493_v6 = vsel %vm481_vm15, %v475_v7, %v492_v39  ;;  %v496_v27 = vand.u32 65535, %v3668_v46 }
  0xaf   : > { %v494_v57 = vsel %vm480_vm0, %v491_v62, %v493_v6  ;;  %v497_v45 = vshrl.u32 %v3668_v46, 16  ;;  %v520_v3 = vand.u32 65535, %v490_v20  ;;  %v521_v51 = vshrl.u32 %v490_v20, 16 }
  0xb0   : > { %v483_v40 = vsel %vm479_vm13, %v463_v9, %v466_v50  ;;  %v485_v4 = vsel %vm481_vm15, %v469_v44, %v484_v21  ;;  %v498_v24 = vand.u32 65535, %v494_v57  ;;  %v499_v10 = vshrl.u32 %v494_v57, 16 }
  0xb1   : > { %v3681_v53 = vsel %vm3650_vm10, 1, %v5291_v1  ;;  %v3161_v61 = vadd.s32 4294967169, %v913_v56  ;;  %v523_v7 = vmul.u32 %v521_v51, %v496_v27  ;;  %v524_v25 = vmul.u32 %v520_v3, %v497_v45 }
  0xb2   : > { %v3683_v58 = vshrl.u32 %v613_v0, 5  ;;  %v3685_v62 = vsub.s32 32, %v615_v54  ;;  %v501_v39 = vmul.u32 %v499_v10, %v496_v27  ;;  %v502_v20 = vmul.u32 %v498_v24, %v497_v45 }
  0xb3   : > { %v486_v50 = vsel %vm480_vm0, %v483_v40, %v485_v4  ;;  %v522_v9 = vmul.u32 %v520_v3, %v496_v27  ;;  %v526_v44 = vshll.u32 %v523_v7, 16  ;;  %v500_v6 = vmul.u32 %v498_v24, %v496_v27 }
  0xb4   : > { %v503_v57 = vmul.u32 %v499_v10, %v497_v45  ;;  %v504_v28 = vshll.u32 %v501_v39, 16  ;;  %v525_v1 = vmul.u32 %v521_v51, %v497_v45  ;;  %v527_v31 = vshrl.u32 %v523_v7, 16 }
  0xb5   : > { %v528_v56 = vshll.u32 %v524_v25, 16  ;;  %vm530_vm1 = vc.u32 %v522_v9, %v526_v44  ;;  %v532_v19 = vadd.s32 %v526_v44, %v522_v9  ;;  %v506_v0 = vshll.u32 %v502_v20, 16 }
  0xb6   : > { %vm508_vm2 = vc.u32 %v500_v6, %v504_v28  ;;  %v510_v26 = vadd.s32 %v504_v28, %v500_v6  ;;  %v5334_v33 = vmov 0   ;;  %v529_v4 = vshrl.u32 %v524_v25, 16 }
  0xb7   : > { %v531_v22 = vsel %vm530_vm1, 1, %v5334_v33  ;;  %v509_v32 = vsel %vm508_vm2, 1, %v5334_v33  ;;  %vm534_vm3 = vc.u32 %v532_v19, %v528_v56  ;;  %v505_v40 = vshrl.u32 %v501_v39, 16 }
  0xb8   : > { %v533_v3 = vadd.s32 %v531_v22, %v525_v1  ;;  %v511_v21 = vadd.s32 %v509_v32, %v503_v57  ;;  %vm512_vm4 = vc.u32 %v510_v26, %v506_v0  ;;  %v535_v24 = vsel %vm534_vm3, 1, %v5334_v33 }
  0xb9   : > { %v507_v51 = vshrl.u32 %v502_v20, 16  ;;  %v513_v27 = vsel %vm512_vm4, 1, %v5334_v33  ;;  %v5335_v10 = vand.u32 2147483647, %v3557_v41  ;;  %v5336_v44 = vmov 683565275  }
  0xba   : > { %v537_v45 = vadd.s32 %v535_v24, %v533_v3  ;;  %v515_v9 = vadd.s32 %v513_v27, %v511_v21  ;;  %v618_v6 = vshll.u32 %v5336_v44, %v615_v54  ;;  %v5337_v28 = vmov 2475754826  }
  0xbb   : > { %v608_v7 = vand.u32 8388607, %v5335_v10  ;;  %v619_v25 = vshrl.u32 %v5337_v28, %v3685_v62  ;;  %v5338_v1 = vmov 2131351028   ;;  %v621_v26 = vshll.u32 %v5337_v28, %v615_v54 }
  0xbc   : > { %v622_v22 = vshrl.u32 %v5338_v1, %v3685_v62  ;;  %v538_v39 = vadd.s32 %v537_v45, %v527_v31  ;;  %v624_v20 = vshll.u32 %v5338_v1, %v615_v54  ;;  %v5339_v57 = vmov 2102212464  }
  0xbd   : > { %v625_v0 = vshrl.u32 %v5339_v57, %v3685_v62  ;;  %v516_v32 = vadd.s32 %v515_v9, %v505_v40  ;;  %v620_v3 = vor.u32 %v619_v25, %v618_v6  ;;  %v627_v21 = vshll.u32 %v5339_v57, %v615_v54 }
  0xbe   : > { %v5340_v24 = vmov 920167782   ;;  %v539_v10 = vadd.s32 %v538_v39, %v529_v4  ;;  %v623_v13 = vor.u32 %v622_v22, %v621_v26  ;;  %v5341_v31 = vmov 1326507024  }
  0xbf   : > { %v628_v27 = vshrl.u32 %v5340_v24, %v3685_v62  ;;  %v630_v16 = vshll.u32 %v5340_v24, %v615_v54  ;;  %v631_v45 = vshrl.u32 %v5341_v31, %v3685_v62  ;;  %v517_v12 = vadd.s32 %v516_v32, %v507_v51 }
  0xc0   : > { %v536_v42 = vadd.s32 %v532_v19, %v528_v56  ;;  %v626_v52 = vor.u32 %v625_v0, %v624_v20  ;;  %v919_v47 = vadd.s32 1, %v3161_v61  ;;  %v543_v49 = vadd.s32 1, %v539_v10 }
  0xc1   : > { %v629_v30 = vor.u32 %v628_v27, %v627_v21  ;;  %v609_v40 = vor.u32 8388608, %v608_v7  ;;  %v632_v9 = vor.u32 %v631_v45, %v630_v16  ;;  %v540_v6 = vmul.u32 %v3668_v46, %v486_v50 }
  0xc2   : > { %vm542_vm5 = vc.u32 %v517_v12, %v536_v42  ;;  %vm633_vm7 = vcmp.lt.s32.totalorder %v3683_v58, 1  ;;  %vm636_vm8 = vcmp.lt.s32.totalorder %v3683_v58, 4  ;;  %vm635_vm9 = vcmp.lt.s32.totalorder %v3683_v58, 3 }
  0xc3   : > { %v544_v4 = vsel %vm542_vm5, %v543_v49, %v539_v10  ;;  %v641_v54 = vsel %vm633_vm7, %v620_v3, %v623_v13  ;;  %v642_v19 = vsel %vm636_vm8, %v629_v30, 920167782  ;;  %vm634_vm10 = vcmp.lt.s32.totalorder %v3683_v58, 2 }
  0xc4   : > { %v545_v61 = vadd.s32 %v544_v4, %v540_v6  ;;  %v643_v16 = vsel %vm635_vm9, %v626_v52, %v642_v19  ;;  %v645_v46 = vsel %vm633_vm7, %v623_v13, %v626_v52  ;;  %v1783_v50 = vand.u32 2139095040, %v3570_v63 }
  0xc5   : > { %v644_v49 = vsel %vm634_vm10, %v641_v54, %v643_v16  ;;  %v646_v56 = vsel %vm636_vm8, %v632_v9, 1326507024  ;;  %v3728_v51 = vshll.u32 %v609_v40, 8  ;;  %vm920_vm11 = vcmp.gt.s32.totalorder %v919_v47, 0 }
  0xc6   : > { %v546_v7 = vadd.s32 536870912, %v545_v61  ;;  %v647_v25 = vsel %vm635_vm9, %v629_v30, %v646_v56  ;;  %v675_v22 = vshrl.u32 %v644_v49, 16  ;;  %v3733_v39 = vshrl.u32 %v3660_v2, 5 }
  0xc7   : > { %v3736_v26 = vand.u32 31, %v3660_v2  ;;  %v648_v20 = vsel %vm634_vm10, %v645_v46, %v647_v25  ;;  %v650_v0 = vand.u32 65535, %v3728_v51  ;;  %v3743_v32 = vadd.s32 %v3681_v53, %v3633_v5 }
  0xc8   : > { %5342 = vst [vmem:[#allocation21_spill] sm:$0xff] %v3733_v39  ;;  %v3745_v21 = vshrl.u32 %v546_v7, 30  ;;  %v652_v27 = vand.u32 65535, %v648_v20  ;;  %v653_v30 = vshrl.u32 %v648_v20, 16  ;;  %v3747_v10 = vsel %vm920_vm11, %v919_v47, 0 }
  0xc9   : > { %5343 = vst [vmem:[#allocation22_spill] sm:$0xff] %v3736_v26  ;;  %v651_v45 = vshrl.u32 %v3728_v51, 16  ;;  %v674_v40 = vand.u32 65535, %v644_v49  ;;  %v677_v2 = vmul.u32 %v675_v22, %v650_v0  ;;  %v3750_v9 = vshrl.u32 %v1783_v50, 23 }
  0xca   : > { %5344 = vst [vmem:[#allocation23_spill] sm:$0xff] %v3743_v32  ;;  %v548_v6 = vshll.u32 %v3745_v21, 30  ;;  %v638_v4 = vsel %vm636_vm8, %v626_v52, 2102212464  ;;  %v655_v54 = vmul.u32 %v653_v30, %v650_v0  ;;  %v617_v53 = vshrl.u32 %v5336_v44, %v3685_v62 }
  0xcb   : > { %v656_v19 = vmul.u32 %v652_v27, %v651_v45  ;;  %v680_v47 = vshll.u32 %v677_v2, 16  ;;  %v541_v16 = vadd.s32 %v536_v42, %v517_v12  ;;  %v654_v56 = vmul.u32 %v652_v27, %v650_v0 }
  0xcc   : > { %v549_v46 = vsub.s32 %v545_v61, %v548_v6  ;;  %v658_v49 = vshll.u32 %v655_v54, 16  ;;  %v637_v50 = vsel %vm633_vm7, %v617_v53, %v620_v3  ;;  %v639_v7 = vsel %vm635_vm9, %v623_v13, %v638_v4 }
  0xcd   : > { %v676_v25 = vmul.u32 %v674_v40, %v650_v0  ;;  %v678_v52 = vmul.u32 %v674_v40, %v651_v45  ;;  %v657_v5 = vmul.u32 %v653_v30, %v651_v45  ;;  %v660_v39 = vshll.u32 %v656_v19, 16 }
  0xce   : > { %vm550_vm12 = vcmp.lt.s32.totalorder %v549_v46, 0  ;;  %v551_v20 = vsub.s32 0, %v549_v46  ;;  %vm662_vm13 = vc.u32 %v654_v56, %v658_v49  ;;  %v664_v26 = vadd.s32 %v658_v49, %v654_v56 }
  0xcf   : > { %v663_v62 = vsel %vm662_vm13, 1, %v5334_v33  ;;  %vm684_vm14 = vc.u32 %v676_v25, %v680_v47  ;;  %v3765_v12 = vsel %vm634_vm10, %v637_v50, %v639_v7  ;;  %v679_v3 = vmul.u32 %v675_v22, %v651_v45 }
  0xd0   : > { %v552_v42 = vsel %vm550_vm12, %v551_v20, %v549_v46  ;;  %v5309_v61 = vand.u32 2147483647, %v3486_v37  ;;  %v665_v0 = vadd.s32 %v663_v62, %v657_v5  ;;  %vm666_vm15 = vc.u32 %v664_v26, %v660_v39 }
  0xd1   : > { %v553_v13 = vclz %v552_v42  ;;  %v685_v27 = vsel %vm684_vm14, 1, %v5334_v33  ;;  %v667_v30 = vsel %vm666_vm15, 1, %v5334_v33  ;;  %v682_v40 = vshll.u32 %v678_v52, 16 }
  0xd2   : > { %v686_v6 = vadd.s32 %v680_v47, %v676_v25  ;;  %v687_v4 = vadd.s32 %v685_v27, %v679_v3  ;;  %v659_v56 = vshrl.u32 %v655_v54, 16  ;;  %v669_v49 = vadd.s32 %v667_v30, %v665_v0 }
  0xd3   : > { %v3153_v53 = vadd.s32 4294967294, %v553_v13  ;;  %v694_v58 = vmul.u32 %v3728_v51, %v3765_v12  ;;  %v571_v22 = vsub.s32 4, %v3745_v21  ;;  %v661_v45 = vshrl.u32 %v656_v19, 16 }
  0xd4   : > { %v681_v50 = vshrl.u32 %v677_v2, 16  ;;  %vm688_vm0 = vc.u32 %v686_v6, %v682_v40  ;;  %v670_v39 = vadd.s32 %v669_v49, %v659_v56  ;;  %v683_v26 = vshrl.u32 %v678_v52, 16 }
  0xd5   : > { %vm3154_vm1 = vcmp.lt.s32.totalorder %v3153_v53, 0  ;;  %v689_v5 = vsel %vm688_vm0, 1, %v5334_v33  ;;  %v3774_v20 = vadd.s32 %v686_v6, %v682_v40  ;;  %v762_v54 = vand.u32 8388607, %v5309_v61 }
  0xd6   : > { %v556_v7 = vsel %vm3154_vm1, 0, %v3153_v53  ;;  %v691_v47 = vadd.s32 %v689_v5, %v687_v4  ;;  %vm449_vm2 = vcmp.lt.s32.totalorder %v3483_v34, 0  ;;  %v3779_v62 = vadd.s32 %v670_v39, %v661_v45  ;;  %v3192_v45 = vld [vmem:[%s5268_s3 + $0x8] sm:$0xff] }
  0xd7   : > { %v557_v51 = vsub.s32 32, %v556_v7  ;;  %v561_v25 = vsub.s32 4294967266, %v556_v7  ;;  %v772_v2 = vshll.u32 %v5336_v44, %v3599_v29  ;;  %v558_v19 = vshll.u32 %v549_v46, %v556_v7  ;;  %1968 = vmatpush.msrb.mxu0 %v3192_v45 }
  0xd8   : > { %v692_v52 = vadd.s32 %v691_v47, %v681_v50  ;;  %v773_v42 = vshrl.u32 %v5337_v28, %v3629_v38  ;;  %v775_v12 = vshll.u32 %v5337_v28, %v3599_v29  ;;  %v776_v0 = vshrl.u32 %v5338_v1, %v3629_v38 }
  0xd9   : > { %v559_v3 = vshrl.u32 %v541_v16, %v557_v51  ;;  %v562_v13 = vadd.s32 127, %v561_v25  ;;  %v778_v27 = vshll.u32 %v5338_v1, %v3599_v29  ;;  %v763_v40 = vor.u32 8388608, %v762_v54 }
  0xda   : > { %v693_v30 = vadd.s32 %v692_v52, %v683_v26  ;;  %v779_v46 = vshrl.u32 %v5339_v57, %v3629_v38  ;;  %v781_v6 = vshll.u32 %v5339_v57, %v3599_v29  ;;  %v5345_v4 = vand.u32 2147483647, %v3483_v34 }
  0xdb   : > { %v560_v16 = vor.u32 %v559_v3, %v558_v19  ;;  %v563_v56 = vshll.u32 %v562_v13, 23  ;;  %vm696_vm4 = vc.u32 %v3779_v62, %v3774_v20  ;;  %v782_v49 = vshrl.u32 %v5340_v24, %v3629_v38 }
  0xdc   : > { %vm3797_vm3 = vcmp.le.f32.partialorder %v5345_v4, 0.7853982  ;;  %v697_v50 = vadd.s32 1, %v693_v30  ;;  %v3808_v39 = vor.u32 %v773_v42, %v772_v2  ;;  %v784_v26 = vshll.u32 %v5340_v24, %v3599_v29 }
  0xdd   : > { %v785_v5 = vshrl.u32 %v5341_v31, %v3629_v38  ;;  %v564_v7 = vor.u32 4788187, %v563_v56  ;;  %v3814_v47 = vor.u32 %v776_v0, %v775_v12  ;;  %v780_v54 = vor.u32 %v779_v46, %v778_v27 }
  0xde   : > { %v783_v51 = vor.u32 %v782_v49, %v781_v6  ;;  %v567_v25 = vcvt.s32.f32 %v560_v16  ;;  %v698_v19 = vsel %vm696_vm4, %v697_v50, %v693_v30  ;;  %vm787_vm5 = vcmp.lt.s32.totalorder %v3626_v55, 1 }
  0xdf   : > { %v786_v52 = vor.u32 %v785_v5, %v784_v26  ;;  %v565_v3 = vand.u32 2147483647, %v564_v7  ;;  %v699_v2 = vadd.s32 %v698_v19, %v694_v58  ;;  %vm789_vm7 = vcmp.lt.s32.totalorder %v3626_v55, 3 }
  0xe0   : > { %vm790_vm8 = vcmp.lt.s32.totalorder %v3626_v55, 4  ;;  %v3820_v29 = vshrl.u32 %v3747_v10, 5  ;;  %v3823_v42 = vand.u32 31, %v3747_v10  ;;  %v572_v12 = vsel %vm449_vm2, %v571_v22, %v3745_v21 }
  0xe1   : > { %v796_v13 = vsel %vm790_vm8, %v783_v51, 920167782  ;;  %v568_v0 = vmul.f32 %v567_v25, %v565_v3  ;;  %v700_v27 = vadd.s32 536870912, %v699_v2  ;;  %vm788_vm9 = vcmp.lt.s32.totalorder %v3626_v55, 2 }
  0xe2   : > { %v799_v58 = vsel %vm787_vm5, %v3814_v47, %v780_v54  ;;  %v795_v10 = vsel %vm787_vm5, %v3808_v39, %v3814_v47  ;;  %v797_v30 = vsel %vm789_vm7, %v780_v54, %v796_v13  ;;  %v800_v21 = vsel %vm790_vm8, %v786_v52, 1326507024 }
  0xe3   : > { %v3842_v22 = vshll.u32 %v763_v40, 8  ;;  %v569_v6 = vxor.u32 2147483648, %v568_v0  ;;  %v3845_v4 = vshrl.u32 %v700_v27, 30  ;;  %v801_v16 = vsel %vm789_vm7, %v783_v51, %v800_v21 }
  0xe4   : > { %v574_v56 = vsel %vm3797_vm3, 0, %v572_v12  ;;  %v802_v49 = vsel %vm788_vm9, %v799_v58, %v801_v16  ;;  %v798_v5 = vsel %vm788_vm9, %v795_v10, %v797_v30  ;;  %v3861_v51 = vsub.s32 32, %v3823_v42 }
  0xe5   : > { %v804_v45 = vand.u32 65535, %v3842_v22  ;;  %v805_v50 = vshrl.u32 %v3842_v22, 16  ;;  %v570_v40 = vsel %vm449_vm2, %v569_v6, %v568_v0  ;;  %v702_v26 = vshll.u32 %v3845_v4, 30 }
  0xe6   : > { %v806_v7 = vand.u32 65535, %v802_v49  ;;  %v3867_v19 = vsel %vm3797_vm3, %v3483_v34, %v570_v40  ;;  %v807_v52 = vshrl.u32 %v802_v49, 16  ;;  %v3871_v12 = vand.u32 3, %v574_v56 }
  0xe7   : > { %v575_v3 = vmul.f32 %v3867_v19, %v3867_v19  ;;  %v3873_v13 = vsub.s32 %v699_v2, %v702_v26  ;;  %v771_v0 = vshrl.u32 %v5336_v44, %v3629_v38  ;;  %v829_v30 = vshrl.u32 %v798_v5, 16 }
  0xe8   : > { %v808_v27 = vmul.u32 %v806_v7, %v804_v45  ;;  %v809_v58 = vmul.u32 %v807_v52, %v804_v45  ;;  %v3877_v10 = vmul.u32 %v806_v7, %v805_v50  ;;  %v695_v16 = vadd.s32 %v3774_v20, %v3779_v62 }
  0xe9   : > { %v576_v21 = vmul.f32 -0.001358992, %v575_v3  ;;  %v583_v53 = vmul.f32 -0.00019511016, %v575_v3  ;;  %vm704_vm10 = vcmp.lt.s32.totalorder %v3873_v13, 0  ;;  %v705_v6 = vsub.s32 0, %v3873_v13 }
  0xea   : > { %v811_v56 = vmul.u32 %v807_v52, %v805_v50  ;;  %v812_v2 = vshll.u32 %v809_v58, 16  ;;  %v828_v49 = vand.u32 65535, %v798_v5  ;;  %v814_v7 = vshll.u32 %v3877_v10, 16 }
  0xeb   : > { %v577_v40 = vadd.f32 0.041655596, %v576_v21  ;;  %v584_v26 = vadd.f32 0.008332121, %v583_v53  ;;  %v706_v38 = vsel %vm704_vm10, %v705_v6, %v3873_v13  ;;  %v3888_v46 = vsel %vm787_vm5, %v771_v0, %v3808_v39 }
  0xec   : > { %v707_v25 = vclz %v706_v38  ;;  %v792_v61 = vsel %vm790_vm8, %v780_v54, 2102212464  ;;  %v3892_v32 = vmul.u32 %v829_v30, %v804_v45  ;;  %vm816_vm11 = vc.u32 %v808_v27, %v812_v2 }
  0xed   : > { %v578_v20 = vmul.f32 %v577_v40, %v575_v3  ;;  %v585_v62 = vmul.f32 %v584_v26, %v575_v3  ;;  %v818_v5 = vadd.s32 %v812_v2, %v808_v27  ;;  %v817_v21 = vsel %vm816_vm11, 1, %v5334_v33 }
  0xee   : > { %v3156_v52 = vadd.s32 4294967294, %v707_v25  ;;  %v830_v53 = vmul.u32 %v828_v49, %v804_v45  ;;  %v832_v6 = vmul.u32 %v828_v49, %v805_v50  ;;  %v819_v18 = vadd.s32 %v817_v21, %v811_v56 }
  0xef   : > { %v579_v38 = vadd.f32 -0.4999988, %v578_v20  ;;  %v586_v63 = vadd.f32 -0.16666654, %v585_v62  ;;  %vm820_vm12 = vc.u32 %v818_v5, %v814_v7  ;;  %vm593_vm13 = vcmp.eq.s32.totalorder %v3871_v12, 0 }
  0xf0   : > { %vm596_vm14 = vcmp.eq.s32.totalorder %v3871_v12, 2  ;;  %vm3157_vm15 = vcmp.lt.s32.totalorder %v3156_v52, 0  ;;  %v813_v39 = vshrl.u32 %v809_v58, 16  ;;  %v821_v54 = vsel %vm820_vm12, 1, %v5334_v33 }
  0xf1   : > { %v834_v0 = vshll.u32 %v3892_v32, 16  ;;  %v580_v27 = vmul.f32 %v579_v38, %v575_v3  ;;  %v587_v25 = vmul.f32 %v586_v63, %v575_v3  ;;  %vm592_vm0 = vcmp.lt.s32.totalorder %v3871_v12, 2 }
  0xf2   : > { %vm1068_vm1 = vcmask 64512   ;;  %v710_v45 = vsel %vm3157_vm15, 0, %v3156_v52  ;;  %v823_v2 = vadd.s32 %v821_v54, %v819_v18  ;;  %vm590_vm2 = vweird.f32 %v3483_v34 }
  0xf3   : > { %vm603_vm3 = vcmp.lt.s32.totalorder %v3557_v41, 0  ;;  %v711_v56 = vsub.s32 32, %v710_v45  ;;  %v715_v49 = vsub.s32 4294967266, %v710_v45  ;;  %v833_v40 = vmul.u32 %v829_v30, %v805_v50 }
  0xf4   : > { %v836_v26 = vshll.u32 %v832_v6, 16  ;;  %v581_v58 = vadd.f32 1.0, %v580_v27  ;;  %v588_v7 = vadd.f32 1.0, %v587_v25  ;;  %v712_v20 = vshll.u32 %v3873_v13, %v710_v45 }
  0xf5   : > { %v824_v62 = vadd.s32 %v823_v2, %v813_v39  ;;  %v713_v5 = vshrl.u32 %v695_v16, %v711_v56  ;;  %v716_v63 = vadd.s32 127, %v715_v49  ;;  %vm838_vm4 = vc.u32 %v830_v53, %v834_v0 }
  0xf6   : > { %v840_v3 = vadd.s32 %v834_v0, %v830_v53  ;;  %v589_v52 = vmul.f32 %v588_v7, %v3867_v19  ;;  %v597_v18 = vxor.u32 2147483648, %v581_v58  ;;  %v815_v21 = vshrl.u32 %v3877_v10, 16 }
  0xf7   : > { %v839_v38 = vsel %vm838_vm4, 1, %v5334_v33  ;;  %v714_v54 = vor.u32 %v713_v5, %v712_v20  ;;  %v717_v23 = vshll.u32 %v716_v63, 23  ;;  %v725_v27 = vsub.s32 4, %v3845_v4 }
  0xf8   : > { %v841_v50 = vadd.s32 %v839_v38, %v833_v40  ;;  %vm842_vm5 = vc.u32 %v840_v3, %v836_v26  ;;  %v594_v30 = vxor.u32 2147483648, %v589_v52  ;;  %v793_v13 = vsel %vm789_vm7, %v3814_v47, %v792_v61 }
  0xf9   : > { %v843_v16 = vsel %vm842_vm5, 1, %v5334_v33  ;;  %v718_v53 = vor.u32 4788187, %v717_v23  ;;  %v3911_v19 = vadd.s32 %v824_v62, %v815_v21  ;;  %v835_v10 = vshrl.u32 %v3892_v32, 16 }
  0xfa   : > { %v845_v39 = vadd.s32 %v843_v16, %v841_v50  ;;  %v595_v0 = vsel %vm593_vm13, %v581_v58, %v594_v30  ;;  %v598_v25 = vsel %vm596_vm14, %v597_v18, %v589_v52  ;;  %v837_v45 = vshrl.u32 %v832_v6, 16 }
  0xfb   : > { %v3918_v2 = vadd.s32 %v840_v3, %v836_v26  ;;  %v599_v61 = vsel %vm592_vm0, %v595_v0, %v598_v25  ;;  %v719_v47 = vand.u32 2147483647, %v718_v53  ;;  %v721_v56 = vcvt.s32.f32 %v714_v54 }
  0xfc   : > { %v846_v23 = vadd.s32 %v845_v39, %v835_v10  ;;  %v600_v49 = vsel %vm590_vm2, nan, %v599_v61  ;;  %v5348_v32 = vand.u32 2147483647, %v3557_v41  ;;  %v726_v6 = vsel %vm603_vm3, %v725_v27, %v3845_v4 }
  0xfd   : > { %v794_v12 = vsel %vm788_vm9, %v3888_v46, %v793_v13  ;;  %3164 = vmatmul.msk.f32.vlgmr.msra.gmra.mxu0 %vm1068_vm1, %v600_v49  ;;  %v722_v26 = vmul.f32 %v721_v56, %v719_v47  ;;  %vm850_vm8 = vc.u32 %v3911_v19, %v3918_v2  ;;  %v909_v34 = vand.u32 2147483647, %v3490_v43 }
  0xfe   : > { %vm3926_vm7 = vcmp.le.f32.partialorder %v5348_v32, 0.7853982  ;;  %v847_v58 = vadd.s32 %v846_v23, %v837_v45  ;;  %v926_v7 = vshll.u32 %v5336_v44, %v3823_v42  ;;  %v927_v20 = vshrl.u32 %v5337_v28, %v3861_v51 }
  0xff   : > { %v929_v4 = vshll.u32 %v5337_v28, %v3823_v42  ;;  %v930_v55 = vshrl.u32 %v5338_v1, %v3861_v51  ;;  %v723_v46 = vxor.u32 2147483648, %v722_v26  ;;  %v932_v5 = vshll.u32 %v5338_v1, %v3823_v42 }
 0x100   : > { %v851_v62 = vadd.s32 1, %v847_v58  ;;  %v933_v63 = vshrl.u32 %v5339_v57, %v3861_v51  ;;  %v728_v3 = vsel %vm3926_vm7, 0, %v726_v6  ;;  %v848_v52 = vmul.u32 %v3842_v22, %v794_v12 }
 0x101   : > { %v935_v18 = vshll.u32 %v5339_v57, %v3823_v42  ;;  %v936_v21 = vshrl.u32 %v5340_v24, %v3861_v51  ;;  %v724_v38 = vsel %vm603_vm3, %v723_v46, %v722_v26  ;;  %v916_v50 = vand.u32 8388607, %v909_v34 }
 0x102   : > { %v852_v54 = vsel %vm850_vm8, %v851_v62, %v847_v58  ;;  %v938_v30 = vshll.u32 %v5340_v24, %v3823_v42  ;;  %v3968_v22 = vsel %vm3926_vm7, %v3557_v41, %v724_v38  ;;  %v939_v16 = vshrl.u32 %v5341_v31, %v3861_v51 }
 0x103   : > { %v853_v27 = vadd.s32 %v852_v54, %v848_v52  ;;  %v937_v13 = vor.u32 %v936_v21, %v935_v18  ;;  %v729_v53 = vmul.f32 %v3968_v22, %v3968_v22  ;;  %v928_v10 = vor.u32 %v927_v20, %v926_v7 }
 0x104   : > { %v931_v39 = vor.u32 %v930_v55, %v929_v4  ;;  %v934_v0 = vor.u32 %v933_v63, %v932_v5  ;;  %v940_v45 = vor.u32 %v939_v16, %v938_v30  ;;  %vm941_vm9 = vcmp.lt.s32.totalorder %v3820_v29, 1 }
 0x105   : > { %v854_v25 = vadd.s32 536870912, %v853_v27  ;;  %vm944_vm10 = vcmp.lt.s32.totalorder %v3820_v29, 4  ;;  %v5351_v42 = vand.u32 2139095040, %v3580_v15  ;;  %v730_v47 = vmul.f32 -0.001358992, %v729_v53 }
 0x106   : > { %v737_v56 = vmul.f32 -0.00019511016, %v729_v53  ;;  %v3978_v23 = vand.u32 3, %v728_v3  ;;  %v917_v32 = vor.u32 8388608, %v916_v50  ;;  %vm943_vm11 = vcmp.lt.s32.totalorder %v3820_v29, 3 }
 0x107   : > { %v1630_v61 = vshrl.u32 %v5351_v42, 23  ;;  %v3980_v49 = vshrl.u32 %v854_v25, 30  ;;  %v950_v40 = vsel %vm944_vm10, %v937_v13, 920167782  ;;  %v731_v6 = vadd.f32 0.041655596, %v730_v47 }
 0x108   : > { %v738_v12 = vadd.f32 0.008332121, %v737_v56  ;;  %vm942_vm12 = vcmp.lt.s32.totalorder %v3820_v29, 2  ;;  %v953_v26 = vsel %vm941_vm9, %v931_v39, %v934_v0  ;;  %v3989_v58 = vadd.s32 4294967169, %v3750_v9 }
 0x109   : > { %v856_v7 = vshll.u32 %v3980_v49, 30  ;;  %v949_v20 = vsel %vm941_vm9, %v928_v10, %v931_v39  ;;  %v954_v4 = vsel %vm944_vm10, %v940_v45, 1326507024  ;;  %v732_v55 = vmul.f32 %v731_v6, %v729_v53 }
 0x10a   : > { %v739_v46 = vmul.f32 %v738_v12, %v729_v53  ;;  %v951_v62 = vsel %vm943_vm11, %v934_v0, %v950_v40  ;;  %v955_v5 = vsel %vm943_vm11, %v937_v13, %v954_v4  ;;  %v925_v9 = vshrl.u32 %v5336_v44, %v3861_v51 }
 0x10b   : > { %v4000_v63 = vsub.s32 %v853_v27, %v856_v7  ;;  %v956_v3 = vsel %vm942_vm12, %v953_v26, %v955_v5  ;;  %v4006_v52 = vshll.u32 %v917_v32, 8  ;;  %v4008_v18 = vadd.s32 4294967169, %v1630_v61 }
 0x10c   : > { %v733_v21 = vadd.f32 -0.4999988, %v732_v55  ;;  %v740_v38 = vadd.f32 -0.16666654, %v739_v46  ;;  %vm750_vm13 = vcmp.eq.s32.totalorder %v3978_v23, 2  ;;  %vm747_vm14 = vcmp.eq.s32.totalorder %v3978_v23, 0 }
 0x10d   : > { %vm858_vm15 = vcmp.lt.s32.totalorder %v4000_v63, 0  ;;  %v859_v54 = vsub.s32 0, %v4000_v63  ;;  %v946_v51 = vsel %vm944_vm10, %v934_v0, 2102212464  ;;  %v952_v50 = vsel %vm942_vm12, %v949_v20, %v951_v62 }
 0x10e   : > { %v734_v30 = vmul.f32 %v733_v21, %v729_v53  ;;  %v741_v27 = vmul.f32 %v740_v38, %v729_v53  ;;  %vm746_vm0 = vcmp.lt.s32.totalorder %v3978_v23, 2  ;;  %v960_v13 = vand.u32 65535, %v956_v3 }
 0x10f   : > { %v961_v16 = vshrl.u32 %v956_v3, 16  ;;  %vm744_vm2 = vweird.f32 %v3557_v41  ;;  %v860_v25 = vsel %vm858_vm15, %v859_v54, %v4000_v63  ;;  %v945_v45 = vsel %vm941_vm9, %v925_v9, %v928_v10 }
 0x110   : > { %v958_v42 = vand.u32 65535, %v4006_v52  ;;  %v959_v0 = vshrl.u32 %v4006_v52, 16  ;;  %v735_v61 = vadd.f32 1.0, %v734_v30  ;;  %v742_v47 = vadd.f32 1.0, %v741_v27 }
 0x111   : > { %v861_v56 = vclz %v860_v25  ;;  %v947_v53 = vsel %vm943_vm11, %v931_v39, %v946_v51  ;;  %v849_v32 = vadd.s32 %v3918_v2, %v3911_v19  ;;  %v983_v12 = vshrl.u32 %v952_v50, 16 }
 0x112   : > { %v963_v40 = vmul.u32 %v961_v16, %v958_v42  ;;  %v964_v6 = vmul.u32 %v960_v13, %v959_v0  ;;  %v743_v26 = vmul.f32 %v742_v47, %v3968_v22  ;;  %v751_v7 = vxor.u32 2147483648, %v735_v61 }
 0x113   : > { %v3159_v10 = vadd.s32 4294967294, %v861_v56  ;;  %v982_v20 = vand.u32 65535, %v952_v50  ;;  %v4032_v4 = vsel %vm942_vm12, %v945_v45, %v947_v53  ;;  %v962_v55 = vmul.u32 %v960_v13, %v958_v42 }
 0x114   : > { %v965_v46 = vmul.u32 %v961_v16, %v959_v0  ;;  %v966_v62 = vshll.u32 %v963_v40, 16  ;;  %v748_v5 = vxor.u32 2147483648, %v743_v26  ;;  %v752_v39 = vsel %vm750_vm13, %v751_v7, %v743_v26 }
 0x115   : > { %vm757_vm3 = vcmp.lt.s32.totalorder %v3486_v37, 0  ;;  %vm3160_vm4 = vcmp.lt.s32.totalorder %v3159_v10, 0  ;;  %v968_v19 = vshll.u32 %v964_v6, 16  ;;  %v985_v9 = vmul.u32 %v983_v12, %v958_v42 }
 0x116   : > { %v864_v2 = vsel %vm3160_vm4, 0, %v3159_v10  ;;  %vm970_vm5 = vc.u32 %v962_v55, %v966_v62  ;;  %v972_v22 = vadd.s32 %v966_v62, %v962_v55  ;;  %v749_v29 = vsel %vm747_vm14, %v735_v61, %v748_v5 }
 0x117   : > { %v865_v3 = vsub.s32 32, %v864_v2  ;;  %v869_v21 = vsub.s32 4294967266, %v864_v2  ;;  %v986_v38 = vmul.u32 %v982_v20, %v959_v0  ;;  %v753_v54 = vsel %vm746_vm0, %v749_v29, %v752_v39 }
 0x118   : > { %v866_v51 = vshll.u32 %v4000_v63, %v864_v2  ;;  %v971_v50 = vsel %vm970_vm5, 1, %v5334_v33  ;;  %vm974_vm7 = vc.u32 %v972_v22, %v968_v19  ;;  %v754_v30 = vsel %vm744_vm2, nan, %v753_v54 }
 0x119   : > { %v867_v27 = vshrl.u32 %v849_v32, %v865_v3  ;;  %v870_v13 = vadd.s32 127, %v869_v21  ;;  %v973_v16 = vadd.s32 %v971_v50, %v965_v46  ;;  %3165 = vmatmul.msk.f32.gmra.mxu0 %vm1068_vm1, %v754_v30  ;;  %v879_v25 = vsub.s32 4, %v3980_v49 }
 0x11a   : > { %v975_v45 = vsel %vm974_vm7, 1, %v5334_v33  ;;  %v984_v61 = vmul.u32 %v982_v20, %v958_v42  ;;  %v988_v23 = vshll.u32 %v985_v9, 16  ;;  %v967_v63 = vshrl.u32 %v963_v40, 16 }
 0x11b   : > { %v868_v47 = vor.u32 %v867_v27, %v866_v51  ;;  %v871_v56 = vshll.u32 %v870_v13, 23  ;;  %v977_v53 = vadd.s32 %v975_v45, %v973_v16  ;;  %v987_v26 = vmul.u32 %v983_v12, %v959_v0 }
 0x11c   : > { %v990_v7 = vshll.u32 %v986_v38, 16  ;;  %vm992_vm8 = vc.u32 %v984_v61, %v988_v23  ;;  %v994_v41 = vadd.s32 %v988_v23, %v984_v61  ;;  %v5352_v32 = vand.u32 2147483647, %v3486_v37 }
 0x11d   : > { %v872_v55 = vor.u32 4788187, %v871_v56  ;;  %v969_v46 = vshrl.u32 %v964_v6, 16  ;;  %v978_v62 = vadd.s32 %v977_v53, %v967_v63  ;;  %v993_v42 = vsel %vm992_vm8, 1, %v5334_v33 }
 0x11e   : > { %vm4050_vm9 = vcmp.le.f32.partialorder %v5352_v32, 0.7853982  ;;  %v880_v40 = vsel %vm757_vm3, %v879_v25, %v3980_v49  ;;  %v995_v20 = vadd.s32 %v993_v42, %v987_v26  ;;  %vm996_vm10 = vc.u32 %v994_v41, %v990_v7 }
 0x11f   : > { %v1318_v0 = vand.u32 2147483647, %v3463_v11  ;;  %v873_v12 = vand.u32 2147483647, %v872_v55  ;;  %v875_v5 = vcvt.s32.f32 %v868_v47  ;;  %v4059_v39 = vadd.s32 %v978_v62, %v969_v46 }
 0x120   : > { %v997_v19 = vsel %vm996_vm10, 1, %v5334_v33  ;;  %v989_v2 = vshrl.u32 %v985_v9, 16  ;;  %v4062_v22 = vadd.s32 %v994_v41, %v990_v7  ;;  %v1335_v49 = vshll.u32 %v5336_v44, %v3497_v48 }
 0x121   : > { %v999_v6 = vadd.s32 %v997_v19, %v995_v20  ;;  %v1325_v29 = vand.u32 8388607, %v1318_v0  ;;  %v876_v3 = vmul.f32 %v875_v5, %v873_v12  ;;  %v1336_v21 = vshrl.u32 %v5337_v28, %v3512_v60 }
 0x122   : > { %v1338_v54 = vshll.u32 %v5337_v28, %v3497_v48  ;;  %v991_v51 = vshrl.u32 %v986_v38, 16  ;;  %v1339_v9 = vshrl.u32 %v5338_v1, %v3512_v60  ;;  %vm1004_vm11 = vc.u32 %v4059_v39, %v4062_v22 }
 0x123   : > { %v1000_v50 = vadd.s32 %v999_v6, %v989_v2  ;;  %v1326_v30 = vor.u32 8388608, %v1325_v29  ;;  %v877_v27 = vxor.u32 2147483648, %v876_v3  ;;  %v1341_v13 = vshll.u32 %v5338_v1, %v3497_v48 }
 0x124   : > { %v1342_v16 = vshrl.u32 %v5339_v57, %v3512_v60  ;;  %v1340_v45 = vor.u32 %v1339_v9, %v1338_v54  ;;  %vm1350_vm12 = vcmp.lt.s32.totalorder %v3509_v59, 1  ;;  %vm1352_vm13 = vcmp.lt.s32.totalorder %v3509_v59, 3 }
 0x125   : > { %v1001_v25 = vadd.s32 %v1000_v50, %v991_v51  ;;  %v878_v38 = vsel %vm757_vm3, %v877_v27, %v876_v3  ;;  %v1337_v61 = vor.u32 %v1336_v21, %v1335_v49  ;;  %vm1351_vm14 = vcmp.lt.s32.totalorder %v3509_v59, 2 }
 0x126   : > { %v1343_v23 = vor.u32 %v1342_v16, %v1341_v13  ;;  %v4088_v48 = vsel %vm4050_vm9, %v3486_v37, %v878_v38  ;;  %v1364_v56 = vsel %vm1352_vm13, %v3546_v36, %v3614_v35  ;;  %v4094_v63 = vshll.u32 %v1326_v30, 8 }
 0x127   : > { %v1005_v47 = vadd.s32 1, %v1001_v25  ;;  %v5355_v53 = vand.u32 2139095040, %v3585_v17  ;;  %v883_v7 = vmul.f32 %v4088_v48, %v4088_v48  ;;  %v1002_v41 = vmul.u32 %v4006_v52, %v4032_v4 }
 0x128   : > { %v1362_v32 = vsel %vm1350_vm12, %v1340_v45, %v1343_v23  ;;  %v4107_v55 = vadd.s32 1, %v3989_v58  ;;  %v1636_v36 = vadd.s32 1, %v4008_v18  ;;  %v882_v35 = vsel %vm4050_vm9, 0, %v880_v40 }
 0x129   : > { %v4098_v26 = vshrl.u32 %v5355_v53, 23  ;;  %v1006_v46 = vsel %vm1004_vm11, %v1005_v47, %v1001_v25  ;;  %v884_v62 = vmul.f32 -0.001358992, %v883_v7  ;;  %v891_v42 = vmul.f32 -0.00019511016, %v883_v7 }
 0x12a   : > { %v1007_v20 = vadd.s32 %v1006_v46, %v1002_v41  ;;  %v1365_v52 = vsel %vm1351_vm14, %v1362_v32, %v1364_v56  ;;  %v1358_v4 = vsel %vm1350_vm12, %v1337_v61, %v1340_v45  ;;  %v1360_v58 = vsel %vm1352_vm13, %v1343_v23, %v3604_v8 }
 0x12b   : > { %v1367_v18 = vand.u32 65535, %v4094_v63  ;;  %v4124_v10 = vshrl.u32 %v4094_v63, 16  ;;  %v885_v40 = vadd.f32 0.041655596, %v884_v62  ;;  %v892_v12 = vadd.f32 0.008332121, %v891_v42 }
 0x12c   : > { %v1008_v5 = vadd.s32 536870912, %v1007_v20  ;;  %v1369_v19 = vand.u32 65535, %v1365_v52  ;;  %vm1637_vm15 = vcmp.gt.s32.totalorder %v1636_v36, 0  ;;  %v899_v2 = vand.u32 3, %v882_v35 }
 0x12d   : > { %v1334_v6 = vshrl.u32 %v5336_v44, %v3512_v60  ;;  %v1370_v29 = vshrl.u32 %v1365_v52, 16  ;;  %v886_v3 = vmul.f32 %v885_v40, %v883_v7  ;;  %v893_v49 = vmul.f32 %v892_v12, %v883_v7 }
 0x12e   : > { %v4128_v21 = vshrl.u32 %v1008_v5, 30  ;;  %v1361_v8 = vsel %vm1351_vm14, %v1358_v4, %v1360_v58  ;;  %v1355_v54 = vsel %vm1353_vm6, %v1343_v23, 2102212464  ;;  %v1371_v51 = vmul.u32 %v1369_v19, %v1367_v18 }
 0x12f   : > { %v1372_v50 = vmul.u32 %v1370_v29, %v1367_v18  ;;  %v1373_v30 = vmul.u32 %v1369_v19, %v4124_v10  ;;  %v4135_v9 = vsel %vm1637_vm15, %v1636_v36, 0  ;;  %v887_v27 = vadd.f32 -0.4999988, %v886_v3 }
 0x130   : > { %v894_v13 = vadd.f32 -0.16666654, %v893_v49  ;;  %v1010_v60 = vshll.u32 %v4128_v21, 30  ;;  %vm901_vm0 = vcmp.eq.s32.totalorder %v899_v2, 0  ;;  %v1391_v38 = vand.u32 65535, %v1361_v8 }
 0x131   : > { %v1375_v16 = vshll.u32 %v1372_v50, 16  ;;  %v1377_v25 = vshll.u32 %v1373_v30, 16  ;;  %v1392_v47 = vshrl.u32 %v1361_v8, 16  ;;  %v888_v56 = vmul.f32 %v887_v27, %v883_v7 }
 0x132   : > { %v895_v53 = vmul.f32 %v894_v13, %v883_v7  ;;  %vm900_vm2 = vcmp.lt.s32.totalorder %v899_v2, 2  ;;  %v1011_v41 = vsub.s32 %v1007_v20, %v1010_v60  ;;  %v1374_v23 = vmul.u32 %v1370_v29, %v4124_v10 }
 0x133   : > { %vm898_vm6 = vweird.f32 %v3486_v37  ;;  %v1354_v32 = vsel %vm1350_vm12, %v1334_v6, %v1337_v61  ;;  %v1356_v36 = vsel %vm1352_vm13, %v1340_v45, %v1355_v54  ;;  %vm1379_vm3 = vc.u32 %v1371_v51, %v1375_v16 }
 0x134   : > { %v1381_v35 = vadd.s32 %v1375_v16, %v1371_v51  ;;  %v889_v46 = vadd.f32 1.0, %v888_v56  ;;  %v896_v62 = vadd.f32 1.0, %v895_v53  ;;  %vm1012_vm4 = vcmp.lt.s32.totalorder %v1011_v41, 0 }
 0x135   : > { %v1013_v42 = vsub.s32 0, %v1011_v41  ;;  %v1380_v7 = vsel %vm1379_vm3, 1, %v5334_v33  ;;  %v1394_v20 = vmul.u32 %v1392_v47, %v1367_v18  ;;  %v1395_v52 = vmul.u32 %v1391_v38, %v4124_v10 }
 0x136   : > { %vm1383_vm5 = vc.u32 %v1381_v35, %v1377_v25  ;;  %v897_v4 = vmul.f32 %v896_v62, %v4088_v48  ;;  %v905_v58 = vxor.u32 2147483648, %v889_v46  ;;  %v1382_v61 = vadd.s32 %v1380_v7, %v1374_v23 }
 0x137   : > { %v1014_v40 = vsel %vm1012_vm4, %v1013_v42, %v1011_v41  ;;  %vm904_vm7 = vcmp.eq.s32.totalorder %v899_v2, 2  ;;  %v1376_v45 = vshrl.u32 %v1372_v50, 16  ;;  %v1393_v5 = vmul.u32 %v1391_v38, %v1367_v18 }
 0x138   : > { %v1015_v12 = vclz %v1014_v40  ;;  %v902_v19 = vxor.u32 2147483648, %v897_v4  ;;  %v1003_v6 = vadd.s32 %v4062_v22, %v4059_v39  ;;  %v4151_v29 = vsel %vm1351_vm14, %v1354_v32, %v1356_v36 }
 0x139   : > { %v1384_v3 = vsel %vm1383_vm5, 1, %v5334_v33  ;;  %v1378_v8 = vshrl.u32 %v1373_v30, 16  ;;  %v1397_v54 = vshll.u32 %v1394_v20, 16  ;;  %v906_v27 = vsel %vm904_vm7, %v905_v58, %v897_v4  ;;  %v5356_v58 = vld [vmem:[#allocation10_spill] sm:$0xff] }
 0x13a   : > { %v3162_v49 = vadd.s32 4294967294, %v1015_v12  ;;  %v1386_v48 = vadd.s32 %v1384_v3, %v1382_v61  ;;  %v903_v51 = vsel %vm901_vm0, %v889_v46, %v902_v19  ;;  %v1396_v50 = vmul.u32 %v1392_v47, %v4124_v10  ;;  %v5357_v61 = vld [vmem:[#allocation14_spill] sm:$0xff] }
 0x13b   : > { %v1399_v18 = vshll.u32 %v1395_v52, 16  ;;  %v907_v13 = vsel %vm900_vm2, %v903_v51, %v906_v27  ;;  %vm1401_vm9 = vc.u32 %v1393_v5, %v1397_v54  ;;  %v1403_v30 = vadd.s32 %v1397_v54, %v1393_v5 }
 0x13c   : > { %vm3163_vm8 = vcmp.lt.s32.totalorder %v3162_v49, 0  ;;  %v1387_v39 = vadd.s32 %v1386_v48, %v1376_v45  ;;  %v908_v59 = vsel %vm898_vm6, nan, %v907_v13  ;;  %v1402_v60 = vsel %vm1401_vm9, 1, %v5334_v33 }
 0x13d   : > { %v1018_v22 = vsel %vm3163_vm8, 0, %v3162_v49  ;;  %3166 = vmatmul.msk.f32.gmra.mxu0 %vm1068_vm1, %v908_v59  ;;  %v1398_v56 = vshrl.u32 %v1394_v20, 16  ;;  %v1404_v2 = vadd.s32 %v1402_v60, %v1396_v50  ;;  %vm1405_vm10 = vc.u32 %v1403_v30, %v1399_v18 }
 0x13e   : > { %v1019_v16 = vsub.s32 32, %v1018_v22  ;;  %v1020_v25 = vshll.u32 %v1011_v41, %v1018_v22  ;;  %v1023_v38 = vsub.s32 4294967266, %v1018_v22  ;;  %v4161_v10 = vadd.s32 %v1387_v39, %v1378_v8 }
 0x13f   : > { %v1472_v47 = vand.u32 2147483647, %v3467_v14  ;;  %v1406_v37 = vsel %vm1405_vm10, 1, %v5334_v33  ;;  %v4165_v32 = vadd.s32 %v1403_v30, %v1399_v18  ;;  %v4168_v36 = vand.u32 31, %v4135_v9  ;;  %v5358_v30 = vld [vmem:[#allocation13_spill] sm:$0xff] }
 0x140   : > { %v1021_v53 = vshrl.u32 %v1003_v6, %v1019_v16  ;;  %v1024_v23 = vadd.s32 127, %v1023_v38  ;;  %v1400_v35 = vshrl.u32 %v1395_v52, 16  ;;  %v1408_v46 = vadd.s32 %v1406_v37, %v1404_v2 }
 0x141   : > { %v1479_v41 = vand.u32 8388607, %v1472_v47  ;;  %vm911_vm11 = vcmp.lt.s32.totalorder %v3490_v43, 0  ;;  %v1411_v7 = vmul.u32 %v4094_v63, %v4151_v29  ;;  %v1033_v20 = vsub.s32 4, %v4128_v21 }
 0x142   : > { %v1022_v62 = vor.u32 %v1021_v53, %v1020_v25  ;;  %v1025_v42 = vshll.u32 %v1024_v23, 23  ;;  %v1409_v4 = vadd.s32 %v1408_v46, %v1398_v56  ;;  %v1489_v40 = vshll.u32 %v5336_v44, %v5356_v58 }
 0x143   : > { %v1490_v52 = vshrl.u32 %v5337_v28, %v5357_v61  ;;  %vm1413_vm12 = vc.u32 %v4161_v10, %v4165_v32  ;;  %v1492_v45 = vshll.u32 %v5337_v28, %v5356_v58  ;;  %v1493_v5 = vshrl.u32 %v5338_v1, %v5357_v61 }
 0x144   : > { %v1026_v12 = vor.u32 4788187, %v1025_v42  ;;  %v1410_v63 = vadd.s32 %v1409_v4, %v1400_v35  ;;  %v1480_v19 = vor.u32 8388608, %v1479_v41  ;;  %v1495_v6 = vshll.u32 %v5338_v1, %v5356_v58 }
 0x145   : > { %v1496_v29 = vshrl.u32 %v5339_v57, %v5357_v61  ;;  %v1029_v49 = vcvt.s32.f32 %v1022_v62  ;;  %v1498_v8 = vshll.u32 %v5339_v57, %v5356_v58  ;;  %v1499_v48 = vshrl.u32 %v5340_v24, %v5357_v61 }
 0x146   : > { %v1027_v3 = vand.u32 2147483647, %v1026_v12  ;;  %v1414_v54 = vadd.s32 1, %v1410_v63  ;;  %v1491_v51 = vor.u32 %v1490_v52, %v1489_v40  ;;  %v1501_v27 = vshll.u32 %v5340_v24, %v5356_v58 }
 0x147   : > { %v1502_v50 = vshrl.u32 %v5341_v31, %v5357_v61  ;;  %v1494_v13 = vor.u32 %v1493_v5, %v1492_v45  ;;  %v1497_v39 = vor.u32 %v1496_v29, %v1495_v6  ;;  %v1500_v59 = vor.u32 %v1499_v48, %v1498_v8 }
 0x148   : > { %v1030_v18 = vmul.f32 %v1029_v49, %v1027_v3  ;;  %v1415_v22 = vsel %vm1413_vm12, %v1414_v54, %v1410_v63  ;;  %vm1504_vm13 = vcmp.lt.s32.totalorder %v5358_v30, 1  ;;  %vm1507_vm14 = vcmp.lt.s32.totalorder %v5358_v30, 4 }
 0x149   : > { %v1503_v60 = vor.u32 %v1502_v50, %v1501_v27  ;;  %vm4205_vm15 = vcmp.le.f32.partialorder %v909_v34, 0.7853982  ;;  %v1416_v38 = vadd.s32 %v1415_v22, %v1411_v7  ;;  %vm1506_vm0 = vcmp.lt.s32.totalorder %v5358_v30, 3 }
 0x14a   : > { %v1031_v25 = vxor.u32 2147483648, %v1030_v18  ;;  %v1034_v56 = vsel %vm911_vm11, %v1033_v20, %v4128_v21  ;;  %v1488_v2 = vshrl.u32 %v5336_v44, %v5357_v61  ;;  %vm1505_vm2 = vcmp.lt.s32.totalorder %v5358_v30, 2 }
 0x14b   : > { %v1513_v53 = vsel %vm1507_vm14, %v1500_v59, 920167782  ;;  %v1417_v23 = vadd.s32 536870912, %v1416_v38  ;;  %v1512_v37 = vsel %vm1504_vm13, %v1491_v51, %v1494_v13  ;;  %v1516_v35 = vsel %vm1504_vm13, %v1494_v13, %v1497_v39 }
 0x14c   : > { %v1032_v34 = vsel %vm911_vm11, %v1031_v25, %v1030_v18  ;;  %v1514_v46 = vsel %vm1506_vm0, %v1497_v39, %v1513_v53  ;;  %v1517_v41 = vsel %vm1507_vm14, %v1503_v60, 1326507024  ;;  %v4233_v62 = vshll.u32 %v1480_v19, 8 }
 0x14d   : > { %v4227_v21 = vsel %vm4205_vm15, %v3490_v43, %v1032_v34  ;;  %v1036_v42 = vsel %vm4205_vm15, 0, %v1034_v56  ;;  %v4239_v20 = vshrl.u32 %v1417_v23, 30  ;;  %v1518_v4 = vsel %vm1506_vm0, %v1500_v59, %v1517_v41 }
 0x14e   : > { %v1037_v7 = vmul.f32 %v4227_v21, %v4227_v21  ;;  %v1509_v58 = vsel %vm1507_vm14, %v1497_v39, 2102212464  ;;  %v1519_v40 = vsel %vm1505_vm2, %v1516_v35, %v1518_v4  ;;  %v1521_v61 = vand.u32 65535, %v4233_v62 }
 0x14f   : > { %v4249_v52 = vshrl.u32 %v4233_v62, 16  ;;  %v1419_v5 = vshll.u32 %v4239_v20, 30  ;;  %v4254_v63 = vsel %vm1505_vm2, %v1512_v37, %v1514_v46  ;;  %v4256_v19 = vand.u32 3, %v1036_v42 }
 0x150   : > { %v1038_v12 = vmul.f32 -0.001358992, %v1037_v7  ;;  %v1045_v45 = vmul.f32 -0.00019511016, %v1037_v7  ;;  %v1508_v6 = vsel %vm1504_vm13, %v1488_v2, %v1491_v51  ;;  %v1523_v29 = vand.u32 65535, %v1519_v40 }
 0x151   : > { %v1524_v3 = vshrl.u32 %v1519_v40, 16  ;;  %v4260_v48 = vsub.s32 %v1416_v38, %v1419_v5  ;;  %v1510_v54 = vsel %vm1506_vm0, %v1494_v13, %v1509_v58  ;;  %v1546_v39 = vshrl.u32 %v4254_v63, 16 }
 0x152   : > { %v1039_v49 = vadd.f32 0.041655596, %v1038_v12  ;;  %v1046_v8 = vadd.f32 0.008332121, %v1045_v45  ;;  %v1525_v27 = vmul.u32 %v1523_v29, %v1521_v61  ;;  %v4265_v18 = vmul.u32 %v1523_v29, %v4249_v52 }
 0x153   : > { %v1526_v50 = vmul.u32 %v1524_v3, %v1521_v61  ;;  %vm1421_vm6 = vcmp.lt.s32.totalorder %v4260_v48, 0  ;;  %v1422_v51 = vsub.s32 0, %v4260_v48  ;;  %v4271_v60 = vsub.s32 32, %v4168_v36 }
 0x154   : > { %v1040_v59 = vmul.f32 %v1039_v49, %v1037_v7  ;;  %v1047_v22 = vmul.f32 %v1046_v8, %v1037_v7  ;;  %v1412_v16 = vadd.s32 %v4165_v32, %v4161_v10  ;;  %v1545_v25 = vand.u32 65535, %v4254_v63 }
 0x155   : > { %v1529_v13 = vshll.u32 %v1526_v50, 16  ;;  %vm1058_vm3 = vcmp.eq.s32.totalorder %v4256_v19, 2  ;;  %vm1320_vm4 = vcmp.lt.s32.totalorder %v3463_v11, 0  ;;  %v1423_v2 = vsel %vm1421_vm6, %v1422_v51, %v4260_v48 }
 0x156   : > { %v1041_v38 = vadd.f32 -0.4999988, %v1040_v59  ;;  %v1048_v56 = vadd.f32 -0.16666654, %v1047_v22  ;;  %v1528_v53 = vmul.u32 %v1524_v3, %v4249_v52  ;;  %vm1055_vm5 = vcmp.eq.s32.totalorder %v4256_v19, 0 }
 0x157   : > { %v1424_v34 = vclz %v1423_v2  ;;  %v4283_v23 = vsel %vm1505_vm2, %v1508_v6, %v1510_v54  ;;  %v1531_v10 = vshll.u32 %v4265_v18, 16  ;;  %v4286_v32 = vmul.u32 %v1546_v39, %v1521_v61 }
 0x158   : > { %v1042_v37 = vmul.f32 %v1041_v38, %v1037_v7  ;;  %v1049_v35 = vmul.f32 %v1048_v56, %v1037_v7  ;;  %vm1054_vm7 = vcmp.lt.s32.totalorder %v4256_v19, 2  ;;  %v1442_v46 = vsub.s32 4, %v4239_v20  ;;  %v5363_v7 = vld [vmem:[#allocation9_spill] sm:$0xff] }
 0x159   : > { %vm1533_vm8 = vc.u32 %v1525_v27, %v1529_v13  ;;  %vm1052_vm9 = vweird.f32 %v3490_v43  ;;  %v3181_v41 = vadd.s32 4294967294, %v1424_v34  ;;  %v1535_v4 = vadd.s32 %v1529_v13, %v1525_v27 }
 0x15a   : > { %v1534_v42 = vsel %vm1533_vm8, 1, %v5334_v33  ;;  %v1547_v30 = vmul.u32 %v1545_v25, %v1521_v61  ;;  %vm1791_vm10 = vcmp.gt.s32.totalorder %v4107_v55, 0  ;;  %v1043_v58 = vadd.f32 1.0, %v1042_v37 }
 0x15b   : > { %v1050_v40 = vadd.f32 1.0, %v1049_v35  ;;  %v1536_v12 = vadd.s32 %v1534_v42, %v1528_v53  ;;  %v1549_v45 = vmul.u32 %v1545_v25, %v4249_v52  ;;  %vm4296_vm11 = vcmp.le.f32.partialorder %v1318_v0, 0.7853982 }
 0x15c   : > { %vm3182_vm12 = vcmp.lt.s32.totalorder %v3181_v41, 0  ;;  %v1530_v5 = vshrl.u32 %v1526_v50, 16  ;;  %vm1537_vm13 = vc.u32 %v1535_v4, %v1531_v10  ;;  %v1551_v63 = vshll.u32 %v4286_v32, 16 }
 0x15d   : > { %v1051_v61 = vmul.f32 %v1050_v40, %v4227_v21  ;;  %v1059_v6 = vxor.u32 2147483648, %v1043_v58  ;;  %v1427_v29 = vsel %vm3182_vm12, 0, %v3181_v41  ;;  %v1538_v3 = vsel %vm1537_vm13, 1, %v5334_v33 }
 0x15e   : > { %v1428_v49 = vsub.s32 32, %v1427_v29  ;;  %v1429_v8 = vshll.u32 %v4260_v48, %v1427_v29  ;;  %v1432_v54 = vsub.s32 4294967266, %v1427_v29  ;;  %v1540_v27 = vadd.s32 %v1538_v3, %v1536_v12 }
 0x15f   : > { %v1056_v0 = vxor.u32 2147483648, %v1051_v61  ;;  %v1532_v59 = vshrl.u32 %v4265_v18, 16  ;;  %v1550_v22 = vmul.u32 %v1546_v39, %v4249_v52  ;;  %v1553_v50 = vshll.u32 %v1549_v45, 16 }
 0x160   : > { %v1060_v51 = vsel %vm1058_vm3, %v1059_v6, %v1051_v61  ;;  %v1430_v13 = vshrl.u32 %v1412_v16, %v1428_v49  ;;  %v1433_v21 = vadd.s32 127, %v1432_v54  ;;  %vm1555_vm14 = vc.u32 %v1547_v30, %v1551_v63  ;;  %v3233_v16 = vld [vmem:[%s5268_s3 + $0x10] sm:$0xff] }
 0x161   : > { %v1057_v25 = vsel %vm1055_vm5, %v1043_v58, %v1056_v0  ;;  %v1541_v38 = vadd.s32 %v1540_v27, %v1530_v5  ;;  %v1556_v48 = vsel %vm1555_vm14, 1, %v5334_v33  ;;  %v1557_v56 = vadd.s32 %v1551_v63, %v1547_v30  ;;  %2849 = vmatpush.msra.mxu0 %v3233_v16 }
 0x162   : > { %v1061_v2 = vsel %vm1054_vm7, %v1057_v25, %v1060_v51  ;;  %v1431_v18 = vor.u32 %v1430_v13, %v1429_v8  ;;  %v1434_v53 = vshll.u32 %v1433_v21, 23  ;;  %v1443_v52 = vsel %vm1320_vm4, %v1442_v46, %v4239_v20 }
 0x163   : > { %v1062_v39 = vsel %vm1052_vm9, nan, %v1061_v2  ;;  %v1552_v34 = vshrl.u32 %v4286_v32, 16  ;;  %v1558_v10 = vadd.s32 %v1556_v48, %v1550_v22  ;;  %vm1559_vm15 = vc.u32 %v1557_v56, %v1553_v50 }
 0x164   : > { %3167 = vmatmul.msk.f32.gmra.mxu0 %vm1068_vm1, %v1062_v39  ;;  %v1435_v19 = vor.u32 4788187, %v1434_v53  ;;  %v1438_v37 = vcvt.s32.f32 %v1431_v18  ;;  %v1554_v35 = vshrl.u32 %v1549_v45, 16  ;;  %v1560_v41 = vsel %vm1559_vm15, 1, %v5334_v33 }
 0x165   : > { %v4324_v20 = vadd.s32 %v1541_v38, %v1532_v59  ;;  %v4326_v43 = vadd.s32 %v1557_v56, %v1553_v50  ;;  %v1562_v46 = vadd.s32 %v1560_v41, %v1558_v10  ;;  %v1626_v42 = vand.u32 2147483647, %v3580_v15 }
 0x166   : > { %v4332_v32 = vsel %vm1791_vm10, %v4107_v55, 0  ;;  %v1436_v4 = vand.u32 2147483647, %v1435_v19  ;;  %v1643_v30 = vshll.u32 %v5336_v44, %v4168_v36  ;;  %v1644_v58 = vshrl.u32 %v5337_v28, %v4271_v60 }
 0x167   : > { %v4339_v40 = vshrl.u32 %v4135_v9, 5  ;;  %v1445_v12 = vsel %vm4296_vm11, 0, %v1443_v52  ;;  %v1563_v45 = vadd.s32 %v1562_v46, %v1552_v34  ;;  %v1633_v5 = vand.u32 8388607, %v1626_v42 }
 0x168   : > { %v1439_v63 = vmul.f32 %v1438_v37, %v1436_v4  ;;  %v1565_v55 = vmul.u32 %v4233_v62, %v4283_v23  ;;  %v1646_v61 = vshll.u32 %v5337_v28, %v4168_v36  ;;  %v1647_v6 = vshrl.u32 %v5338_v1, %v4271_v60 }
 0x169   : > { %v1564_v29 = vadd.s32 %v1563_v45, %v1554_v35  ;;  %vm1567_vm0 = vc.u32 %v4324_v20, %v4326_v43  ;;  %v4353_v9 = vor.u32 %v1644_v58, %v1643_v30  ;;  %v1649_v3 = vshll.u32 %v5338_v1, %v4168_v36 }
 0x16a   : > { %v1440_v49 = vxor.u32 2147483648, %v1439_v63  ;;  %v1650_v8 = vshrl.u32 %v5339_v57, %v4271_v60  ;;  %v1652_v62 = vshll.u32 %v5339_v57, %v4168_v36  ;;  %v1653_v23 = vshrl.u32 %v5340_v24, %v4271_v60 }
 0x16b   : > { %v1568_v54 = vadd.s32 1, %v1564_v29  ;;  %v1634_v27 = vor.u32 8388608, %v1633_v5  ;;  %v1655_v0 = vshll.u32 %v5340_v24, %v4168_v36  ;;  %v1656_v59 = vshrl.u32 %v5341_v31, %v4271_v60 }
 0x16c   : > { %v1441_v22 = vsel %vm1320_vm4, %v1440_v49, %v1439_v63  ;;  %v4369_v50 = vor.u32 %v1647_v6, %v1646_v61  ;;  %v1654_v51 = vor.u32 %v1653_v23, %v1652_v62  ;;  %vm1658_vm2 = vcmp.lt.s32.totalorder %v4339_v40, 1 }
 0x16d   : > { %v4375_v13 = vsel %vm4296_vm11, %v3463_v11, %v1441_v22  ;;  %v1569_v36 = vsel %vm1567_vm0, %v1568_v54, %v1564_v29  ;;  %v1651_v21 = vor.u32 %v1650_v8, %v1649_v3  ;;  %v1657_v25 = vor.u32 %v1656_v59, %v1655_v0 }
 0x16e   : > { %v1446_v38 = vmul.f32 %v4375_v13, %v4375_v13  ;;  %v1570_v48 = vadd.s32 %v1569_v36, %v1565_v55  ;;  %vm1660_vm6 = vcmp.lt.s32.totalorder %v4339_v40, 3  ;;  %vm1661_vm3 = vcmp.lt.s32.totalorder %v4339_v40, 4 }
 0x16f   : > { %v4385_v56 = vand.u32 31, %v4332_v32  ;;  %v5364_v2 = vand.u32 2139095040, %v5363_v7  ;;  %v4389_v53 = vand.u32 3, %v1445_v12  ;;  %v1667_v52 = vsel %vm1661_vm3, %v1654_v51, 920167782 }
 0x170   : > { %v1447_v39 = vmul.f32 -0.001358992, %v1446_v38  ;;  %v1454_v16 = vmul.f32 -0.00019511016, %v1446_v38  ;;  %v1571_v34 = vadd.s32 536870912, %v1570_v48  ;;  %vm1659_vm4 = vcmp.lt.s32.totalorder %v4339_v40, 2 }
 0x171   : > { %v2665_v18 = vshrl.u32 %v5364_v2, 23  ;;  %v1666_v10 = vsel %vm1658_vm2, %v4353_v9, %v4369_v50  ;;  %v1668_v19 = vsel %vm1660_vm6, %v1651_v21, %v1667_v52  ;;  %v1671_v37 = vsel %vm1661_vm3, %v1657_v25, 1326507024 }
 0x172   : > { %v4402_v35 = vshll.u32 %v1634_v27, 8  ;;  %v1448_v41 = vadd.f32 0.041655596, %v1447_v39  ;;  %v1455_v46 = vadd.f32 0.008332121, %v1454_v16  ;;  %v4404_v4 = vshrl.u32 %v1571_v34, 30 }
 0x173   : > { %v1670_v30 = vsel %vm1658_vm2, %v4369_v50, %v1651_v21  ;;  %v4410_v58 = vsub.s32 32, %v4385_v56  ;;  %v4413_v12 = vadd.s32 4294967169, %v4098_v26  ;;  %v4415_v45 = vadd.s32 4294967169, %v2665_v18 }
 0x174   : > { %v1672_v5 = vsel %vm1660_vm6, %v1654_v51, %v1671_v37  ;;  %v1449_v63 = vmul.f32 %v1448_v41, %v1446_v38  ;;  %v1456_v55 = vmul.f32 %v1455_v46, %v1446_v38  ;;  %v1573_v61 = vshll.u32 %v4404_v4, 30 }
 0x175   : > { %v1669_v6 = vsel %vm1659_vm4, %v1666_v10, %v1668_v19  ;;  %v1642_v29 = vshrl.u32 %v5336_v44, %v4271_v60  ;;  %v1673_v3 = vsel %vm1659_vm4, %v1670_v30, %v1672_v5  ;;  %v1675_v26 = vand.u32 65535, %v4402_v35 }
 0x176   : > { %v1676_v49 = vshrl.u32 %v4402_v35, 16  ;;  %v1450_v8 = vadd.f32 -0.4999988, %v1449_v63  ;;  %v1457_v62 = vadd.f32 -0.16666654, %v1456_v55  ;;  %vm1467_vm5 = vcmp.eq.s32.totalorder %v4389_v53, 2 }
 0x177   : > { %v4429_v23 = vsub.s32 %v1570_v48, %v1573_v61  ;;  %vm1464_vm7 = vcmp.eq.s32.totalorder %v4389_v53, 0  ;;  %v1677_v54 = vand.u32 65535, %v1673_v3  ;;  %v1678_v27 = vshrl.u32 %v1673_v3, 16 }
 0x178   : > { %v1699_v0 = vand.u32 65535, %v1669_v6  ;;  %v1700_v59 = vshrl.u32 %v1669_v6, 16  ;;  %v1451_v60 = vmul.f32 %v1450_v8, %v1446_v38  ;;  %v1458_v22 = vmul.f32 %v1457_v62, %v1446_v38 }
 0x179   : > { %vm1463_vm8 = vcmp.lt.s32.totalorder %v4389_v53, 2  ;;  %vm1575_vm9 = vcmp.lt.s32.totalorder %v4429_v23, 0  ;;  %v1576_v51 = vsub.s32 0, %v4429_v23  ;;  %vm1461_vm10 = vweird.f32 %v3463_v11 }
 0x17a   : > { %v1566_v36 = vadd.s32 %v4326_v43, %v4324_v20  ;;  %v1662_v25 = vsel %vm1658_vm2, %v1642_v29, %v4353_v9  ;;  %v1680_v48 = vmul.u32 %v1678_v27, %v1675_v26  ;;  %v1681_v2 = vmul.u32 %v1677_v54, %v1676_v49 }
 0x17b   : > { %v1452_v18 = vadd.f32 1.0, %v1451_v60  ;;  %v1459_v52 = vadd.f32 1.0, %v1458_v22  ;;  %v1577_v38 = vsel %vm1575_vm9, %v1576_v51, %v4429_v23  ;;  %v1679_v39 = vmul.u32 %v1677_v54, %v1675_v26 }
 0x17c   : > { %vm1474_vm11 = vcmp.lt.s32.totalorder %v3467_v14, 0  ;;  %v1578_v16 = vclz %v1577_v38  ;;  %v1663_v34 = vsel %vm1661_vm3, %v1651_v21, 2102212464  ;;  %v1701_v10 = vmul.u32 %v1699_v0, %v1675_v26 }
 0x17d   : > { %v1702_v19 = vmul.u32 %v1700_v59, %v1675_v26  ;;  %v1460_v20 = vmul.f32 %v1459_v52, %v4375_v13  ;;  %v1468_v43 = vxor.u32 2147483648, %v1452_v18  ;;  %v1682_v37 = vmul.u32 %v1678_v27, %v1676_v49 }
 0x17e   : > { %v1683_v9 = vshll.u32 %v1680_v48, 16  ;;  %v3184_v41 = vadd.s32 4294967294, %v1578_v16  ;;  %v1684_v46 = vshrl.u32 %v1680_v48, 16  ;;  %v1685_v30 = vshll.u32 %v1681_v2, 16 }
 0x17f   : > { %v1703_v5 = vmul.u32 %v1699_v0, %v1676_v49  ;;  %v1465_v63 = vxor.u32 2147483648, %v1460_v20  ;;  %vm4448_vm12 = vcmp.le.f32.partialorder %v1472_v47, 0.7853982  ;;  %v1704_v61 = vmul.u32 %v1700_v59, %v1676_v49 }
 0x180   : > { %vm1687_vm13 = vc.u32 %v1679_v39, %v1683_v9  ;;  %v1689_v21 = vadd.s32 %v1683_v9, %v1679_v39  ;;  %v1469_v13 = vsel %vm1467_vm5, %v1468_v43, %v1460_v20  ;;  %vm3185_vm14 = vcmp.lt.s32.totalorder %v3184_v41, 0  ;;  %v5367_v43 = vld [vmem:[#allocation8_spill] sm:$0xff] }
 0x181   : > { %v1688_v6 = vsel %vm1687_vm13, 1, %v5334_v33  ;;  %v1705_v29 = vshll.u32 %v1702_v19, 16  ;;  %v1466_v3 = vsel %vm1464_vm7, %v1452_v18, %v1465_v63  ;;  %v1581_v26 = vsel %vm3185_vm14, 0, %v3184_v41 }
 0x182   : > { %v1690_v8 = vadd.s32 %v1688_v6, %v1682_v37  ;;  %vm1691_vm15 = vc.u32 %v1689_v21, %v1685_v30  ;;  %v1470_v47 = vsel %vm1463_vm8, %v1466_v3, %v1469_v13  ;;  %v1582_v62 = vsub.s32 32, %v1581_v26 }
 0x183   : > { %v1583_v54 = vshll.u32 %v4429_v23, %v1581_v26  ;;  %v1586_v49 = vsub.s32 4294967266, %v1581_v26  ;;  %v1471_v27 = vsel %vm1461_vm10, nan, %v1470_v47  ;;  %v1596_v0 = vsub.s32 4, %v4404_v4 }
 0x184   : > { %v1692_v59 = vsel %vm1691_vm15, 1, %v5334_v33  ;;  %v1707_v60 = vshll.u32 %v1703_v5, 16  ;;  %3194 = vmatmul.msk.f32.vlgmr.msrb.gmra.mxu0 %vm1068_vm1, %v1471_v27  ;;  %v1584_v22 = vshrl.u32 %v1566_v36, %v1582_v62  ;;  %vm1709_vm0 = vc.u32 %v1701_v10, %v1705_v29 }
 0x185   : > { %v1587_v51 = vadd.s32 127, %v1586_v49  ;;  %v1694_v48 = vadd.s32 %v1692_v59, %v1690_v8  ;;  %v1664_v53 = vsel %vm1660_vm6, %v4369_v50, %v1663_v34  ;;  %v1686_v23 = vshrl.u32 %v1681_v2, 16 }
 0x186   : > { %v1710_v18 = vsel %vm1709_vm0, 1, %v5334_v33  ;;  %v1711_v11 = vadd.s32 %v1705_v29, %v1701_v10  ;;  %v1585_v52 = vor.u32 %v1584_v22, %v1583_v54  ;;  %v1597_v20 = vsel %vm1474_vm11, %v1596_v0, %v4404_v4 }
 0x187   : > { %v1588_v38 = vshll.u32 %v1587_v51, 23  ;;  %v1695_v39 = vadd.s32 %v1694_v48, %v1684_v46  ;;  %v1712_v16 = vadd.s32 %v1710_v18, %v1704_v61  ;;  %v1706_v36 = vshrl.u32 %v1702_v19, 16 }
 0x188   : > { %vm1713_vm2 = vc.u32 %v1711_v11, %v1707_v60  ;;  %v1780_v37 = vand.u32 2147483647, %v5367_v43  ;;  %v1592_v41 = vcvt.s32.f32 %v1585_v52  ;;  %v1665_v50 = vsel %vm1659_vm4, %v1662_v25, %v1664_v53 }
 0x189   : > { %v1589_v9 = vor.u32 4788187, %v1588_v38  ;;  %v1714_v2 = vsel %vm1713_vm2, 1, %v5334_v33  ;;  %v4476_v34 = vadd.s32 %v1695_v39, %v1686_v23  ;;  %v1708_v10 = vshrl.u32 %v1703_v5, 16 }
 0x18a   : > { %v4478_v46 = vadd.s32 %v1711_v11, %v1707_v60  ;;  %v1716_v30 = vadd.s32 %v1714_v2, %v1712_v16  ;;  %v4481_v63 = vshrl.u32 %v4332_v32, 5  ;;  %v2363_v4 = vadd.s32 1, %v4413_v12 }
 0x18b   : > { %v1590_v19 = vand.u32 2147483647, %v1589_v9  ;;  %v1599_v21 = vsel %vm4448_vm12, 0, %v1597_v20  ;;  %v1719_v40 = vmul.u32 %v4402_v35, %v1665_v50  ;;  %v1787_v25 = vand.u32 8388607, %v1780_v37 }
 0x18c   : > { %v1717_v61 = vadd.s32 %v1716_v30, %v1706_v36  ;;  %v1800_v5 = vshll.u32 %v5337_v28, %v4385_v56  ;;  %v1801_v32 = vshrl.u32 %v5338_v1, %v4410_v58  ;;  %v1803_v12 = vshll.u32 %v5338_v1, %v4385_v56 }
 0x18d   : > { %v1593_v13 = vmul.f32 %v1592_v41, %v1590_v19  ;;  %v1804_v6 = vshrl.u32 %v5339_v57, %v4410_v58  ;;  %vm1721_vm6 = vc.u32 %v4476_v34, %v4478_v46  ;;  %v1806_v35 = vshll.u32 %v5339_v57, %v4385_v56 }
 0x18e   : > { %v1718_v29 = vadd.s32 %v1717_v61, %v1708_v10  ;;  %v1807_v3 = vshrl.u32 %v5340_v24, %v4410_v58  ;;  %v1797_v8 = vshll.u32 %v5336_v44, %v4385_v56  ;;  %v1798_v47 = vshrl.u32 %v5337_v28, %v4410_v58 }
 0x18f   : > { %v1594_v26 = vxor.u32 2147483648, %v1593_v13  ;;  %v1809_v62 = vshll.u32 %v5340_v24, %v4385_v56  ;;  %v1788_v49 = vor.u32 8388608, %v1787_v25  ;;  %v1810_v0 = vshrl.u32 %v5341_v31, %v4410_v58 }
 0x190   : > { %v1722_v54 = vadd.s32 1, %v1718_v29  ;;  %v1808_v27 = vor.u32 %v1807_v3, %v1806_v35  ;;  %v4513_v60 = vor.u32 %v1801_v32, %v1800_v5  ;;  %v1805_v22 = vor.u32 %v1804_v6, %v1803_v12 }
 0x191   : > { %v1595_v59 = vsel %vm1474_vm11, %v1594_v26, %v1593_v13  ;;  %vm1815_vm3 = vcmp.lt.s32.totalorder %v4481_v63, 4  ;;  %v1811_v48 = vor.u32 %v1810_v0, %v1809_v62  ;;  %vm1812_vm4 = vcmp.lt.s32.totalorder %v4481_v63, 1 }
 0x192   : > { %v4519_v51 = vsel %vm4448_vm12, %v3467_v14, %v1595_v59  ;;  %v1723_v56 = vsel %vm1721_vm6, %v1722_v54, %v1718_v29  ;;  %v1799_v18 = vor.u32 %v1798_v47, %v1797_v8  ;;  %vm1814_vm5 = vcmp.lt.s32.totalorder %v4481_v63, 3 }
 0x193   : > { %v1600_v53 = vmul.f32 %v4519_v51, %v4519_v51  ;;  %v1724_v23 = vadd.s32 %v1723_v56, %v1719_v40  ;;  %v4529_v11 = vadd.s32 1, %v4415_v45  ;;  %vm1813_vm7 = vcmp.lt.s32.totalorder %v4481_v63, 2 }
 0x194   : > { %v1821_v55 = vsel %vm1815_vm3, %v1808_v27, 920167782  ;;  %v1825_v52 = vsel %vm1815_vm3, %v1811_v48, 1326507024  ;;  %v1824_v20 = vsel %vm1812_vm4, %v4513_v60, %v1805_v22  ;;  %vm2364_vm8 = vcmp.gt.s32.totalorder %v2363_v4, 0 }
 0x195   : > { %v1601_v38 = vmul.f32 -0.001358992, %v1600_v53  ;;  %v1608_v39 = vmul.f32 -0.00019511016, %v1600_v53  ;;  %v1725_v16 = vadd.s32 536870912, %v1724_v23  ;;  %v4539_v36 = vand.u32 3, %v1599_v21 }
 0x196   : > { %v1826_v45 = vsel %vm1814_vm5, %v1808_v27, %v1825_v52  ;;  %v4543_v9 = vshll.u32 %v1788_v49, 8  ;;  %v1820_v10 = vsel %vm1812_vm4, %v1799_v18, %v4513_v60  ;;  %v1822_v30 = vsel %vm1814_vm5, %v1805_v22, %v1821_v55 }
 0x197   : > { %v1602_v41 = vadd.f32 0.041655596, %v1601_v38  ;;  %v1609_v50 = vadd.f32 0.008332121, %v1608_v39  ;;  %v4545_v2 = vshrl.u32 %v1725_v16, 30  ;;  %v1827_v19 = vsel %vm1813_vm7, %v1824_v20, %v1826_v45 }
 0x198   : > { %v1829_v21 = vand.u32 65535, %v4543_v9  ;;  %v1830_v61 = vshrl.u32 %v4543_v9, 16  ;;  %v4556_v40 = vsel %vm2364_vm8, %v2363_v4, 0  ;;  %v1796_v32 = vshrl.u32 %v5336_v44, %v4410_v58 }
 0x199   : > { %v1603_v25 = vmul.f32 %v1602_v41, %v1600_v53  ;;  %v1610_v5 = vmul.f32 %v1609_v50, %v1600_v53  ;;  %v1727_v13 = vshll.u32 %v4545_v2, 30  ;;  %v1817_v12 = vsel %vm1815_vm3, %v1805_v22, 2102212464 }
 0x19a   : > { %v1831_v6 = vand.u32 65535, %v1827_v19  ;;  %v1832_v29 = vshrl.u32 %v1827_v19, 16  ;;  %v1823_v4 = vsel %vm1813_vm7, %v1820_v10, %v1822_v30  ;;  %vm1618_vm9 = vcmp.eq.s32.totalorder %v4539_v36, 0 }
 0x19b   : > { %v1604_v35 = vadd.f32 -0.4999988, %v1603_v25  ;;  %v1611_v3 = vadd.f32 -0.16666654, %v1610_v5  ;;  %v4563_v26 = vsub.s32 %v1724_v23, %v1727_v13  ;;  %v1853_v54 = vand.u32 65535, %v1823_v4 }
 0x19c   : > { %v1833_v8 = vmul.u32 %v1831_v6, %v1829_v21  ;;  %v1834_v47 = vmul.u32 %v1832_v29, %v1829_v21  ;;  %v4568_v62 = vmul.u32 %v1831_v6, %v1830_v61  ;;  %vm1617_vm10 = vcmp.lt.s32.totalorder %v4539_v36, 2 }
 0x19d   : > { %v1605_v58 = vmul.f32 %v1604_v35, %v1600_v53  ;;  %v1612_v49 = vmul.f32 %v1611_v3, %v1600_v53  ;;  %vm1729_vm11 = vcmp.lt.s32.totalorder %v4563_v26, 0  ;;  %v1730_v27 = vsub.s32 0, %v4563_v26 }
 0x19e   : > { %vm1615_vm12 = vweird.f32 %v3467_v14  ;;  %vm1621_vm13 = vcmp.eq.s32.totalorder %v4539_v36, 2  ;;  %v1720_v0 = vadd.s32 %v4478_v46, %v4476_v34  ;;  %v1837_v59 = vshll.u32 %v1834_v47, 16 }
 0x19f   : > { %v1854_v22 = vshrl.u32 %v1823_v4, 16  ;;  %v1606_v56 = vadd.f32 1.0, %v1605_v58  ;;  %v1613_v48 = vadd.f32 1.0, %v1612_v49  ;;  %v1731_v23 = vsel %vm1729_vm11, %v1730_v27, %v4563_v26 }
 0x1a0   : > { %v1836_v53 = vmul.u32 %v1832_v29, %v1830_v61  ;;  %v1732_v55 = vclz %v1731_v23  ;;  %v1816_v52 = vsel %vm1812_vm4, %v1796_v32, %v1799_v18  ;;  %v1818_v38 = vsel %vm1814_vm5, %v4513_v60, %v1817_v12 }
 0x1a1   : > { %v1839_v39 = vshll.u32 %v4568_v62, 16  ;;  %v1614_v16 = vmul.f32 %v1613_v48, %v4519_v51  ;;  %v1622_v34 = vxor.u32 2147483648, %v1606_v56  ;;  %vm1841_vm14 = vc.u32 %v1833_v8, %v1837_v59 }
 0x1a2   : > { %v1855_v46 = vmul.u32 %v1853_v54, %v1829_v21  ;;  %v3187_v20 = vadd.s32 4294967294, %v1732_v55  ;;  %v1842_v45 = vsel %vm1841_vm14, 1, %v5334_v33  ;;  %v1843_v41 = vadd.s32 %v1837_v59, %v1833_v8 }
 0x1a3   : > { %v1856_v50 = vmul.u32 %v1854_v22, %v1829_v21  ;;  %v1619_v10 = vxor.u32 2147483648, %v1614_v16  ;;  %v1838_v30 = vshrl.u32 %v1834_v47, 16  ;;  %v1844_v19 = vadd.s32 %v1842_v45, %v1836_v53  ;;  %v5372_v45 = vld [vmem:[#allocation17_spill] sm:$0xff] }
 0x1a4   : > { %v1857_v18 = vmul.u32 %v1853_v54, %v1830_v61  ;;  %vm3188_vm15 = vcmp.lt.s32.totalorder %v3187_v20, 0  ;;  %v1840_v25 = vshrl.u32 %v4568_v62, 16  ;;  %vm1845_vm0 = vc.u32 %v1843_v41, %v1839_v39  ;;  %v5368_v39 = vld [vmem:[#allocation12_spill] sm:$0xff] }
 0x1a5   : > { %v1859_v60 = vshll.u32 %v1856_v50, 16  ;;  %v1620_v51 = vsel %vm1618_vm9, %v1606_v56, %v1619_v10  ;;  %v1623_v5 = vsel %vm1621_vm13, %v1622_v34, %v1614_v16  ;;  %v1735_v13 = vsel %vm3188_vm15, 0, %v3187_v20  ;;  %v5369_v34 = vld [vmem:[#allocation15_spill] sm:$0xff]  ;;  %v5371_v20 = vld [vmem:[#allocation20_spill] sm:$0xff] }
 0x1a6   : > { %v1846_v32 = vsel %vm1845_vm0, 1, %v5334_v33  ;;  %v1624_v21 = vsel %vm1617_vm10, %v1620_v51, %v1623_v5  ;;  %v1736_v12 = vsub.s32 32, %v1735_v13  ;;  %v1740_v6 = vsub.s32 4294967266, %v1735_v13 }
 0x1a7   : > { %v1858_v29 = vmul.u32 %v1854_v22, %v1830_v61  ;;  %v1625_v35 = vsel %vm1615_vm12, nan, %v1624_v21  ;;  %v1737_v3 = vshll.u32 %v4563_v26, %v1735_v13  ;;  %v1848_v4 = vadd.s32 %v1846_v32, %v1844_v19 }
 0x1a8   : > { %v1861_v8 = vshll.u32 %v1857_v18, 16  ;;  %vm2672_vm2 = vcmp.gt.s32.totalorder %v4529_v11, 0  ;;  %3195 = vmatmul.msk.f32.gmra.mxu0 %vm1068_vm1, %v1625_v35  ;;  %v1738_v47 = vshrl.u32 %v1720_v0, %v1736_v12  ;;  %v1741_v62 = vadd.s32 127, %v1740_v6  ;;  %v5376_v6 = vld [vmem:[#allocation19_spill] sm:$0xff] }
 0x1a9   : > { %vm1863_vm6 = vc.u32 %v1855_v46, %v1859_v60  ;;  %v1865_v54 = vadd.s32 %v1859_v60, %v1855_v46  ;;  %v4600_v36 = vand.u32 31, %v4556_v40  ;;  %v1849_v58 = vadd.s32 %v1848_v4, %v1838_v30  ;;  %v5375_v60 = vld [vmem:[#allocation16_spill] sm:$0xff] }
 0x1aa   : > { %v1860_v61 = vshrl.u32 %v1856_v50, 16  ;;  %v1864_v14 = vsel %vm1863_vm6, 1, %v5334_v33  ;;  %v1739_v49 = vor.u32 %v1738_v47, %v1737_v3  ;;  %v1742_v27 = vshll.u32 %v1741_v62, 23 }
 0x1ab   : > { %v1866_v26 = vadd.s32 %v1864_v14, %v1858_v29  ;;  %vm1867_vm3 = vc.u32 %v1865_v54, %v1861_v8  ;;  %vm1628_vm4 = vcmp.lt.s32.totalorder %v3580_v15, 0  ;;  %v1750_v59 = vsub.s32 4, %v4545_v2 }
 0x1ac   : > { %v1819_v0 = vsel %vm1813_vm7, %v1816_v52, %v1818_v38  ;;  %v1868_v22 = vsel %vm1867_vm3, 1, %v5334_v33  ;;  %v1743_v56 = vor.u32 4788187, %v1742_v27  ;;  %v1850_v48 = vadd.s32 %v1849_v58, %v1840_v25  ;;  %v5373_v38 = vld [vmem:[#allocation23_spill] sm:$0xff] }
 0x1ad   : > { %v1862_v23 = vshrl.u32 %v1857_v18, 16  ;;  %v1870_v53 = vadd.s32 %v1868_v22, %v1866_v26  ;;  %v1869_v55 = vadd.s32 %v1865_v54, %v1861_v8  ;;  %v2257_v16 = vshrl.u32 %v5368_v39, 16  ;;  %v5374_v18 = vld [vmem:[#allocation18_spill] sm:$0xff] }
 0x1ae   : > { %v5370_v46 = vshll.u32 %v5369_v34, 16  ;;  %v2278_v41 = vshll.u32 %v5372_v45, 16  ;;  %v1744_v50 = vand.u32 2147483647, %v1743_v56  ;;  %v1746_v10 = vcvt.s32.f32 %v1739_v49  ;;  %v5379_v26 = vld [vmem:[#allocation22_spill] sm:$0xff] }
 0x1af   : > { %v1871_v30 = vadd.s32 %v1870_v53, %v1860_v61  ;;  %v1873_v52 = vmul.u32 %v4543_v9, %v1819_v0  ;;  %v2280_v25 = vshll.u32 %v5374_v18, 16  ;;  %vm1875_vm8 = vc.u32 %v1850_v48, %v1869_v55 }
 0x1b0   : > { %vm2264_vm5 = vc.u32 %v5371_v20, %v5370_v46  ;;  %vm2282_vm7 = vc.u32 %v5375_v60, %v2278_v41  ;;  %v1747_v51 = vmul.f32 %v1746_v10, %v1744_v50  ;;  %v2284_v32 = vadd.s32 %v2278_v41, %v5375_v60 }
 0x1b1   : > { %v2265_v63 = vsel %vm2264_vm5, 1, %v5334_v33  ;;  %v1872_v5 = vadd.s32 %v1871_v30, %v1862_v23  ;;  %v2283_v13 = vsel %vm2282_vm7, 1, %v5334_v33  ;;  %v2259_v21 = vshrl.u32 %v5369_v34, 16 }
 0x1b2   : > { %v2267_v19 = vadd.s32 %v2265_v63, %v5373_v38  ;;  %v2285_v29 = vadd.s32 %v2283_v13, %v5376_v6  ;;  %v1748_v35 = vxor.u32 2147483648, %v1747_v51  ;;  %v2279_v3 = vshrl.u32 %v5372_v45, 16  ;;  %v5383_v13 = vld [vmem:[#allocation11_spill] sm:$0xff] }
 0x1b3   : > { %v1876_v9 = vadd.s32 1, %v1872_v5  ;;  %vm2286_vm9 = vc.u32 %v2284_v32, %v2280_v25  ;;  %v4626_v4 = vsel %vm2672_vm2, %v4529_v11, 0  ;;  %vm4630_vm10 = vcmp.le.f32.partialorder %v1626_v42, 0.7853982 }
 0x1b4   : > { %v2268_v12 = vadd.s32 %v2267_v19, %v2257_v16  ;;  %v1751_v47 = vsel %vm1628_vm4, %v1750_v59, %v4545_v2  ;;  %v2287_v62 = vsel %vm2286_vm9, 1, %v5334_v33  ;;  %v1749_v54 = vsel %vm1628_vm4, %v1748_v35, %v1747_v51 }
 0x1b5   : > { %v1877_v58 = vsel %vm1875_vm8, %v1876_v9, %v1872_v5  ;;  %v2281_v61 = vshrl.u32 %v5374_v18, 16  ;;  %v2289_v11 = vadd.s32 %v2287_v62, %v2285_v29  ;;  %v4644_v42 = vsel %vm4630_vm10, %v3580_v15, %v1749_v54 }
 0x1b6   : > { %v1878_v14 = vadd.s32 %v1877_v58, %v1873_v52  ;;  %v2269_v49 = vadd.s32 %v2268_v12, %v2259_v21  ;;  %v2288_v27 = vadd.s32 %v2284_v32, %v2280_v25  ;;  %v4647_v0 = vsub.s32 32, %v5379_v26 }
 0x1b7   : > { %v1753_v2 = vsel %vm4630_vm10, 0, %v1751_v47  ;;  %v1754_v59 = vmul.f32 %v4644_v42, %v4644_v42  ;;  %v2290_v22 = vadd.s32 %v2289_v11, %v2279_v3  ;;  %v4654_v56 = vshrl.u32 %v4556_v40, 5 }
 0x1b8   : > { %v4657_v23 = vsub.s32 32, %v4600_v36  ;;  %v1879_v53 = vadd.s32 536870912, %v1878_v14  ;;  %v2353_v39 = vand.u32 2147483647, %v3585_v17  ;;  %v4661_v16 = vand.u32 31, %v4626_v4 }
 0x1b9   : > { %v1755_v34 = vmul.f32 -0.001358992, %v1754_v59  ;;  %v1762_v46 = vmul.f32 -0.00019511016, %v1754_v59  ;;  %v2291_v20 = vadd.s32 %v2290_v22, %v2281_v61  ;;  %v4663_v45 = vand.u32 3, %v1753_v2 }
 0x1ba   : > { %vm1782_vm11 = vcmp.lt.s32.totalorder %v5367_v43, 0  ;;  %v1880_v41 = vshrl.u32 %v1879_v53, 30  ;;  %vm2294_vm12 = vc.u32 %v2269_v49, %v2288_v27  ;;  %vm4668_vm13 = vcmp.le.f32.partialorder %v1780_v37, 0.7853982 }
 0x1bb   : > { %v1756_v40 = vadd.f32 0.041655596, %v1755_v34  ;;  %v1763_v50 = vadd.f32 0.008332121, %v1762_v46  ;;  %v4672_v30 = vadd.s32 %v1869_v55, %v1850_v48  ;;  %v2295_v63 = vadd.s32 1, %v2291_v20  ;;  %v5382_v55 = vld [vmem:[#allocation7_spill] sm:$0xff] }
 0x1bc   : > { %v1881_v52 = vshll.u32 %v1880_v41, 30  ;;  %v4676_v38 = vand.u32 8388607, %v2353_v39  ;;  %v2370_v19 = vshll.u32 %v5336_v44, %v4600_v36  ;;  %v2371_v18 = vshrl.u32 %v5337_v28, %v4657_v23 }
 0x1bd   : > { %v1757_v25 = vmul.f32 %v1756_v40, %v1754_v59  ;;  %v1764_v60 = vmul.f32 %v1763_v50, %v1754_v59  ;;  %v1904_v37 = vsub.s32 4, %v1880_v41  ;;  %v2296_v51 = vsel %vm2294_vm12, %v2295_v63, %v2291_v20 }
 0x1be   : > { %v4682_v5 = vsub.s32 %v1878_v14, %v1881_v52  ;;  %v4684_v48 = vadd.s32 %v2288_v27, %v2269_v49  ;;  %v5384_v32 = vmul.u32 %v5382_v55, %v5383_v13  ;;  %v2373_v12 = vshll.u32 %v5337_v28, %v4600_v36  ;;  %v5385_v13 = vld [vmem:[#allocation5_spill] sm:$0xff] }
 0x1bf   : > { %v1758_v6 = vadd.f32 -0.4999988, %v1757_v25  ;;  %v1765_v29 = vadd.f32 -0.16666654, %v1764_v60  ;;  %v2374_v35 = vshrl.u32 %v5338_v1, %v4657_v23  ;;  %v2379_v9 = vshll.u32 %v5339_v57, %v4600_v36 }
 0x1c0   : > { %v2297_v21 = vadd.s32 %v2296_v51, %v5384_v32  ;;  %vm1772_vm14 = vcmp.eq.s32.totalorder %v4663_v45, 0  ;;  %vm1775_vm15 = vcmp.eq.s32.totalorder %v4663_v45, 2  ;;  %vm1883_vm0 = vcmp.lt.s32.totalorder %v4682_v5, 0 }
 0x1c1   : > { %v1884_v3 = vsub.s32 0, %v4682_v5  ;;  %v2380_v47 = vshrl.u32 %v5340_v24, %v4657_v23  ;;  %v1759_v62 = vmul.f32 %v1758_v6, %v1754_v59  ;;  %v1766_v54 = vmul.f32 %v1765_v29, %v1754_v59 }
 0x1c2   : > { %v2298_v8 = vadd.s32 536870912, %v2297_v21  ;;  %vm1771_vm2 = vcmp.lt.s32.totalorder %v4663_v45, 2  ;;  %v1905_v58 = vsel %vm1782_vm11, %v1904_v37, %v1880_v41  ;;  %v2361_v61 = vor.u32 8388608, %v4676_v38 }
 0x1c3   : > { %vm1769_vm6 = vweird.f32 %v3580_v15  ;;  %v1885_v11 = vsel %vm1883_vm0, %v1884_v3, %v4682_v5  ;;  %v2372_v14 = vor.u32 %v2371_v18, %v2370_v19  ;;  %v2376_v49 = vshll.u32 %v5338_v1, %v4600_v36 }
 0x1c4   : > { %v2377_v27 = vshrl.u32 %v5339_v57, %v4657_v23  ;;  %v1760_v2 = vadd.f32 1.0, %v1759_v62  ;;  %v1767_v59 = vadd.f32 1.0, %v1766_v54  ;;  %v1886_v22 = vclz %v1885_v11 }
 0x1c5   : > { %v4711_v53 = vshrl.u32 %v2298_v8, 30  ;;  %v1907_v34 = vsel %vm4668_vm13, 0, %v1905_v58  ;;  %v4715_v46 = vor.u32 %v2374_v35, %v2373_v12  ;;  %v2381_v20 = vor.u32 %v2380_v47, %v2379_v9 }
 0x1c6   : > { %vm2388_vm3 = vcmp.lt.s32.totalorder %v4654_v56, 4  ;;  %v1768_v41 = vmul.f32 %v1767_v59, %v4644_v42  ;;  %v1776_v40 = vxor.u32 2147483648, %v1760_v2  ;;  %v3190_v50 = vadd.s32 4294967294, %v1886_v22 }
 0x1c7   : > { %v2300_v63 = vshll.u32 %v4711_v53, 30  ;;  %v2369_v52 = vshrl.u32 %v5336_v44, %v4657_v23  ;;  %v2378_v19 = vor.u32 %v2377_v27, %v2376_v49  ;;  %v2382_v18 = vshll.u32 %v5340_v24, %v4600_v36 }
 0x1c8   : > { %v2383_v25 = vshrl.u32 %v5341_v31, %v4657_v23  ;;  %v1773_v60 = vxor.u32 2147483648, %v1768_v41  ;;  %vm3191_vm4 = vcmp.lt.s32.totalorder %v3190_v50, 0  ;;  %vm2385_vm5 = vcmp.lt.s32.totalorder %v4654_v56, 1 }
 0x1c9   : > { %v4726_v37 = vsub.s32 %v2297_v21, %v2300_v63  ;;  %v1889_v42 = vsel %vm3191_vm4, 0, %v3190_v50  ;;  %v4729_v51 = vand.u32 3, %v1907_v34  ;;  %vm2387_vm7 = vcmp.lt.s32.totalorder %v4654_v56, 3 }
 0x1ca   : > { %v2394_v55 = vsel %vm2388_vm3, %v2381_v20, 920167782  ;;  %vm2201_vm8 = vcmp.lt.s32.totalorder %v5385_v13, 0  ;;  %v1774_v36 = vsel %vm1772_vm14, %v1760_v2, %v1773_v60  ;;  %v1777_v23 = vsel %vm1775_vm15, %v1776_v40, %v1768_v41 }
 0x1cb   : > { %v1890_v32 = vsub.s32 32, %v1889_v42  ;;  %v1894_v21 = vsub.s32 4294967266, %v1889_v42  ;;  %v1778_v12 = vsel %vm1771_vm2, %v1774_v36, %v1777_v23  ;;  %vm2302_vm9 = vcmp.lt.s32.totalorder %v4726_v37, 0 }
 0x1cc   : > { %v2303_v6 = vsub.s32 0, %v4726_v37  ;;  %v2384_v29 = vor.u32 %v2383_v25, %v2382_v18  ;;  %v1779_v35 = vsel %vm1769_vm6, nan, %v1778_v12  ;;  %v1891_v9 = vshll.u32 %v4682_v5, %v1889_v42 }
 0x1cd   : > { %v1892_v3 = vshrl.u32 %v4672_v30, %v1890_v32  ;;  %v1895_v8 = vadd.s32 127, %v1894_v21  ;;  %3196 = vmatmul.msk.f32.gmra.mxu0 %vm1068_vm1, %v1779_v35  ;;  %vm2386_vm10 = vcmp.lt.s32.totalorder %v4654_v56, 2  ;;  %v2393_v45 = vsel %vm2385_vm5, %v2372_v14, %v4715_v46 }
 0x1ce   : > { %v2304_v47 = vsel %vm2302_vm9, %v2303_v6, %v4726_v37  ;;  %v2395_v62 = vsel %vm2387_vm7, %v2378_v19, %v2394_v55  ;;  %v2397_v30 = vsel %vm2385_vm5, %v4715_v46, %v2378_v19  ;;  %v2323_v5 = vsub.s32 4, %v4711_v53 }
 0x1cf   : > { %v1893_v15 = vor.u32 %v1892_v3, %v1891_v9  ;;  %v1896_v54 = vshll.u32 %v1895_v8, 23  ;;  %v2305_v58 = vclz %v2304_v47  ;;  %v2389_v11 = vsel %vm2385_vm5, %v2369_v52, %v2372_v14 }
 0x1d0   : > { %v2390_v49 = vsel %vm2388_vm3, %v2378_v19, 2102212464  ;;  %v2398_v27 = vsel %vm2388_vm3, %v2384_v29, 1326507024  ;;  %v2396_v22 = vsel %vm2386_vm10, %v2393_v45, %v2395_v62  ;;  %v4773_v14 = vshll.u32 %v2361_v61, 8 }
 0x1d1   : > { %v1897_v2 = vor.u32 4788187, %v1896_v54  ;;  %v3222_v59 = vadd.s32 4294967294, %v2305_v58  ;;  %v2399_v34 = vsel %vm2387_vm7, %v2381_v20, %v2398_v27  ;;  %v1900_v41 = vcvt.s32.f32 %v1893_v15 }
 0x1d2   : > { %v2400_v40 = vsel %vm2386_vm10, %v2397_v30, %v2399_v34  ;;  %v2426_v50 = vand.u32 65535, %v2396_v22  ;;  %v5386_v52 = vand.u32 2147483647, %v5385_v13  ;;  %v2402_v60 = vand.u32 65535, %v4773_v14 }
 0x1d3   : > { %v1898_v63 = vand.u32 2147483647, %v1897_v2  ;;  %vm3223_vm14 = vcmp.lt.s32.totalorder %v3222_v59, 0  ;;  %v2404_v18 = vand.u32 65535, %v2400_v40  ;;  %v2405_v25 = vshrl.u32 %v2400_v40, 16 }
 0x1d4   : > { %vm4777_vm12 = vcmp.le.f32.partialorder %v5386_v52, 0.7853982  ;;  %v2308_v20 = vsel %vm3223_vm14, 0, %v3222_v59  ;;  %v2403_v42 = vshrl.u32 %v4773_v14, 16  ;;  %v2427_v55 = vshrl.u32 %v2396_v22, 16 }
 0x1d5   : > { %v1901_v38 = vmul.f32 %v1900_v41, %v1898_v63  ;;  %v2309_v61 = vsub.s32 32, %v2308_v20  ;;  %v2310_v36 = vshll.u32 %v4726_v37, %v2308_v20  ;;  %v2313_v23 = vsub.s32 4294967266, %v2308_v20 }
 0x1d6   : > { %v4787_v32 = vsel %vm2201_vm8, %v2323_v5, %v4711_v53  ;;  %v2406_v21 = vmul.u32 %v2404_v18, %v2402_v60  ;;  %v2407_v12 = vmul.u32 %v2405_v25, %v2402_v60  ;;  %v2408_v6 = vmul.u32 %v2404_v18, %v2403_v42 }
 0x1d7   : > { %v1902_v29 = vxor.u32 2147483648, %v1901_v38  ;;  %v2311_v35 = vshrl.u32 %v4684_v48, %v2309_v61  ;;  %v2314_v9 = vadd.s32 127, %v2313_v23  ;;  %v2391_v3 = vsel %vm2387_vm7, %v4715_v46, %v2390_v49 }
 0x1d8   : > { %v2409_v8 = vmul.u32 %v2405_v25, %v2403_v42  ;;  %v2410_v47 = vshll.u32 %v2407_v12, 16  ;;  %v2412_v37 = vshll.u32 %v2408_v6, 16  ;;  %v2428_v45 = vmul.u32 %v2426_v50, %v2402_v60 }
 0x1d9   : > { %v1903_v62 = vsel %vm1782_vm11, %v1902_v29, %v1901_v38  ;;  %v2312_v53 = vor.u32 %v2311_v35, %v2310_v36  ;;  %v2315_v15 = vshll.u32 %v2314_v9, 23  ;;  %v2429_v54 = vmul.u32 %v2427_v55, %v2402_v60 }
 0x1da   : > { %v1906_v58 = vsel %vm4668_vm13, %v5367_v43, %v1903_v62  ;;  %vm2414_vm15 = vc.u32 %v2406_v21, %v2410_v47  ;;  %v2416_v48 = vadd.s32 %v2410_v47, %v2406_v21  ;;  %v4798_v30 = vmul.u32 %v2426_v50, %v2403_v42 }
 0x1db   : > { %v1908_v5 = vmul.f32 %v1906_v58, %v1906_v58  ;;  %v2316_v46 = vor.u32 4788187, %v2315_v15  ;;  %v2319_v49 = vcvt.s32.f32 %v2312_v53  ;;  %v2415_v27 = vsel %vm2414_vm15, 1, %v5334_v33 }
 0x1dc   : > { %v2411_v2 = vshrl.u32 %v2407_v12, 16  ;;  %v2417_v59 = vadd.s32 %v2415_v27, %v2409_v8  ;;  %vm2418_vm0 = vc.u32 %v2416_v48, %v2412_v37  ;;  %v2432_v22 = vshll.u32 %v2429_v54, 16 }
 0x1dd   : > { %v1909_v34 = vmul.f32 -0.001358992, %v1908_v5  ;;  %v1916_v41 = vmul.f32 -0.00019511016, %v1908_v5  ;;  %v2317_v40 = vand.u32 2147483647, %v2316_v46  ;;  %v4806_v50 = vsel %vm2386_vm10, %v2389_v11, %v2391_v3 }
 0x1de   : > { %v2326_v10 = vsel %vm4777_vm12, 0, %v4787_v32  ;;  %v2419_v63 = vsel %vm2418_vm0, 1, %v5334_v33  ;;  %v2434_v52 = vshll.u32 %v4798_v30, 16  ;;  %v2413_v38 = vshrl.u32 %v2408_v6, 16  ;;  %v5389_v11 = vld [vmem:[#allocation6_spill] sm:$0xff] }
 0x1df   : > { %v1910_v18 = vadd.f32 0.041655596, %v1909_v34  ;;  %v1917_v25 = vadd.f32 0.008332121, %v1916_v41  ;;  %v2320_v20 = vmul.f32 %v2319_v49, %v2317_v40  ;;  %v2421_v60 = vadd.s32 %v2419_v63, %v2417_v59 }
 0x1e0   : > { %v2431_v61 = vmul.u32 %v2427_v55, %v2403_v42  ;;  %vm2436_vm11 = vc.u32 %v2428_v45, %v2432_v22  ;;  %v2438_v36 = vadd.s32 %v2432_v22, %v2428_v45  ;;  %v2433_v29 = vshrl.u32 %v2429_v54, 16 }
 0x1e1   : > { %v1911_v23 = vmul.f32 %v1910_v18, %v1908_v5  ;;  %v1918_v21 = vmul.f32 %v1917_v25, %v1908_v5  ;;  %v2321_v12 = vxor.u32 2147483648, %v2320_v20  ;;  %v2422_v32 = vadd.s32 %v2421_v60, %v2411_v2 }
 0x1e2   : > { %v2437_v56 = vsel %vm2436_vm11, 1, %v5334_v33  ;;  %vm2440_vm13 = vc.u32 %v2438_v36, %v2434_v52  ;;  %v2507_v35 = vand.u32 2147483647, %v5389_v11  ;;  %v4814_v47 = vadd.s32 %v2438_v36, %v2434_v52 }
 0x1e3   : > { %v1912_v9 = vadd.f32 -0.4999988, %v1911_v23  ;;  %v1919_v3 = vadd.f32 -0.16666654, %v1918_v21  ;;  %v2322_v8 = vsel %vm2201_vm8, %v2321_v12, %v2320_v20  ;;  %vm1926_vm2 = vcmp.eq.s32.totalorder %v4729_v51, 0 }
 0x1e4   : > { %v4820_v42 = vsel %vm4777_vm12, %v5385_v13, %v2322_v8  ;;  %v4822_v55 = vadd.s32 %v2422_v32, %v2413_v38  ;;  %v2439_v6 = vadd.s32 %v2437_v56, %v2431_v61  ;;  %v2441_v37 = vsel %vm2440_vm13, 1, %v5334_v33 }
 0x1e5   : > { %v1913_v45 = vmul.f32 %v1912_v9, %v1908_v5  ;;  %v1920_v62 = vmul.f32 %v1919_v3, %v1908_v5  ;;  %vm1925_vm6 = vcmp.lt.s32.totalorder %v4729_v51, 2  ;;  %vm1929_vm3 = vcmp.eq.s32.totalorder %v4729_v51, 2 }
 0x1e6   : > { %v2327_v53 = vmul.f32 %v4820_v42, %v4820_v42  ;;  %vm1923_vm4 = vweird.f32 %v5367_v43  ;;  %v4830_v15 = vand.u32 3, %v2326_v10  ;;  %v2435_v19 = vshrl.u32 %v4798_v30, 16 }
 0x1e7   : > { %v2443_v54 = vadd.s32 %v2441_v37, %v2439_v6  ;;  %v2446_v48 = vmul.u32 %v4773_v14, %v4806_v50  ;;  %v1914_v46 = vadd.f32 1.0, %v1913_v45  ;;  %v1921_v49 = vadd.f32 1.0, %v1920_v62 }
 0x1e8   : > { %v2328_v5 = vmul.f32 -0.001358992, %v2327_v53  ;;  %v2335_v27 = vmul.f32 -0.00019511016, %v2327_v53  ;;  %vm2448_vm5 = vc.u32 %v4822_v55, %v4814_v47  ;;  %v2514_v59 = vand.u32 8388607, %v2507_v35 }
 0x1e9   : > { %v2444_v2 = vadd.s32 %v2443_v54, %v2433_v29  ;;  %v2524_v22 = vshll.u32 %v5336_v44, %v5379_v26  ;;  %v1922_v34 = vmul.f32 %v1921_v49, %v1906_v58  ;;  %v1930_v30 = vxor.u32 2147483648, %v1914_v46  ;;  %v5390_v49 = vld [vmem:[#allocation21_spill] sm:$0xff] }
 0x1ea   : > { %v2329_v41 = vadd.f32 0.041655596, %v2328_v5  ;;  %v2336_v40 = vadd.f32 0.008332121, %v2335_v27  ;;  %v2527_v14 = vshll.u32 %v5337_v28, %v5379_v26  ;;  %v2528_v50 = vshrl.u32 %v5338_v1, %v4647_v0 }
 0x1eb   : > { %v2445_v10 = vadd.s32 %v2444_v2, %v2435_v19  ;;  %v2530_v63 = vshll.u32 %v5338_v1, %v5379_v26  ;;  %v1927_v52 = vxor.u32 2147483648, %v1922_v34  ;;  %v2531_v20 = vshrl.u32 %v5339_v57, %v4647_v0 }
 0x1ec   : > { %v2330_v18 = vmul.f32 %v2329_v41, %v2327_v53  ;;  %v2337_v25 = vmul.f32 %v2336_v40, %v2327_v53  ;;  %v1931_v58 = vsel %vm1929_vm3, %v1930_v30, %v1922_v34  ;;  %v2533_v38 = vshll.u32 %v5339_v57, %v5379_v26 }
 0x1ed   : > { %v2449_v60 = vadd.s32 1, %v2445_v10  ;;  %v2534_v61 = vshrl.u32 %v5340_v24, %v4647_v0  ;;  %v1928_v36 = vsel %vm1926_vm2, %v1914_v46, %v1927_v52  ;;  %v2536_v12 = vshll.u32 %v5340_v24, %v5379_v26 }
 0x1ee   : > { %v2331_v23 = vadd.f32 -0.4999988, %v2330_v18  ;;  %v2338_v21 = vadd.f32 -0.16666654, %v2337_v25  ;;  %v1932_v32 = vsel %vm1925_vm6, %v1928_v36, %v1931_v58  ;;  %v2525_v56 = vshrl.u32 %v5337_v28, %v4647_v0 }
 0x1ef   : > { %v2450_v29 = vsel %vm2448_vm5, %v2449_v60, %v2445_v10  ;;  %v2537_v9 = vshrl.u32 %v5341_v31, %v4647_v0  ;;  %v1933_v3 = vsel %vm1923_vm4, nan, %v1932_v32  ;;  %vm2342_vm7 = vweird.f32 %v5385_v13 }
 0x1f0   : > { %v2332_v8 = vmul.f32 %v2331_v23, %v2327_v53  ;;  %v2339_v6 = vmul.f32 %v2338_v21, %v2327_v53  ;;  %v2451_v37 = vadd.s32 %v2450_v29, %v2446_v48  ;;  %3197 = vmatmul.msk.f32.gmra.mxu0 %vm1068_vm1, %v1933_v3  ;;  %v2529_v26 = vor.u32 %v2528_v50, %v2527_v14 }
 0x1f1   : > { %v2532_v51 = vor.u32 %v2531_v20, %v2530_v63  ;;  %v2535_v45 = vor.u32 %v2534_v61, %v2533_v38  ;;  %v2538_v62 = vor.u32 %v2537_v9, %v2536_v12  ;;  %vm2542_vm8 = vcmp.lt.s32.totalorder %v5390_v49, 4 }
 0x1f2   : > { %v2333_v19 = vadd.f32 1.0, %v2332_v8  ;;  %v2340_v54 = vadd.f32 1.0, %v2339_v6  ;;  %v2452_v46 = vadd.s32 536870912, %v2451_v37  ;;  %vm2344_vm9 = vcmp.lt.s32.totalorder %v4830_v15, 2 }
 0x1f3   : > { %v2515_v43 = vor.u32 8388608, %v2514_v59  ;;  %v2526_v5 = vor.u32 %v2525_v56, %v2524_v22  ;;  %vm2539_vm10 = vcmp.lt.s32.totalorder %v5390_v49, 1  ;;  %vm2541_vm12 = vcmp.lt.s32.totalorder %v5390_v49, 3 }
 0x1f4   : > { %v2341_v53 = vmul.f32 %v2340_v54, %v4820_v42  ;;  %v2349_v48 = vxor.u32 2147483648, %v2333_v19  ;;  %v4876_v27 = vshrl.u32 %v2452_v46, 30  ;;  %vm2345_vm14 = vcmp.eq.s32.totalorder %v4830_v15, 0 }
 0x1f5   : > { %vm2348_vm15 = vcmp.eq.s32.totalorder %v4830_v15, 2  ;;  %v2548_v2 = vsel %vm2542_vm8, %v2535_v45, 920167782  ;;  %v2552_v59 = vsel %vm2542_vm8, %v2538_v62, 1326507024  ;;  %vm2540_vm0 = vcmp.lt.s32.totalorder %v5390_v49, 2 }
 0x1f6   : > { %v2346_v22 = vxor.u32 2147483648, %v2341_v53  ;;  %v2454_v34 = vshll.u32 %v4876_v27, 30  ;;  %v2551_v42 = vsel %vm2539_vm10, %v2529_v26, %v2532_v51  ;;  %v2547_v30 = vsel %vm2539_vm10, %v2526_v5, %v2529_v26 }
 0x1f7   : > { %v2549_v41 = vsel %vm2541_vm12, %v2532_v51, %v2548_v2  ;;  %v2553_v40 = vsel %vm2541_vm12, %v2535_v45, %v2552_v59  ;;  %v4895_v10 = vshll.u32 %v2515_v43, 8  ;;  %v2350_v50 = vsel %vm2348_vm15, %v2349_v48, %v2341_v53 }
 0x1f8   : > { %v2347_v14 = vsel %vm2345_vm14, %v2333_v19, %v2346_v22  ;;  %v2455_v63 = vsub.s32 %v2451_v37, %v2454_v34  ;;  %v2523_v52 = vshrl.u32 %v5336_v44, %v4647_v0  ;;  %v2544_v25 = vsel %vm2542_vm8, %v2532_v51, 2102212464 }
 0x1f9   : > { %v2351_v18 = vsel %vm2344_vm9, %v2347_v14, %v2350_v50  ;;  %v2554_v20 = vsel %vm2540_vm0, %v2551_v42, %v2553_v40  ;;  %v2556_v58 = vand.u32 65535, %v4895_v10  ;;  %v2550_v61 = vsel %vm2540_vm0, %v2547_v30, %v2549_v41 }
 0x1fa   : > { %v2352_v60 = vsel %vm2342_vm7, nan, %v2351_v18  ;;  %vm2456_vm11 = vcmp.lt.s32.totalorder %v2455_v63, 0  ;;  %v2457_v38 = vsub.s32 0, %v2455_v63  ;;  %v2557_v0 = vshrl.u32 %v4895_v10, 16 }
 0x1fb   : > { %3235 = vmatmul.msk.f32.vlgmr.msra.gmra.mxu0 %vm1068_vm1, %v2352_v60  ;;  %v2558_v15 = vand.u32 65535, %v2554_v20  ;;  %v2559_v36 = vshrl.u32 %v2554_v20, 16  ;;  %v2580_v23 = vand.u32 65535, %v2550_v61  ;;  %v2543_v12 = vsel %vm2539_vm10, %v2523_v52, %v2526_v5 }
 0x1fc   : > { %v2458_v21 = vsel %vm2456_vm11, %v2457_v38, %v2455_v63  ;;  %v2545_v13 = vsel %vm2541_vm12, %v2529_v26, %v2544_v25  ;;  %v4917_v3 = vsub.s32 32, %v4661_v16  ;;  %v2447_v8 = vadd.s32 %v4814_v47, %v4822_v55 }
 0x1fd   : > { %v2459_v32 = vclz %v2458_v21  ;;  %v2560_v29 = vmul.u32 %v2558_v15, %v2556_v58  ;;  %v2561_v56 = vmul.u32 %v2559_v36, %v2556_v58  ;;  %v2562_v9 = vmul.u32 %v2558_v15, %v2557_v0 }
 0x1fe   : > { %v2581_v6 = vshrl.u32 %v2550_v61, 16  ;;  %v2584_v37 = vmul.u32 %v2580_v23, %v2557_v0  ;;  %v4923_v45 = vsel %vm2540_vm0, %v2543_v12, %v2545_v13  ;;  %v2563_v62 = vmul.u32 %v2559_v36, %v2557_v0 }
 0x1ff   : > { %v3225_v51 = vadd.s32 4294967294, %v2459_v32  ;;  %v2564_v19 = vshll.u32 %v2561_v56, 16  ;;  %v2565_v26 = vshrl.u32 %v2561_v56, 16  ;;  %v2566_v54 = vshll.u32 %v2562_v9, 16 }
 0x200   : > { %v2582_v46 = vmul.u32 %v2580_v23, %v2556_v58  ;;  %v2583_v43 = vmul.u32 %v2581_v6, %v2556_v58  ;;  %v2585_v53 = vmul.u32 %v2581_v6, %v2557_v0  ;;  %v2588_v2 = vshll.u32 %v2584_v37, 16 }
 0x201   : > { %vm3226_vm13 = vcmp.lt.s32.totalorder %v3225_v51, 0  ;;  %vm2568_vm2 = vc.u32 %v2560_v29, %v2564_v19  ;;  %v2570_v5 = vadd.s32 %v2564_v19, %v2560_v29  ;;  %v2567_v42 = vshrl.u32 %v2562_v9, 16 }
 0x202   : > { %v2462_v48 = vsel %vm3226_vm13, 0, %v3225_v51  ;;  %v2569_v47 = vsel %vm2568_vm2, 1, %v5334_v33  ;;  %v2586_v55 = vshll.u32 %v2583_v43, 16  ;;  %v2587_v18 = vshrl.u32 %v2583_v43, 16 }
 0x203   : > { %v2463_v59 = vsub.s32 32, %v2462_v48  ;;  %v2464_v22 = vshll.u32 %v2455_v63, %v2462_v48  ;;  %v2467_v49 = vsub.s32 4294967266, %v2462_v48  ;;  %v2571_v34 = vadd.s32 %v2569_v47, %v2563_v62 }
 0x204   : > { %vm2572_vm6 = vc.u32 %v2570_v5, %v2566_v54  ;;  %vm2590_vm3 = vc.u32 %v2582_v46, %v2586_v55  ;;  %v2592_v30 = vadd.s32 %v2586_v55, %v2582_v46  ;;  %v2661_v60 = vand.u32 2147483647, %v5363_v7 }
 0x205   : > { %v2465_v41 = vshrl.u32 %v2447_v8, %v2463_v59  ;;  %v2468_v40 = vadd.s32 127, %v2467_v49  ;;  %v2573_v14 = vsel %vm2572_vm6, 1, %v5334_v33  ;;  %v2591_v50 = vsel %vm2590_vm3, 1, %v5334_v33 }
 0x206   : > { %v2575_v52 = vadd.s32 %v2573_v14, %v2571_v34  ;;  %v2593_v25 = vadd.s32 %v2591_v50, %v2585_v53  ;;  %vm2594_vm4 = vc.u32 %v2592_v30, %v2588_v2  ;;  %v2589_v61 = vshrl.u32 %v2584_v37, 16 }
 0x207   : > { %v2466_v20 = vor.u32 %v2465_v41, %v2464_v22  ;;  %v2469_v58 = vshll.u32 %v2468_v40, 23  ;;  %v2595_v63 = vsel %vm2594_vm4, 1, %v5334_v33  ;;  %v4931_v15 = vshrl.u32 %v4626_v4, 5 }
 0x208   : > { %v2576_v38 = vadd.s32 %v2575_v52, %v2565_v26  ;;  %v2597_v0 = vadd.s32 %v2595_v63, %v2593_v25  ;;  %vm2355_vm5 = vcmp.lt.s32.totalorder %v3585_v17, 0  ;;  %v4934_v23 = vadd.s32 %v2592_v30, %v2588_v2 }
 0x209   : > { %v2470_v36 = vor.u32 4788187, %v2469_v58  ;;  %v2473_v21 = vcvt.s32.f32 %v2466_v20  ;;  %v2600_v32 = vmul.u32 %v4895_v10, %v4923_v45  ;;  %v2668_v56 = vand.u32 8388607, %v2661_v60 }
 0x20a   : > { %v4936_v12 = vadd.s32 %v2576_v38, %v2567_v42  ;;  %v2598_v13 = vadd.s32 %v2597_v0, %v2587_v18  ;;  %v2681_v4 = vshll.u32 %v5337_v28, %v4661_v16  ;;  %v2682_v9 = vshrl.u32 %v5338_v1, %v4917_v3 }
 0x20b   : > { %v2471_v29 = vand.u32 2147483647, %v2470_v36  ;;  %v2678_v6 = vshll.u32 %v5336_v44, %v4661_v16  ;;  %v2679_v37 = vshrl.u32 %v5337_v28, %v4917_v3  ;;  %v2684_v10 = vshll.u32 %v5338_v1, %v4661_v16 }
 0x20c   : > { %v2599_v8 = vadd.s32 %v2598_v13, %v2589_v61  ;;  %vm2602_vm7 = vc.u32 %v4936_v12, %v4934_v23  ;;  %v2685_v45 = vshrl.u32 %v5339_v57, %v4917_v3  ;;  %v2687_v62 = vshll.u32 %v5339_v57, %v4661_v16 }
 0x20d   : > { %v2474_v51 = vmul.f32 %v2473_v21, %v2471_v29  ;;  %v2688_v26 = vshrl.u32 %v5340_v24, %v4917_v3  ;;  %v2690_v28 = vshll.u32 %v5340_v24, %v4661_v16  ;;  %v2691_v1 = vshrl.u32 %v5341_v31, %v4917_v3 }
 0x20e   : > { %v2603_v19 = vadd.s32 1, %v2599_v8  ;;  %vm4966_vm8 = vcmp.le.f32.partialorder %v2353_v39, 0.7853982  ;;  %v2477_v43 = vsub.s32 4, %v4876_v27  ;;  %v4971_v57 = vor.u32 %v2682_v9, %v2681_v4 }
 0x20f   : > { %v2475_v46 = vxor.u32 2147483648, %v2474_v51  ;;  %v4973_v53 = vor.u32 %v2685_v45, %v2684_v10  ;;  %v2689_v48 = vor.u32 %v2688_v26, %v2687_v62  ;;  %v2692_v47 = vor.u32 %v2691_v1, %v2690_v28 }
 0x210   : > { %v2604_v5 = vsel %vm2602_vm7, %v2603_v19, %v2599_v8  ;;  %vm2693_vm9 = vcmp.lt.s32.totalorder %v4931_v15, 1  ;;  %vm2696_vm10 = vcmp.lt.s32.totalorder %v4931_v15, 4  ;;  %v2669_v16 = vor.u32 8388608, %v2668_v56 }
 0x211   : > { %v2476_v24 = vsel %vm2355_vm5, %v2475_v46, %v2474_v51  ;;  %v2605_v31 = vadd.s32 %v2604_v5, %v2600_v32  ;;  %v4982_v55 = vor.u32 %v2679_v37, %v2678_v6  ;;  %vm2695_vm12 = vcmp.lt.s32.totalorder %v4931_v15, 3 }
 0x212   : > { %v2479_v39 = vsel %vm4966_vm8, %v3585_v17, %v2476_v24  ;;  %v2478_v2 = vsel %vm2355_vm5, %v2477_v43, %v4876_v27  ;;  %vm2694_vm14 = vcmp.lt.s32.totalorder %v4931_v15, 2  ;;  %v2702_v49 = vsel %vm2696_vm10, %v2689_v48, 920167782 }
 0x213   : > { %v2481_v59 = vmul.f32 %v2479_v39, %v2479_v39  ;;  %v2606_v22 = vadd.s32 536870912, %v2605_v31  ;;  %v2705_v34 = vsel %vm2693_vm9, %v4971_v57, %v4973_v53  ;;  %v2706_v42 = vsel %vm2696_vm10, %v2692_v47, 1326507024 }
 0x214   : > { %v2707_v27 = vsel %vm2695_vm12, %v2689_v48, %v2706_v42  ;;  %v2480_v14 = vsel %vm4966_vm8, 0, %v2478_v2  ;;  %v2701_v50 = vsel %vm2693_vm9, %v4982_v55, %v4971_v57  ;;  %v5009_v18 = vshll.u32 %v2669_v16, 8 }
 0x215   : > { %v2482_v30 = vmul.f32 -0.001358992, %v2481_v59  ;;  %v2489_v41 = vmul.f32 -0.00019511016, %v2481_v59  ;;  %v4997_v40 = vshrl.u32 %v2606_v22, 30  ;;  %v2708_v52 = vsel %vm2694_vm14, %v2705_v34, %v2707_v27 }
 0x216   : > { %v2703_v63 = vsel %vm2695_vm12, %v4973_v53, %v2702_v49  ;;  %v2710_v38 = vand.u32 65535, %v5009_v18  ;;  %v2711_v61 = vshrl.u32 %v5009_v18, 16  ;;  %v2712_v0 = vand.u32 65535, %v2708_v52 }
 0x217   : > { %v2483_v25 = vadd.f32 0.041655596, %v2482_v30  ;;  %v2490_v20 = vadd.f32 0.008332121, %v2489_v41  ;;  %v2608_v58 = vshll.u32 %v4997_v40, 30  ;;  %v2713_v36 = vshrl.u32 %v2708_v52, 16 }
 0x218   : > { %v2497_v32 = vand.u32 3, %v2480_v14  ;;  %v2704_v56 = vsel %vm2694_vm14, %v2701_v50, %v2703_v63  ;;  %v2714_v4 = vmul.u32 %v2712_v0, %v2710_v38  ;;  %v5021_v8 = vmul.u32 %v2712_v0, %v2711_v61 }
 0x219   : > { %v2484_v21 = vmul.f32 %v2483_v25, %v2481_v59  ;;  %v2491_v13 = vmul.f32 %v2490_v20, %v2481_v59  ;;  %v2609_v29 = vsub.s32 %v2605_v31, %v2608_v58  ;;  %v5019_v9 = vmul.u32 %v2713_v36, %v2710_v38 }
 0x21a   : > { %vm2498_vm0 = vcmp.lt.s32.totalorder %v2497_v32, 2  ;;  %v2717_v26 = vmul.u32 %v2713_v36, %v2711_v61  ;;  %vm2496_vm11 = vweird.f32 %v3585_v17  ;;  %vm2499_vm13 = vcmp.eq.s32.totalorder %v2497_v32, 0 }
 0x21b   : > { %v2485_v6 = vadd.f32 -0.4999988, %v2484_v21  ;;  %v2492_v37 = vadd.f32 -0.16666654, %v2491_v13  ;;  %vm2610_vm15 = vcmp.lt.s32.totalorder %v2609_v29, 0  ;;  %v2611_v10 = vsub.s32 0, %v2609_v29 }
 0x21c   : > { %v2718_v51 = vshll.u32 %v5019_v9, 16  ;;  %v2720_v1 = vshll.u32 %v5021_v8, 16  ;;  %v2735_v54 = vshrl.u32 %v2704_v56, 16  ;;  %v2734_v5 = vand.u32 65535, %v2704_v56 }
 0x21d   : > { %v2486_v45 = vmul.f32 %v2485_v6, %v2481_v59  ;;  %v2493_v62 = vmul.f32 %v2492_v37, %v2481_v59  ;;  %v2612_v19 = vsel %vm2610_vm15, %v2611_v10, %v2609_v29  ;;  %vm2502_vm6 = vcmp.eq.s32.totalorder %v2497_v32, 2 }
 0x21e   : > { %v2613_v28 = vclz %v2612_v19  ;;  %vm2722_vm2 = vc.u32 %v2714_v4, %v2718_v51  ;;  %v2724_v24 = vadd.s32 %v2718_v51, %v2714_v4  ;;  %v2601_v2 = vadd.s32 %v4934_v23, %v4936_v12 }
 0x21f   : > { %v2487_v46 = vadd.f32 1.0, %v2486_v45  ;;  %v2494_v43 = vadd.f32 1.0, %v2493_v62  ;;  %v2723_v47 = vsel %vm2722_vm2, 1, %v5334_v33  ;;  %v2719_v22 = vshrl.u32 %v5019_v9, 16 }
 0x220   : > { %v3228_v48 = vadd.s32 4294967294, %v2613_v28  ;;  %v2725_v59 = vadd.s32 %v2723_v47, %v2717_v26  ;;  %vm2726_vm4 = vc.u32 %v2724_v24, %v2720_v1  ;;  %v2737_v49 = vmul.u32 %v2735_v54, %v2710_v38 }
 0x221   : > { %v2495_v31 = vmul.f32 %v2494_v43, %v2479_v39  ;;  %v2503_v16 = vxor.u32 2147483648, %v2487_v46  ;;  %v2727_v30 = vsel %vm2726_vm4, 1, %v5334_v33  ;;  %v2736_v41 = vmul.u32 %v2734_v5, %v2710_v38 }
 0x222   : > { %vm3229_vm3 = vcmp.lt.s32.totalorder %v3228_v48, 0  ;;  %v2729_v25 = vadd.s32 %v2727_v30, %v2725_v59  ;;  %v2738_v23 = vmul.u32 %v2734_v5, %v2711_v61  ;;  %v2740_v12 = vshll.u32 %v2737_v49, 16 }
 0x223   : > { %v2500_v34 = vxor.u32 2147483648, %v2495_v31  ;;  %v2616_v42 = vsel %vm3229_vm3, 0, %v3228_v48  ;;  %v2504_v27 = vsel %vm2502_vm6, %v2503_v16, %v2495_v31  ;;  %v2739_v0 = vmul.u32 %v2735_v54, %v2711_v61 }
 0x224   : > { %v2617_v14 = vsub.s32 32, %v2616_v42  ;;  %v2618_v50 = vshll.u32 %v2609_v29, %v2616_v42  ;;  %v2621_v39 = vsub.s32 4294967266, %v2616_v42  ;;  %v2742_v21 = vshll.u32 %v2738_v23, 16 }
 0x225   : > { %v2501_v52 = vsel %vm2499_vm13, %v2487_v46, %v2500_v34  ;;  %v2677_v29 = vshrl.u32 %v5336_v44, %v4917_v3  ;;  %vm2744_vm5 = vc.u32 %v2736_v41, %v2740_v12  ;;  %v2698_v32 = vsel %vm2696_vm10, %v4973_v53, 2102212464 }
 0x226   : > { %v2505_v20 = vsel %vm2498_vm0, %v2501_v52, %v2504_v27  ;;  %v2619_v58 = vshrl.u32 %v2601_v2, %v2617_v14  ;;  %v2622_v63 = vadd.s32 127, %v2621_v39  ;;  %v2721_v56 = vshrl.u32 %v5021_v8, 16 }
 0x227   : > { %v2506_v36 = vsel %vm2496_vm11, nan, %v2505_v20  ;;  %v2745_v61 = vsel %vm2744_vm5, 1, %v5334_v33  ;;  %v2746_v4 = vadd.s32 %v2740_v12, %v2736_v41  ;;  %v2730_v6 = vadd.s32 %v2729_v25, %v2719_v22 }
 0x228   : > { %3236 = vmatmul.msk.f32.gmra.mxu0 %vm1068_vm1, %v2506_v36  ;;  %v2620_v38 = vor.u32 %v2619_v58, %v2618_v50  ;;  %v2623_v13 = vshll.u32 %v2622_v63, 23  ;;  %v2747_v37 = vadd.s32 %v2745_v61, %v2739_v0  ;;  %v2741_v10 = vshrl.u32 %v2737_v49, 16 }
 0x229   : > { %vm2748_vm7 = vc.u32 %v2746_v4, %v2742_v21  ;;  %v2697_v44 = vsel %vm2693_vm9, %v2677_v29, %v4982_v55  ;;  %v2699_v3 = vsel %vm2695_vm12, %v4971_v57, %v2698_v32  ;;  %v2743_v8 = vshrl.u32 %v2738_v23, 16 }
 0x22a   : > { %v2624_v17 = vor.u32 4788187, %v2623_v13  ;;  %v2627_v9 = vcvt.s32.f32 %v2620_v38  ;;  %v2749_v53 = vsel %vm2748_vm7, 1, %v5334_v33  ;;  %v2731_v19 = vadd.s32 %v2730_v6, %v2721_v56 }
 0x22b   : > { %v2751_v45 = vadd.s32 %v2749_v53, %v2747_v37  ;;  %v2750_v26 = vadd.s32 %v2746_v4, %v2742_v21  ;;  %v2700_v28 = vsel %vm2694_vm14, %v2697_v44, %v2699_v3  ;;  %vm2509_vm8 = vcmp.lt.s32.totalorder %v5389_v11, 0  ;;  %v1098_v44 = vpop.f32.mrf.mxu0  ;;  %v1124_v3 = vld [vmem:[%s5270_s5 + $0x10] sm:$0xff] }
 0x22c   : > { %v2625_v51 = vand.u32 2147483647, %v2624_v17  ;;  %vm5056_vm9 = vcmp.le.f32.partialorder %v2507_v35, 0.7853982  ;;  %v2754_v57 = vmul.u32 %v5009_v18, %v2700_v28  ;;  %v2631_v35 = vsub.s32 4, %v4997_v40  ;;  %v1122_v28 = vld [vmem:[%s5270_s5] sm:$0xff] }
 0x22d   : > { %v2752_v1 = vadd.s32 %v2751_v45, %v2741_v10  ;;  %vm2756_vm10 = vc.u32 %v2731_v19, %v2750_v26  ;;  %vm2650_vm11 = vweird.f32 %v5389_v11  ;;  %v2755_v29 = vadd.s32 %v2750_v26, %v2731_v19 }
 0x22e   : > { %v2628_v62 = vmul.f32 %v2627_v9, %v2625_v51  ;;  %v2632_v18 = vsel %vm2509_vm8, %v2631_v35, %v4997_v40  ;;  %v1125_v51 = vld [vmem:[%s5270_s5 + $0x18] sm:$0xff]  ;;  %vm1130_vm6 = vcmask 261120   ;;  %vm2663_vm3 = vcmp.lt.s32.totalorder %v5363_v7, 0 }
 0x22f   : > { %v2753_v46 = vadd.s32 %v2752_v1, %v2743_v8  ;;  %v2634_v27 = vsel %vm5056_vm9, 0, %v2632_v18  ;;  %1155 = vmatpush.msra.mxu1 %v1125_v51  ;;  %vm5105_vm4 = vcmp.le.f32.partialorder %v2661_v60, 0.7853982  ;;  %v3198_v60 = vld [vmem:[%s5270_s5 + $0x20] sm:$0xff] }
 0x230   : > { %v2629_v54 = vxor.u32 2147483648, %v2628_v62  ;;  %v2651_v12 = vand.u32 3, %v2634_v27 }
 0x231   : > { %v2757_v43 = vadd.s32 1, %v2753_v46  ;;  %1156 = vmatpush.msra.mxu1 %v1124_v3 }
 0x232   : > { %v2630_v33 = vsel %vm2509_vm8, %v2629_v54, %v2628_v62  ;;  %vm2653_vm14 = vcmp.eq.s32.totalorder %v2651_v12, 0  ;;  %vm2656_vm15 = vcmp.eq.s32.totalorder %v2651_v12, 2  ;;  %vm2652_vm0 = vcmp.lt.s32.totalorder %v2651_v12, 2  ;;  %v1123_v62 = vld [vmem:[%s5270_s5 + $0x8] sm:$0xff] }
 0x233   : > { %v2633_v15 = vsel %vm5056_vm9, %v5389_v11, %v2630_v33  ;;  %v2758_v48 = vsel %vm2756_vm10, %v2757_v43, %v2753_v46  ;;  %v5083_v11 = vld [vmem:[%s5269_s4] ss:$0 sm:$0xff]  ;;  %1157 = vmatpush.msra.mxu1 %v1123_v62  ;;  %v3201_v46 = vld [vmem:[%s5270_s5 + $0x38] sm:$0xff]  ;;  %v1101_v33 = vpop.f32.mrf.mxu0 }
 0x234   : > { %v2635_v5 = vmul.f32 %v2633_v15, %v2633_v15  ;;  %v2759_v31 = vadd.s32 %v2758_v48, %v2754_v57  ;;  %v1099_v45 = vadd.f32 %v5083_v11, %v1098_v44  ;;  %v3200_v57 = vld [vmem:[%s5270_s5 + $0x30] sm:$0xff] }
 0x235   : > { %1158 = vmatpush.msra.mxu1 %v1122_v28 }
 0x236   : > { %v2636_v47 = vmul.f32 -0.001358992, %v2635_v5  ;;  %v2643_v24 = vmul.f32 -0.00019511016, %v2635_v5  ;;  %v2760_v59 = vadd.s32 536870912, %v2759_v31  ;;  %vm1110_vm2 = vcmp.gt.f32.partialorder %v1099_v45, 0.0 }
 0x237   : > { %v1114_v26 = vmul.f32 0.2, %v1099_v45  ;;  %2028 = vmatpush.msrb.mxu1 %v3201_v46 }
 0x238   : > { %v2637_v16 = vadd.f32 0.041655596, %v2636_v47  ;;  %v2644_v2 = vadd.f32 0.008332121, %v2643_v24  ;;  %v5067_v34 = vshrl.u32 %v2760_v59, 30  ;;  %v3199_v47 = vld [vmem:[%s5270_s5 + $0x28] sm:$0xff] }
 0x239   : > { %v1118_v54 = vsel %vm1110_vm2, %v1099_v45, %v1114_v26  ;;  %2029 = vmatpush.msrb.mxu1 %v3200_v57 }
 0x23a   : > { %v2638_v22 = vmul.f32 %v2637_v16, %v2635_v5  ;;  %v2645_v49 = vmul.f32 %v2644_v2, %v2635_v5  ;;  %v2762_v41 = vshll.u32 %v5067_v34, 30  ;;  %3168 = vmatmul.msk.f32.vlgmr.msra.gmra.mxu1 %vm1130_vm6, %v1118_v54  ;;  %v2785_v59 = vsub.s32 4, %v5067_v34 }
 0x23b   : > { %2030 = vmatpush.msrb.mxu1 %v3199_v47 }
 0x23c   : > { %v2639_v42 = vadd.f32 -0.4999988, %v2638_v22  ;;  %v2646_v30 = vadd.f32 -0.16666654, %v2645_v49  ;;  %v2763_v39 = vsub.s32 %v2759_v31, %v2762_v41  ;;  %v3242_v22 = vld [vmem:[%s5270_s5 + $0x58] sm:$0xff] }
 0x23d   : > { %2031 = vmatpush.msrb.mxu1 %v3198_v60 }
 0x23e   : > { %v2640_v14 = vmul.f32 %v2639_v42, %v2635_v5  ;;  %v2647_v50 = vmul.f32 %v2646_v30, %v2635_v5  ;;  %vm2764_vm12 = vcmp.lt.s32.totalorder %v2763_v39, 0  ;;  %v2765_v23 = vsub.s32 0, %v2763_v39  ;;  %v1104_v42 = vpop.f32.mrf.mxu0  ;;  %v3241_v30 = vld [vmem:[%s5270_s5 + $0x50] sm:$0xff] }
 0x23f   : > { %v1102_v5 = vadd.f32 %v5083_v11, %v1101_v33  ;;  %2909 = vmatpush.msra.mxu1 %v3242_v22  ;;  %v1186_v22 = vld [vmem:[#allocation2 + $0x10] sm:$0xff] }
 0x240   : > { %v2641_v52 = vadd.f32 1.0, %v2640_v14  ;;  %v2648_v25 = vadd.f32 1.0, %v2647_v50  ;;  %v2766_v63 = vsel %vm2764_vm12, %v2765_v23, %v2763_v39  ;;  %v1105_v14 = vadd.f32 %v5083_v11, %v1104_v42 }
 0x241   : > { %v2767_v0 = vclz %v2766_v63  ;;  %v1115_v31 = vmul.f32 0.2, %v1102_v5  ;;  %vm1111_vm5 = vcmp.gt.f32.partialorder %v1102_v5, 0.0  ;;  %v2786_v50 = vsel %vm2663_vm3, %v2785_v59, %v5067_v34  ;;  %2910 = vmatpush.msra.mxu1 %v3241_v30  ;;  %v3240_v34 = vld [vmem:[%s5270_s5 + $0x48] sm:$0xff]  ;;  %v3307_v59 = vld [vmem:[%s5271_s6] ss:$0 sm:$0xff] }
 0x242   : > { %v2649_v20 = vmul.f32 %v2648_v25, %v2633_v15  ;;  %v2657_v58 = vxor.u32 2147483648, %v2641_v52  ;;  %v1116_v25 = vmul.f32 0.2, %v1105_v14  ;;  %vm1112_vm7 = vcmp.gt.f32.partialorder %v1105_v14, 0.0  ;;  %v1184_v30 = vld [vmem:[#allocation2] sm:$0xff] }
 0x243   : > { %v3231_v36 = vadd.s32 4294967294, %v2767_v0  ;;  %v1119_v2 = vsel %vm1111_vm5, %v1102_v5, %v1115_v31  ;;  %v2788_v23 = vsel %vm5105_vm4, 0, %v2786_v50  ;;  %2911 = vmatpush.msra.mxu1 %v3240_v34  ;;  %v2060_v50 = vld [vmem:[#allocation2 + $0x30] sm:$0xff] }
 0x244   : > { %v2654_v40 = vxor.u32 2147483648, %v2649_v20  ;;  %v2658_v38 = vsel %vm2656_vm15, %v2657_v58, %v2649_v20  ;;  %3169 = vmatmul.msk.f32.gmra.mxu1 %vm1130_vm6, %v1119_v2  ;;  %v1120_v58 = vsel %vm1112_vm7, %v1105_v14, %v1116_v25  ;;  %v1187_v2 = vld [vmem:[#allocation2 + $0x18] sm:$0xff] }
 0x245   : > { %vm3232_vm13 = vcmp.lt.s32.totalorder %v3231_v36, 0  ;;  %1216 = vmatpush.msra.mxu2 %v1187_v2  ;;  %v1247_v2 = vld [vmem:[%s5274_s9 + $0x10] sm:$0xff] }
 0x246   : > { %v2655_v21 = vsel %vm2653_vm14, %v2641_v52, %v2654_v40  ;;  %v2770_v56 = vsel %vm3232_vm13, 0, %v3231_v36  ;;  %v2805_v40 = vand.u32 3, %v2788_v23  ;;  %v1107_v36 = vpop.f32.mrf.mxu0  ;;  %vm2804_vm14 = vweird.f32 %v5363_v7  ;;  %v2058_v23 = vld [vmem:[#allocation2 + $0x20] sm:$0xff] }
 0x247   : > { %v2659_v13 = vsel %vm2652_vm0, %v2655_v21, %v2658_v38  ;;  %v2771_v61 = vsub.s32 32, %v2770_v56  ;;  %v2772_v4 = vshll.u32 %v2763_v39, %v2770_v56  ;;  %v2775_v17 = vsub.s32 4294967266, %v2770_v56  ;;  %1217 = vmatpush.msra.mxu2 %v1186_v22  ;;  %v1245_v22 = vld [vmem:[%s5274_s9] sm:$0xff] }
 0x248   : > { %v2660_v32 = vsel %vm2650_vm11, nan, %v2659_v13  ;;  %v1108_v13 = vadd.f32 %v5083_v11, %v1107_v36  ;;  %vm2807_vm9 = vcmp.eq.s32.totalorder %v2805_v40, 0  ;;  %vm2810_vm10 = vcmp.eq.s32.totalorder %v2805_v40, 2 }
 0x249   : > { %3237 = vmatmul.msk.f32.gmra.mxu0 %vm1068_vm1, %v2660_v32  ;;  %v2773_v9 = vshrl.u32 %v2755_v29, %v2771_v61  ;;  %v2776_v6 = vadd.s32 127, %v2775_v17  ;;  %vm2806_vm12 = vcmp.lt.s32.totalorder %v2805_v40, 2  ;;  %v3305_v17 = vld [vmem:[%s5269_s4 + $0x1] ss:$0 sm:$0xff] }
 0x24a   : > { %v1117_v32 = vmul.f32 0.2, %v1108_v13  ;;  %vm1113_vm8 = vcmp.gt.f32.partialorder %v1108_v13, 0.0 }
 0x24b   : > { %v2774_v37 = vor.u32 %v2773_v9, %v2772_v4  ;;  %v2777_v10 = vshll.u32 %v2776_v6, 23 }
 0x24c   : > { %3170 = vmatmul.msk.f32.gmra.mxu1 %vm1130_vm6, %v1120_v58  ;;  %v1121_v4 = vsel %vm1113_vm8, %v1108_v13, %v1117_v32 }
 0x24d   : > { %v2778_v53 = vor.u32 4788187, %v2777_v10  ;;  %v2781_v8 = vcvt.s32.f32 %v2774_v37  ;;  %v3239_v10 = vld [vmem:[%s5270_s5 + $0x40] sm:$0xff] }
 0x24e   : > { %v1970_v37 = vpop.f32.mrf.mxu0  ;;  %2912 = vmatpush.msra.mxu1 %v3239_v10 }
 0x24f   : > { %v2779_v19 = vand.u32 2147483647, %v2778_v53  ;;  %v1971_v51 = vadd.f32 %v3305_v17, %v1970_v37 }
 0x251   : > { %v2782_v1 = vmul.f32 %v2781_v8, %v2779_v19  ;;  %vm1982_vm15 = vcmp.gt.f32.partialorder %v1971_v51, 0.0  ;;  %v1986_v11 = vmul.f32 0.2, %v1971_v51 }
 0x253   : > { %v2783_v55 = vxor.u32 2147483648, %v2782_v1  ;;  %v1990_v44 = vsel %vm1982_vm15, %v1971_v51, %v1986_v11 }
 0x254   : > { %3171 = vmatmul.msk.f32.gmra.mxu1 %vm1130_vm6, %v1121_v4 }
 0x255   : > { %v2784_v43 = vsel %vm2663_vm3, %v2783_v55, %v2782_v1  ;;  %v5155_v55 = vld [vmem:[%s5269_s4 + $0x2] ss:$0 sm:$0xff] }
 0x256   : > { %v2787_v48 = vsel %vm5105_vm4, %v5363_v7, %v2784_v43  ;;  %v1973_v3 = vpop.f32.mrf.mxu0 }
 0x257   : > { %v2789_v24 = vmul.f32 %v2787_v48, %v2787_v48  ;;  %v1974_v7 = vadd.f32 %v3305_v17, %v1973_v3 }
 0x259   : > { %v2790_v35 = vmul.f32 -0.001358992, %v2789_v24  ;;  %v2797_v16 = vmul.f32 -0.00019511016, %v2789_v24  ;;  %v1987_v53 = vmul.f32 0.2, %v1974_v7 }
 0x25a   : > { %vm1983_vm0 = vcmp.gt.f32.partialorder %v1974_v7, 0.0 }
 0x25b   : > { %v2791_v49 = vadd.f32 0.041655596, %v2790_v35  ;;  %v2798_v18 = vadd.f32 0.008332121, %v2797_v16  ;;  %v1991_v8 = vsel %vm1983_vm0, %v1974_v7, %v1987_v53 }
 0x25c   : > { %3203 = vmatmul.msk.f32.vlgmr.msrb.gmra.mxu1 %vm1130_vm6, %v1990_v44 }
 0x25d   : > { %v2792_v41 = vmul.f32 %v2791_v49, %v2789_v24  ;;  %v2799_v27 = vmul.f32 %v2798_v18, %v2789_v24  ;;  %v1185_v18 = vld [vmem:[#allocation2 + $0x8] sm:$0xff] }
 0x25e   : > { %v1976_v45 = vpop.f32.mrf.mxu0  ;;  %1218 = vmatpush.msra.mxu2 %v1185_v18  ;;  %v3215_v18 = vld [vmem:[%s5274_s9 + $0x38] sm:$0xff] }
 0x25f   : > { %v2793_v39 = vadd.f32 -0.4999988, %v2792_v41  ;;  %v2800_v52 = vadd.f32 -0.16666654, %v2799_v27  ;;  %v1977_v62 = vadd.f32 %v3305_v17, %v1976_v45  ;;  %v2061_v27 = vld [vmem:[#allocation2 + $0x38] sm:$0xff] }
 0x260   : > { %1219 = vmatpush.msra.mxu2 %v1184_v30 }
 0x261   : > { %v2794_v12 = vmul.f32 %v2793_v39, %v2789_v24  ;;  %v2801_v20 = vmul.f32 %v2800_v52, %v2789_v24  ;;  %v1988_v19 = vmul.f32 0.2, %v1977_v62  ;;  %vm1984_vm11 = vcmp.gt.f32.partialorder %v1977_v62, 0.0  ;;  %v2059_v52 = vld [vmem:[#allocation2 + $0x28] sm:$0xff] }
 0x262   : > { %2091 = vmatpush.msrb.mxu2 %v2061_v27  ;;  %v3213_v27 = vld [vmem:[%s5274_s9 + $0x28] sm:$0xff] }
 0x263   : > { %v2795_v63 = vadd.f32 1.0, %v2794_v12  ;;  %v2802_v0 = vadd.f32 1.0, %v2801_v20  ;;  %v1992_v26 = vsel %vm1984_vm11, %v1977_v62, %v1988_v19  ;;  %v2942_v20 = vld [vmem:[#allocation2 + $0x58] sm:$0xff] }
 0x264   : > { %3204 = vmatmul.msk.f32.gmra.mxu1 %vm1130_vm6, %v1991_v8  ;;  %2092 = vmatpush.msrb.mxu2 %v2060_v50  ;;  %v3212_v50 = vld [vmem:[%s5274_s9 + $0x20] sm:$0xff] }
 0x265   : > { %v2803_v21 = vmul.f32 %v2802_v0, %v2787_v48  ;;  %v2811_v38 = vxor.u32 2147483648, %v2795_v63 }
 0x266   : > { %2093 = vmatpush.msrb.mxu2 %v2059_v52  ;;  %v3256_v52 = vld [vmem:[%s5274_s9 + $0x58] sm:$0xff] }
 0x267   : > { %v2808_v29 = vxor.u32 2147483648, %v2803_v21  ;;  %v2812_v61 = vsel %vm2810_vm10, %v2811_v38, %v2803_v21  ;;  %v2940_v21 = vld [vmem:[#allocation2 + $0x48] sm:$0xff] }
 0x268   : > { %2094 = vmatpush.msrb.mxu2 %v2058_v23 }
 0x269   : > { %v2809_v56 = vsel %vm2807_vm9, %v2795_v63, %v2808_v29  ;;  %v2941_v63 = vld [vmem:[#allocation2 + $0x50] sm:$0xff] }
 0x26a   : > { %v2813_v9 = vsel %vm2806_vm12, %v2809_v56, %v2812_v61 }
 0x26b   : > { %v2814_v6 = vsel %vm2804_vm14, nan, %v2813_v9  ;;  %v3308_v9 = vld [vmem:[%s5271_s6 + $0x1] ss:$0 sm:$0xff] }
 0x26c   : > { %3238 = vmatmul.msk.f32.gmra.mxu0 %vm1068_vm1, %v2814_v6  ;;  %3205 = vmatmul.msk.f32.gmra.mxu1 %vm1130_vm6, %v1992_v26  ;;  %v2939_v6 = vld [vmem:[#allocation2 + $0x40] sm:$0xff] }
 0x26d   : > { %v1979_v28 = vpop.f32.mrf.mxu0 }
 0x26e   : > { %v1980_v1 = vadd.f32 %v3305_v17, %v1979_v28 }
 0x270   : > { %v1989_v54 = vmul.f32 0.2, %v1980_v1  ;;  %vm1985_vm13 = vcmp.gt.f32.partialorder %v1980_v1, 0.0 }
 0x272   : > { %v1993_v46 = vsel %vm1985_vm13, %v1980_v1, %v1989_v54 }
 0x274   : > { %3206 = vmatmul.msk.f32.gmra.mxu1 %vm1130_vm6, %v1993_v46  ;;  %v3309_v46 = vld [vmem:[%s5271_s6 + $0x2] ss:$0 sm:$0xff] }
 0x278   : > { %v2851_v33 = vpop.f32.mrf.mxu0 }
 0x279   : > { %v2852_v57 = vadd.f32 %v5155_v55, %v2851_v33 }
 0x27b   : > { %vm2863_vm2 = vcmp.gt.f32.partialorder %v2852_v57, 0.0  ;;  %v2867_v15 = vmul.f32 0.2, %v2852_v57 }
 0x27d   : > { %v2871_v43 = vsel %vm2863_vm2, %v2852_v57, %v2867_v15 }
 0x27e   : > { %3244 = vmatmul.msk.f32.vlgmr.msra.gmra.mxu1 %vm1130_vm6, %v2871_v43 }
 0x2a5   : > { %v2854_v5 = vpop.f32.mrf.mxu0 }
 0x2a6   : > { %v2855_v48 = vadd.f32 %v5155_v55, %v2854_v5 }
 0x2a8   : > { %v2868_v47 = vmul.f32 0.2, %v2855_v48  ;;  %vm2864_vm3 = vcmp.gt.f32.partialorder %v2855_v48, 0.0 }
 0x2aa   : > { %v2872_v24 = vsel %vm2864_vm3, %v2855_v48, %v2868_v47 }
 0x2ab   : > { %3245 = vmatmul.msk.f32.gmra.mxu1 %vm1130_vm6, %v2872_v24 }
 0x2b7   : > { %v1160_v49 = vpop.f32.mrf.mxu1 }
 0x2b8   : > { %v1161_v42 = vadd.f32 %v3307_v59, %v1160_v49  ;;  %v3310_v49 = vld [vmem:[%s5273_s8] ss:$0 sm:$0xff] }
 0x2ba   : > { %v1176_v41 = vmul.f32 0.2, %v1161_v42  ;;  %vm1172_vm5 = vcmp.gt.f32.partialorder %v1161_v42, 0.0 }
 0x2bc   : > { %v1180_v14 = vsel %vm1172_vm5, %v1161_v42, %v1176_v41  ;;  %v3214_v42 = vld [vmem:[%s5274_s9 + $0x30] sm:$0xff] }
 0x2bd   : > { %3172 = vmatmul.msk.f32.vlgmr.msra.gmra.mxu2 %vm1130_vm6, %v1180_v14 }
 0x2be   : > { %2972 = vmatpush.msra.mxu2 %v2942_v20 }
 0x2c0   : > { %2973 = vmatpush.msra.mxu2 %v2941_v63 }
 0x2c1   : > { %v1163_v39 = vpop.f32.mrf.mxu1 }
 0x2c2   : > { %v1164_v25 = vadd.f32 %v3307_v59, %v1163_v39  ;;  %2974 = vmatpush.msra.mxu2 %v2940_v21 }
 0x2c4   : > { %v1177_v12 = vmul.f32 0.2, %v1164_v25  ;;  %vm1173_vm7 = vcmp.gt.f32.partialorder %v1164_v25, 0.0  ;;  %2975 = vmatpush.msra.mxu2 %v2939_v6 }
 0x2c6   : > { %v2857_v31 = vpop.f32.mrf.mxu0  ;;  %v1181_v58 = vsel %vm1173_vm7, %v1164_v25, %v1177_v12 }
 0x2c7   : > { %v2858_v60 = vadd.f32 %v5155_v55, %v2857_v31  ;;  %3173 = vmatmul.msk.f32.gmra.mxu2 %vm1130_vm6, %v1181_v58  ;;  %v3255_v58 = vld [vmem:[%s5274_s9 + $0x50] sm:$0xff] }
 0x2c9   : > { %v2869_v35 = vmul.f32 0.2, %v2858_v60  ;;  %vm2865_vm4 = vcmp.gt.f32.partialorder %v2858_v60, 0.0  ;;  %v1166_v0 = vpop.f32.mrf.mxu1 }
 0x2ca   : > { %v1167_v40 = vadd.f32 %v3307_v59, %v1166_v0 }
 0x2cb   : > { %v2873_v16 = vsel %vm2865_vm4, %v2858_v60, %v2869_v35 }
 0x2cc   : > { %3246 = vmatmul.msk.f32.gmra.mxu1 %vm1130_vm6, %v2873_v16  ;;  %v1178_v36 = vmul.f32 0.2, %v1167_v40  ;;  %vm1174_vm8 = vcmp.gt.f32.partialorder %v1167_v40, 0.0  ;;  %v1248_v16 = vld [vmem:[%s5274_s9 + $0x18] sm:$0xff] }
 0x2cd   : > { %1277 = vmatpush.msra.mxu3 %v1248_v16 }
 0x2ce   : > { %v1182_v34 = vsel %vm1174_vm8, %v1167_v40, %v1178_v36 }
 0x2cf   : > { %3174 = vmatmul.msk.f32.gmra.mxu2 %vm1130_vm6, %v1182_v34  ;;  %1278 = vmatpush.msra.mxu3 %v1247_v2 }
 0x2d1   : > { %v1169_v13 = vpop.f32.mrf.mxu1 }
 0x2d2   : > { %v1170_v32 = vadd.f32 %v3307_v59, %v1169_v13  ;;  %v1246_v59 = vld [vmem:[%s5274_s9 + $0x8] sm:$0xff] }
 0x2d3   : > { %1279 = vmatpush.msra.mxu3 %v1246_v59  ;;  %v3254_v13 = vld [vmem:[%s5274_s9 + $0x48] sm:$0xff] }
 0x2d4   : > { %v1179_v61 = vmul.f32 0.2, %v1170_v32  ;;  %vm1175_vm10 = vcmp.gt.f32.partialorder %v1170_v32, 0.0 }
 0x2d5   : > { %1280 = vmatpush.msra.mxu3 %v1245_v22 }
 0x2d6   : > { %v1183_v17 = vsel %vm1175_vm10, %v1170_v32, %v1179_v61 }
 0x2d7   : > { %3175 = vmatmul.msk.f32.gmra.mxu2 %vm1130_vm6, %v1183_v17  ;;  %2154 = vmatpush.msrb.mxu3 %v3215_v18  ;;  %v3311_v17 = vld [vmem:[%s5273_s8 + $0x1] ss:$0 sm:$0xff] }
 0x2d9   : > { %v2033_v37 = vpop.f32.mrf.mxu1  ;;  %2155 = vmatpush.msrb.mxu3 %v3214_v42  ;;  %v3313_v42 = vld [vmem:[%s5275_s10] ss:$0 sm:$0xff] }
 0x2da   : > { %v2034_v10 = vadd.f32 %v3308_v9, %v2033_v37 }
 0x2db   : > { %2156 = vmatpush.msrb.mxu3 %v3213_v27 }
 0x2dc   : > { %vm2045_vm12 = vcmp.gt.f32.partialorder %v2034_v10, 0.0  ;;  %v2049_v51 = vmul.f32 0.2, %v2034_v10 }
 0x2dd   : > { %2157 = vmatpush.msrb.mxu3 %v3212_v50  ;;  %v3314_v50 = vld [vmem:[%s5275_s10 + $0x1] ss:$0 sm:$0xff] }
 0x2de   : > { %v2053_v11 = vsel %vm2045_vm12, %v2034_v10, %v2049_v51 }
 0x2df   : > { %3208 = vmatmul.msk.f32.vlgmr.msrb.gmra.mxu2 %vm1130_vm6, %v2053_v11 }
 0x2e1   : > { %v2036_v44 = vpop.f32.mrf.mxu1 }
 0x2e2   : > { %v2037_v3 = vadd.f32 %v3308_v9, %v2036_v44 }
 0x2e4   : > { %v2050_v7 = vmul.f32 0.2, %v2037_v3  ;;  %vm2046_vm14 = vcmp.gt.f32.partialorder %v2037_v3, 0.0 }
 0x2e6   : > { %v2054_v53 = vsel %vm2046_vm14, %v2037_v3, %v2050_v7 }
 0x2e7   : > { %3209 = vmatmul.msk.f32.gmra.mxu2 %vm1130_vm6, %v2054_v53 }
 0x2e9   : > { %v2860_v38 = vpop.f32.mrf.mxu0  ;;  %v2039_v8 = vpop.f32.mrf.mxu1 }
 0x2ea   : > { %v2861_v29 = vadd.f32 %v5155_v55, %v2860_v38  ;;  %v2040_v45 = vadd.f32 %v3308_v9, %v2039_v8 }
 0x2ec   : > { %v2870_v56 = vmul.f32 0.2, %v2861_v29  ;;  %vm2866_vm9 = vcmp.gt.f32.partialorder %v2861_v29, 0.0  ;;  %v2051_v62 = vmul.f32 0.2, %v2040_v45  ;;  %vm2047_vm15 = vcmp.gt.f32.partialorder %v2040_v45, 0.0 }
 0x2ee   : > { %v2874_v4 = vsel %vm2866_vm9, %v2861_v29, %v2870_v56  ;;  %v2055_v19 = vsel %vm2047_vm15, %v2040_v45, %v2051_v62 }
 0x2ef   : > { %3247 = vmatmul.msk.f32.gmra.mxu1 %vm1130_vm6, %v2874_v4  ;;  %3210 = vmatmul.msk.f32.gmra.mxu2 %vm1130_vm6, %v2055_v19 }
 0x2f1   : > { %v2042_v26 = vpop.f32.mrf.mxu1 }
 0x2f2   : > { %v2043_v28 = vadd.f32 %v3308_v9, %v2042_v26  ;;  %v3253_v9 = vld [vmem:[%s5274_s9 + $0x40] sm:$0xff] }
 0x2f4   : > { %v2052_v1 = vmul.f32 0.2, %v2043_v28  ;;  %vm2048_vm0 = vcmp.gt.f32.partialorder %v2043_v28, 0.0 }
 0x2f6   : > { %v2056_v54 = vsel %vm2048_vm0, %v2043_v28, %v2052_v1 }
 0x2f7   : > { %3211 = vmatmul.msk.f32.gmra.mxu2 %vm1130_vm6, %v2056_v54  ;;  %v3312_v54 = vld [vmem:[%s5273_s8 + $0x2] ss:$0 sm:$0xff] }
 0x2fb   : > { %v2914_v55 = vpop.f32.mrf.mxu1 }
 0x2fc   : > { %v2915_v33 = vadd.f32 %v3309_v46, %v2914_v55 }
 0x2fe   : > { %vm2926_vm11 = vcmp.gt.f32.partialorder %v2915_v33, 0.0  ;;  %v2930_v57 = vmul.f32 0.2, %v2915_v33 }
 0x300   : > { %v2934_v15 = vsel %vm2926_vm11, %v2915_v33, %v2930_v57 }
 0x301   : > { %3249 = vmatmul.msk.f32.vlgmr.msra.gmra.mxu2 %vm1130_vm6, %v2934_v15 }
 0x328   : > { %v2917_v43 = vpop.f32.mrf.mxu1 }
 0x329   : > { %v2918_v5 = vadd.f32 %v3309_v46, %v2917_v43 }
 0x32b   : > { %v2931_v48 = vmul.f32 0.2, %v2918_v5  ;;  %vm2927_vm13 = vcmp.gt.f32.partialorder %v2918_v5, 0.0 }
 0x32d   : > { %v2935_v47 = vsel %vm2927_vm13, %v2918_v5, %v2931_v48 }
 0x32e   : > { %3250 = vmatmul.msk.f32.gmra.mxu2 %vm1130_vm6, %v2935_v47 }
 0x340   : > { %v1221_v30 = vpop.f32.mrf.mxu2 }
 0x341   : > { %v1222_v41 = vadd.f32 %v3310_v49, %v1221_v30 }
 0x343   : > { %v1237_v14 = vmul.f32 0.2, %v1222_v41  ;;  %vm1233_vm3 = vcmp.gt.f32.partialorder %v1222_v41, 0.0 }
 0x345   : > { %v1241_v39 = vsel %vm1233_vm3, %v1222_v41, %v1237_v14 }
 0x346   : > { %3176 = vmatmul.msk.f32.vlgmr.msra.gmra.mxu3 %vm1130_vm6, %v1241_v39 }
 0x347   : > { %3035 = vmatpush.msra.mxu3 %v3256_v52 }
 0x349   : > { %v2920_v24 = vpop.f32.mrf.mxu1  ;;  %3036 = vmatpush.msra.mxu3 %v3255_v58 }
 0x34a   : > { %v2921_v31 = vadd.f32 %v3309_v46, %v2920_v24  ;;  %v1224_v25 = vpop.f32.mrf.mxu2 }
 0x34b   : > { %v1225_v23 = vadd.f32 %v3310_v49, %v1224_v25  ;;  %3037 = vmatpush.msra.mxu3 %v3254_v13 }
 0x34c   : > { %v2932_v60 = vmul.f32 0.2, %v2921_v31  ;;  %vm2928_vm2 = vcmp.gt.f32.partialorder %v2921_v31, 0.0 }
 0x34d   : > { %v1238_v12 = vmul.f32 0.2, %v1225_v23  ;;  %vm1234_vm4 = vcmp.gt.f32.partialorder %v1225_v23, 0.0  ;;  %3038 = vmatpush.msra.mxu3 %v3253_v9 }
 0x34e   : > { %v2936_v35 = vsel %vm2928_vm2, %v2921_v31, %v2932_v60 }
 0x34f   : > { %3251 = vmatmul.msk.f32.gmra.mxu2 %vm1130_vm6, %v2936_v35  ;;  %v1242_v20 = vsel %vm1234_vm4, %v1225_v23, %v1238_v12 }
 0x350   : > { %3177 = vmatmul.msk.f32.gmra.mxu3 %vm1130_vm6, %v1242_v20 }
 0x352   : > { %v1227_v63 = vpop.f32.mrf.mxu2 }
 0x353   : > { %v1228_v0 = vadd.f32 %v3310_v49, %v1227_v63 }
 0x355   : > { %v1239_v34 = vmul.f32 0.2, %v1228_v0  ;;  %vm1235_vm5 = vcmp.gt.f32.partialorder %v1228_v0, 0.0 }
 0x357   : > { %v1243_v38 = vsel %vm1235_vm5, %v1228_v0, %v1239_v34  ;;  %v3315_v0 = vld [vmem:[%s5275_s10 + $0x2] ss:$0 sm:$0xff] }
 0x358   : > { %3178 = vmatmul.msk.f32.gmra.mxu3 %vm1130_vm6, %v1243_v38 }
 0x35a   : > { %v1230_v32 = vpop.f32.mrf.mxu2 }
 0x35b   : > { %v1231_v56 = vadd.f32 %v3310_v49, %v1230_v32 }
 0x35d   : > { %v1240_v61 = vmul.f32 0.2, %v1231_v56  ;;  %vm1236_vm8 = vcmp.gt.f32.partialorder %v1231_v56, 0.0 }
 0x35f   : > { %v1244_v4 = vsel %vm1236_vm8, %v1231_v56, %v1240_v61 }
 0x360   : > { %3179 = vmatmul.msk.f32.gmra.mxu3 %vm1130_vm6, %v1244_v4 }
 0x362   : > { %v2096_v6 = vpop.f32.mrf.mxu2 }
 0x363   : > { %v2097_v37 = vadd.f32 %v3311_v17, %v2096_v6 }
 0x365   : > { %vm2108_vm9 = vcmp.gt.f32.partialorder %v2097_v37, 0.0  ;;  %v2112_v10 = vmul.f32 0.2, %v2097_v37 }
 0x367   : > { %v2116_v51 = vsel %vm2108_vm9, %v2097_v37, %v2112_v10 }
 0x368   : > { %3217 = vmatmul.msk.f32.vlgmr.msrb.gmra.mxu3 %vm1130_vm6, %v2116_v51 }
 0x36a   : > { %v2099_v11 = vpop.f32.mrf.mxu2 }
 0x36b   : > { %v2100_v44 = vadd.f32 %v3311_v17, %v2099_v11 }
 0x36c   : > { %v2923_v40 = vpop.f32.mrf.mxu1 }
 0x36d   : > { %v2924_v36 = vadd.f32 %v3309_v46, %v2923_v40  ;;  %v2113_v3 = vmul.f32 0.2, %v2100_v44  ;;  %vm2109_vm10 = vcmp.gt.f32.partialorder %v2100_v44, 0.0 }
 0x36f   : > { %v2933_v21 = vmul.f32 0.2, %v2924_v36  ;;  %vm2929_vm7 = vcmp.gt.f32.partialorder %v2924_v36, 0.0  ;;  %v2117_v7 = vsel %vm2109_vm10, %v2100_v44, %v2113_v3 }
 0x370   : > { %3218 = vmatmul.msk.f32.gmra.mxu3 %vm1130_vm6, %v2117_v7 }
 0x371   : > { %v2937_v29 = vsel %vm2929_vm7, %v2924_v36, %v2933_v21 }
 0x372   : > { %3252 = vmatmul.msk.f32.gmra.mxu2 %vm1130_vm6, %v2937_v29  ;;  %v2102_v53 = vpop.f32.mrf.mxu2 }
 0x373   : > { %v2103_v8 = vadd.f32 %v3311_v17, %v2102_v53 }
 0x375   : > { %v2114_v45 = vmul.f32 0.2, %v2103_v8  ;;  %vm2110_vm12 = vcmp.gt.f32.partialorder %v2103_v8, 0.0 }
 0x377   : > { %v2118_v62 = vsel %vm2110_vm12, %v2103_v8, %v2114_v45 }
 0x378   : > { %3219 = vmatmul.msk.f32.gmra.mxu3 %vm1130_vm6, %v2118_v62 }
 0x37a   : > { %v2105_v19 = vpop.f32.mrf.mxu2 }
 0x37b   : > { %v2106_v26 = vadd.f32 %v3311_v17, %v2105_v19 }
 0x37d   : > { %v2115_v28 = vmul.f32 0.2, %v2106_v26  ;;  %vm2111_vm14 = vcmp.gt.f32.partialorder %v2106_v26, 0.0 }
 0x37f   : > { %v2119_v1 = vsel %vm2111_vm14, %v2106_v26, %v2115_v28 }
 0x380   : > { %3220 = vmatmul.msk.f32.gmra.mxu3 %vm1130_vm6, %v2119_v1 }
 0x384   : > { %v2977_v46 = vpop.f32.mrf.mxu2 }
 0x385   : > { %v2978_v55 = vadd.f32 %v3312_v54, %v2977_v46 }
 0x387   : > { %vm2989_vm15 = vcmp.gt.f32.partialorder %v2978_v55, 0.0  ;;  %v2993_v33 = vmul.f32 0.2, %v2978_v55 }
 0x389   : > { %v2997_v57 = vsel %vm2989_vm15, %v2978_v55, %v2993_v33 }
 0x38a   : > { %3258 = vmatmul.msk.f32.vlgmr.msra.gmra.mxu3 %vm1130_vm6, %v2997_v57 }
 0x3b1   : > { %v2980_v15 = vpop.f32.mrf.mxu2 }
 0x3b2   : > { %v2981_v43 = vadd.f32 %v3312_v54, %v2980_v15 }
 0x3b4   : > { %v2994_v5 = vmul.f32 0.2, %v2981_v43  ;;  %vm2990_vm0 = vcmp.gt.f32.partialorder %v2981_v43, 0.0 }
 0x3b6   : > { %v2998_v48 = vsel %vm2990_vm0, %v2981_v43, %v2994_v5 }
 0x3b7   : > { %3259 = vmatmul.msk.f32.gmra.mxu3 %vm1130_vm6, %v2998_v48 }
 0x3c9   : > { %v1282_v35 = vpop.f32.mrf.mxu3 }
 0x3ca   : > { %v1283_v40 = vadd.f32 %v3313_v42, %v1282_v35 }
 0x3d2   : > { %v2983_v47 = vpop.f32.mrf.mxu2 }
 0x3d3   : > { %v2984_v24 = vadd.f32 %v3312_v54, %v2983_v47  ;;  %v1285_v16 = vpop.f32.mrf.mxu3 }
 0x3d4   : > { %v1286_v32 = vadd.f32 %v3313_v42, %v1285_v16 }
 0x3d5   : > { %v2995_v31 = vmul.f32 0.2, %v2984_v24  ;;  %vm2991_vm11 = vcmp.gt.f32.partialorder %v2984_v24, 0.0 }
 0x3d7   : > { %v2999_v60 = vsel %vm2991_vm11, %v2984_v24, %v2995_v31 }
 0x3d8   : > { %3260 = vmatmul.msk.f32.gmra.mxu3 %vm1130_vm6, %v2999_v60 }
 0x3db   : > { %v1288_v2 = vpop.f32.mrf.mxu3 }
 0x3dc   : > { %v1289_v52 = vadd.f32 %v3313_v42, %v1288_v2 }
 0x3e3   : > { %v1291_v30 = vpop.f32.mrf.mxu3 }
 0x3e4   : > { %v1292_v41 = vadd.f32 %v3313_v42, %v1291_v30 }
 0x3eb   : > { %v2159_v27 = vpop.f32.mrf.mxu3 }
 0x3ec   : > { %v2160_v63 = vadd.f32 %v3314_v50, %v2159_v27 }
 0x3ee   : > { %v2171_v34 = vmul.f32 %v2160_v63, %v1283_v40 }
 0x3f3   : > { %v2162_v14 = vpop.f32.mrf.mxu3 }
 0x3f4   : > { %v2163_v29 = vadd.f32 %v3314_v50, %v2162_v14 }
 0x3f5   : > { %v2986_v59 = vpop.f32.mrf.mxu2 }
 0x3f6   : > { %v2987_v22 = vadd.f32 %v3312_v54, %v2986_v59  ;;  %v2172_v61 = vmul.f32 %v2163_v29, %v1286_v32 }
 0x3f8   : > { %v2996_v49 = vmul.f32 0.2, %v2987_v22  ;;  %vm2992_vm13 = vcmp.gt.f32.partialorder %v2987_v22, 0.0 }
 0x3fa   : > { %v3000_v18 = vsel %vm2992_vm13, %v2987_v22, %v2996_v49 }
 0x3fb   : > { %3261 = vmatmul.msk.f32.gmra.mxu3 %vm1130_vm6, %v3000_v18  ;;  %v2165_v39 = vpop.f32.mrf.mxu3  ;;  %vm3068_vm6 = vcmask 7168  }
 0x3fc   : > { %v2166_v25 = vadd.f32 %v3314_v50, %v2165_v39 }
 0x3fe   : > { %v2173_v23 = vmul.f32 %v2166_v25, %v1289_v52 }
 0x403   : > { %v2168_v12 = vpop.f32.mrf.mxu3 }
 0x404   : > { %v2169_v20 = vadd.f32 %v3314_v50, %v2168_v12 }
 0x406   : > { %v2174_v58 = vmul.f32 %v2169_v20, %v1292_v41 }
 0x40d   : > { %v3040_v36 = vpop.f32.mrf.mxu3 }
 0x40e   : > { %v3041_v21 = vadd.f32 %v3315_v0, %v3040_v36 }
 0x410   : > { %v3052_v38 = vmul.f32 %v3041_v21, %v2171_v34 }
 0x412   : > { %v3056_v13 = vsel %vm1068_vm1, %v3052_v38, 0.0 }
 0x413   : > { %3057 = vadd.xlane.f32.xlu1 %v3056_v13 }
 0x43a   : > { %v3043_v56 = vpop.f32.mrf.mxu3 }
 0x43b   : > { %v3044_v4 = vadd.f32 %v3315_v0, %v3043_v56 }
 0x43d   : > { %v3053_v17 = vmul.f32 %v3044_v4, %v2172_v61 }
 0x43f   : > { %v3059_v9 = vsel %vm1068_vm1, %v3053_v17, 0.0 }
 0x440   : > { %3060 = vadd.xlane.f32.xlu2 %v3059_v9 }
 0x45b   : > { %v3046_v6 = vpop.f32.mrf.mxu3 }
 0x45c   : > { %v3047_v37 = vadd.f32 %v3315_v0, %v3046_v6 }
 0x45e   : > { %v3054_v10 = vmul.f32 %v3047_v37, %v2173_v23 }
 0x460   : > { %v3062_v51 = vsel %vm1068_vm1, %v3054_v10, 0.0 }
 0x461   : > { %3063 = vadd.xlane.f32.xlu0 %v3062_v51 }
 0x47e   : > { %v3049_v11 = vpop.f32.mrf.mxu3 }
 0x47f   : > { %v3050_v44 = vadd.f32 %v3315_v0, %v3049_v11 }
 0x481   : > { %v3055_v3 = vmul.f32 %v3050_v44, %v2174_v58 }
 0x483   : > { %v3065_v7 = vsel %vm1068_vm1, %v3055_v3, 0.0 }
 0x484   : > { %3066 = vadd.xlane.f32.xlu2 %v3065_v7 }
 0x486   : > { %v3058_v53 = vpop.xlane.xlu1 %3057 }
 0x487   : > { %3069 = vst.msk [vmem:[%s405_s16] sm:$0xff] %vm3068_vm6, %v3058_v53 }
 0x4b3   : > { %v3061_v8 = vpop.xlane.xlu2 %3060 }
 0x4b4   : > { %3070 = vst.msk [vmem:[%s405_s16 + $0x8] sm:$0xff] %vm3068_vm6, %v3061_v8 }
 0x4d4   : > { %v3064_v45 = vpop.xlane.xlu0 %3063 }
 0x4d5   : > { %3071 = vst.msk [vmem:[%s405_s16 + $0x10] sm:$0xff] %vm3068_vm6, %v3064_v45 }
 0x4f7   : > { %v3067_v62 = vpop.xlane.xlu2 %3066 }
 0x4f8   : > { %3072 = vst.msk [vmem:[%s405_s16 + $0x18] sm:$0xff] %vm3068_vm6, %v3067_v62 }
 0x4f9 PF: > { %s22_s17 = sadd.s32 1, %s3356_s17  }
 0x4fa   : > { %p19_p7 = scmp.ge.s32.totalorder %s22_s17, 4  }
 0x4fc   :  { %21 = sbr.rel (!%p19_p7) target bundleno = 1 (0x1), region = 115 }
 0x501   :  { %3095 = vsyncpa [#allocation3], 1 }
 0x502   :  { %3097 = vsyncpa [#allocation3 + $0x1], 1 }

</bundles_post_ra>
